<compile_context>
chip_gen: v6e
topology: v6e:2x2x1
jax: 0.10.0
libtpu: 0.0.40
codegen_flags: <defaults>
</compile_context>

<pallas_src>
import math

import jax
import jax.numpy as jnp
from jax.experimental import pallas as pl
from jax.experimental.pallas import tpu as pltpu

HIDDEN = 30        # hardcoded in the PyTorch forward (h0/c0 built with hidden_size=30)
HPAD = 128         # lane-padded hidden width
SEQ = 5            # fully_connected input width is hidden_size * 5
NUM_LAYERS = 3
GATES = 4 * HPAD   # 512
FC1_PAD = 256      # 150 -> 256 lanes
FC2_PAD = 128      # 50  -> 128 lanes
OUT_PAD = 128      # 1   -> 128 lanes (lane-dense store; wrapper slices col 0)


def _sigmoid(x):
    # One EUP op (tanh) plus a cheap VPU FMA; exact sigmoid, shorter serial
    # chain than exp + reciprocal.  sigmoid(0)=0.5 keeps padded lanes at 0
    # (f*c with c==0 and i*g with g==0).
    return 0.5 * jnp.tanh(0.5 * x) + 0.5


def lstm_numeric_kernel(
        # VMEM-resident inputs (needed immediately)
        x_ref, wih0_ref, whh0_ref, b0_ref,
        # deferred inputs (pl.ANY): DMA'd manually to overlap layer-0 compute
        wih1_hbm, whh1_hbm, b1_hbm,
        wih2_hbm, whh2_hbm, b2_hbm,
        fw1_hbm, fb1_hbm, fw2_hbm, fb2_hbm, fw3_hbm, fb3_hbm,
        # output
        out_ref,
        # VMEM scratch destinations for the deferred weights + DMA semaphores
        wih1_v, whh1_v, b1_v, wih2_v, whh2_v, b2_v,
        fw1_v, fb1_v, fw2_v, fb2_v, fw3_v, fb3_v,
        copy_sems):
    # ---- kick off all deferred weight DMAs up front ----------------------
    hbm_srcs = (wih1_hbm, whh1_hbm, b1_hbm, wih2_hbm, whh2_hbm, b2_hbm,
                fw1_hbm, fb1_hbm, fw2_hbm, fb2_hbm, fw3_hbm, fb3_hbm)
    vmem_dsts = (wih1_v, whh1_v, b1_v, wih2_v, whh2_v, b2_v,
                 fw1_v, fb1_v, fw2_v, fb2_v, fw3_v, fb3_v)
    copies = [pltpu.make_async_copy(src, dst, copy_sems.at[i])
              for i, (src, dst) in enumerate(zip(hbm_srcs, vmem_dsts))]
    for cp in copies:
        cp.start()

    x = x_ref[...]                       # (T, B, DPAD) bf16, time-major
    T, B = x.shape[0], x.shape[1]

    def mm(a, w):
        # bf16 x bf16 operands, f32 accumulation on the MXU.
        return jnp.dot(a.astype(jnp.bfloat16), w,
                       preferred_element_type=jnp.float32)

    def run_layer(prev_2d, wih, whh, b):
        """prev_2d: (T*B, in) matmul-ready inputs for all timesteps."""
        # One fused input projection for all T steps (off the serial chain).
        xproj = mm(prev_2d, wih) + b                      # (T*B, 4*HPAD) f32
        h = jnp.zeros((B, HPAD), jnp.float32)
        c = jnp.zeros((B, HPAD), jnp.float32)
        outs = []
        for t in range(T):
            # Single fused-gate matmul on the recurrent critical path.
            gates = xproj[t * B:(t + 1) * B] + mm(h, whh)     # (B, 4*HPAD)
            i = _sigmoid(gates[:, 0 * HPAD:1 * HPAD])
            f = _sigmoid(gates[:, 1 * HPAD:2 * HPAD])
            g = jnp.tanh(gates[:, 2 * HPAD:3 * HPAD])
            o = _sigmoid(gates[:, 3 * HPAD:4 * HPAD])
            c = f * c + i * g
            h = o * jnp.tanh(c)
            outs.append(h)
        return outs
        # TODO(synk): for large batch tiles, stage xproj / per-step h in explicit
        # pltpu.VMEM scratch (bound vreg pressure) and keep Whh resident in the
        # MXU across the 5 steps via pltpu.matmul_push_rhs/acc_lhs/pop.

    # Layer 0 (weights already in VMEM).
    seq = run_layer(x.reshape(T * B, x.shape[2]),
                    wih0_ref[...], whh0_ref[...], b0_ref[...])

    # Layer 1: wait only on its own weights, just before use.
    for k in range(0, 3):
        copies[k].wait()
    seq = run_layer(jnp.concatenate(seq, axis=0),
                    wih1_v[...], whh1_v[...], b1_v[...])

    # Layer 2.
    for k in range(3, 6):
        copies[k].wait()
    seq = run_layer(jnp.concatenate(seq, axis=0),
                    wih2_v[...], whh2_v[...], b2_v[...])

    # Fully connected head (Dropout layers are identity in eval mode).
    for k in range(6, 12):
        copies[k].wait()
    flat = jnp.concatenate(seq, axis=-1)                  # (B, T*HPAD), lane-aligned
    z1 = jnp.tanh(mm(flat, fw1_v[...]) + fb1_v[...])      # (B, 256), cols >=150 are 0
    z2 = jnp.tanh(mm(z1, fw2_v[...]) + fb2_v[...])        # (B, 128), cols >=50 are 0
    out = mm(z2, fw3_v[...]) + fb3_v[...]                 # (B, 128), col 0 valid
    out_ref[...] = out.astype(out_ref.dtype)


def lstm_numeric_forward(x, kp):
    """x: (B, T, input_size) batch_first. kp: packed/padded params. Returns (B, 1)."""
    B, T, D = x.shape
    assert T == SEQ
    B_pad = max(8, -(-B // 8) * 8)            # >= 8 sublanes (padded rows discarded)
    DPAD = kp["wih0"].shape[0]                # 128-lane padded input width

    x_tm = jnp.zeros((T, B_pad, DPAD), jnp.bfloat16)
    x_tm = x_tm.at[:, :B, :D].set(jnp.transpose(x, (1, 0, 2)).astype(jnp.bfloat16))

    args = (x_tm, kp["wih0"], kp["whh0"], kp["b0"],
            kp["wih1"], kp["whh1"], kp["b1"],
            kp["wih2"], kp["whh2"], kp["b2"],
            kp["fw1"], kp["fb1"], kp["fw2"], kp["fb2"], kp["fw3"], kp["fb3"])

    vmem = pl.BlockSpec(memory_space=pltpu.MemorySpace.VMEM)
    hbm = pl.BlockSpec(memory_space=pl.ANY)
    in_specs = [vmem] * 4 + [hbm] * 12

    deferred = args[4:]
    scratch_shapes = [pltpu.VMEM(a.shape, a.dtype) for a in deferred]
    scratch_shapes.append(pltpu.SemaphoreType.DMA((len(deferred),)))

    out = pl.pallas_call(
        lstm_numeric_kernel,
        out_shape=jax.ShapeDtypeStruct((B_pad, OUT_PAD), jnp.float32),
        in_specs=in_specs,
        out_specs=vmem,
        scratch_shapes=scratch_shapes,
    )(*args)
    return out[:B, :1]
    # TODO(synk): on v7x with large batch, add a leading batch grid with
    # dimension_semantics=("parallel",) and constant-index weight BlockSpecs so
    # both TensorCores are used and weights stay VMEM-resident across steps
    # (budget tiles against v7x's 64 MiB VMEM).


def init_params(key, input_size, hidden=HIDDEN):
    """Deterministic synthetic parameters, logical (PyTorch-equivalent) layout."""
    ks = jax.random.split(key, 12)

    def u(k, shape, bound):
        return jax.random.uniform(k, shape, jnp.float32, -bound, bound)

    kb = 1.0 / math.sqrt(hidden)
    flat = hidden * SEQ  # 150
    return {
        # LSTM layer 0 (per-gate, gate order i,f,g,o; bias_ih+bias_hh folded)
        "wih0": u(ks[0], (4, input_size, hidden), kb),
        "whh0": u(ks[1], (4, hidden, hidden), kb),
        "b0":   u(ks[2], (4, hidden), kb),
        # LSTM layers 1 & 2
        "wih12": u(ks[3], (2, 4, hidden, hidden), kb),
        "whh12": u(ks[4], (2, 4, hidden, hidden), kb),
        "b12":   u(ks[5], (2, 4, hidden), kb),
        # Linear(150,150) / Linear(150,50) / Linear(50,1), weights stored (in, out)
        "fw1": u(ks[6], (flat, 150), 1.0 / math.sqrt(flat)),
        "fb1": u(ks[7], (1, 150), 1.0 / math.sqrt(flat)),
        "fw2": u(ks[8], (150, 50), 1.0 / math.sqrt(150.0)),
        "fb2": u(ks[9], (1, 50), 1.0 / math.sqrt(150.0)),
        "fw3": u(ks[10], (50, 1), 1.0 / math.sqrt(50.0)),
        "fb3": u(ks[11], (1, 1), 1.0 / math.sqrt(50.0)),
    }


def pack_params(p):
    """Host-side repacking: fuse gates, zero-pad to 128 lanes, bf16 weights."""
    H, T, HP = HIDDEN, SEQ, HPAD
    in_dim = p["wih0"].shape[1]
    DPAD = max(128, -(-in_dim // 128) * 128)

    def pack_layer(wih, whh, b, in_dim, rows):
        wih_p = jnp.zeros((rows, GATES), jnp.float32)
        whh_p = jnp.zeros((HP, GATES), jnp.float32)
        b_p = jnp.zeros((1, GATES), jnp.float32)
        for g in range(4):
            lo = g * HP
            wih_p = wih_p.at[:in_dim, lo:lo + H].set(wih[g])
            whh_p = whh_p.at[:H, lo:lo + H].set(whh[g])
            b_p = b_p.at[0, lo:lo + H].set(b[g])
        # Weights in bf16 (MXU operands); biases stay f32 (VPU add).
        return wih_p.astype(jnp.bfloat16), whh_p.astype(jnp.bfloat16), b_p

    kp = {}
    kp["wih0"], kp["whh0"], kp["b0"] = pack_layer(
        p["wih0"], p["whh0"], p["b0"], in_dim, DPAD)
    for l in range(NUM_LAYERS - 1):
        w, wh, b = pack_layer(p["wih12"][l], p["whh12"][l], p["b12"][l], H, HP)
        kp[f"wih{l + 1}"], kp[f"whh{l + 1}"], kp[f"b{l + 1}"] = w, wh, b

    # FC1: rows reordered to the time-major, 128-lane-padded flatten layout.
    fw1_p = jnp.zeros((T * HP, FC1_PAD), jnp.float32)
    for t in range(T):
        fw1_p = fw1_p.at[t * HP:t * HP + H, :150].set(p["fw1"][t * H:(t + 1) * H, :])
    fb1_p = jnp.zeros((1, FC1_PAD), jnp.float32).at[:, :150].set(p["fb1"])
    fw2_p = jnp.zeros((FC1_PAD, FC2_PAD), jnp.float32).at[:150, :50].set(p["fw2"])
    fb2_p = jnp.zeros((1, FC2_PAD), jnp.float32).at[:, :50].set(p["fb2"])
    fw3_p = jnp.zeros((FC2_PAD, OUT_PAD), jnp.float32).at[:50, :1].set(p["fw3"])
    fb3_p = jnp.zeros((1, OUT_PAD), jnp.float32).at[:, :1].set(p["fb3"])
    kp.update(fw1=fw1_p.astype(jnp.bfloat16), fb1=fb1_p,
              fw2=fw2_p.astype(jnp.bfloat16), fb2=fb2_p,
              fw3=fw3_p.astype(jnp.bfloat16), fb3=fb3_p)
    return kp


def ref_forward(x, p):
    """Pure-JAX reference of the PyTorch forward pass (for correctness check)."""
    B, T, _ = x.shape

    def layer(seq, wih, whh, b):
        h = jnp.zeros((B, HIDDEN), jnp.float32)
        c = jnp.zeros((B, HIDDEN), jnp.float32)
        outs = []
        for t in range(T):
            xt = seq[t]
            g = [xt @ wih[k] + h @ whh[k] + b[k] for k in range(4)]
            i = jax.nn.sigmoid(g[0])
            f = jax.nn.sigmoid(g[1])
            gg = jnp.tanh(g[2])
            o = jax.nn.sigmoid(g[3])
            c = f * c + i * gg
            h = o * jnp.tanh(c)
            outs.append(h)
        return outs

    seq = [x[:, t, :] for t in range(T)]
    seq = layer(seq, p["wih0"], p["whh0"], p["b0"])
    for l in range(NUM_LAYERS - 1):
        seq = layer(seq, p["wih12"][l], p["whh12"][l], p["b12"][l])
    flat = jnp.concatenate(seq, axis=-1)            # (B, T*H) time-major flatten
    z1 = jnp.tanh(flat @ p["fw1"] + p["fb1"])
    z2 = jnp.tanh(z1 @ p["fw2"] + p["fb2"])
    return z2 @ p["fw3"] + p["fb3"]


if __name__ == "__main__":
    key = jax.random.PRNGKey(0)
    kx, kparam = jax.random.split(key)

    B, T, D = 2, SEQ, 8                   # x: (batch=2, seq=5, input_size=8)
    x = jax.random.normal(kx, (B, T, D), jnp.float32)
    params = init_params(kparam, D)
    kernel_params = pack_params(params)

    out = lstm_numeric_forward(x, kernel_params)
    out = jax.block_until_ready(out)
    assert out.shape == (B, 1), out.shape

    ref = ref_forward(x, params)
    assert jnp.allclose(out, ref, atol=2e-2, rtol=2e-2), (out, ref)

    print("KERNEL_OK")
</pallas_src>

<mosaic_0001>
module attributes {stable_mosaic.version = 11 : i64} {
  func.func @lstm_numeric_kernel(%arg0: memref<5x8x128xbf16, #tpu.memory_space<vmem>>, %arg1: memref<128x512xbf16, #tpu.memory_space<vmem>>, %arg2: memref<128x512xbf16, #tpu.memory_space<vmem>>, %arg3: memref<1x512xf32, #tpu.memory_space<vmem>>, %arg4: memref<128x512xbf16, #tpu.memory_space<any>>, %arg5: memref<128x512xbf16, #tpu.memory_space<any>>, %arg6: memref<1x512xf32, #tpu.memory_space<any>>, %arg7: memref<128x512xbf16, #tpu.memory_space<any>>, %arg8: memref<128x512xbf16, #tpu.memory_space<any>>, %arg9: memref<1x512xf32, #tpu.memory_space<any>>, %arg10: memref<640x256xbf16, #tpu.memory_space<any>>, %arg11: memref<1x256xf32, #tpu.memory_space<any>>, %arg12: memref<256x128xbf16, #tpu.memory_space<any>>, %arg13: memref<1x128xf32, #tpu.memory_space<any>>, %arg14: memref<128x128xbf16, #tpu.memory_space<any>>, %arg15: memref<1x128xf32, #tpu.memory_space<any>>, %arg16: memref<8x128xf32, #tpu.memory_space<vmem>>, %arg17: memref<128x512xbf16, #tpu.memory_space<vmem>>, %arg18: memref<128x512xbf16, #tpu.memory_space<vmem>>, %arg19: memref<1x512xf32, #tpu.memory_space<vmem>>, %arg20: memref<128x512xbf16, #tpu.memory_space<vmem>>, %arg21: memref<128x512xbf16, #tpu.memory_space<vmem>>, %arg22: memref<1x512xf32, #tpu.memory_space<vmem>>, %arg23: memref<640x256xbf16, #tpu.memory_space<vmem>>, %arg24: memref<1x256xf32, #tpu.memory_space<vmem>>, %arg25: memref<256x128xbf16, #tpu.memory_space<vmem>>, %arg26: memref<1x128xf32, #tpu.memory_space<vmem>>, %arg27: memref<128x128xbf16, #tpu.memory_space<vmem>>, %arg28: memref<1x128xf32, #tpu.memory_space<vmem>>, %arg29: memref<12x!tpu.dma_semaphore, #tpu.memory_space<semaphore_mem>>) attributes {dimension_semantics = [], scalar_prefetch = 0 : i64, scratch_operands = 13 : i64, tpu.core_type = #tpu.core_type<tc>} {
    %c0_i32 = arith.constant 0 : i32
    %0 = tpu.memref_slice %arg29[%c0_i32] : memref<12x!tpu.dma_semaphore, #tpu.memory_space<semaphore_mem>> -> memref<1x!tpu.dma_semaphore, #tpu.memory_space<semaphore_mem>>
    %1 = tpu.memref_squeeze %0 : memref<1x!tpu.dma_semaphore, #tpu.memory_space<semaphore_mem>> -> memref<!tpu.dma_semaphore, #tpu.memory_space<semaphore_mem>>
    tpu.enqueue_dma source(%arg4 : memref<128x512xbf16, #tpu.memory_space<any>>) target(%arg17 : memref<128x512xbf16, #tpu.memory_space<vmem>>) target_semaphore(%1 : memref<!tpu.dma_semaphore, #tpu.memory_space<semaphore_mem>>)
    %c1_i32 = arith.constant 1 : i32
    %2 = tpu.memref_slice %arg29[%c1_i32] : memref<12x!tpu.dma_semaphore, #tpu.memory_space<semaphore_mem>> -> memref<1x!tpu.dma_semaphore, #tpu.memory_space<semaphore_mem>>
    %3 = tpu.memref_squeeze %2 : memref<1x!tpu.dma_semaphore, #tpu.memory_space<semaphore_mem>> -> memref<!tpu.dma_semaphore, #tpu.memory_space<semaphore_mem>>
    tpu.enqueue_dma source(%arg5 : memref<128x512xbf16, #tpu.memory_space<any>>) target(%arg18 : memref<128x512xbf16, #tpu.memory_space<vmem>>) target_semaphore(%3 : memref<!tpu.dma_semaphore, #tpu.memory_space<semaphore_mem>>)
    %c2_i32 = arith.constant 2 : i32
    %4 = tpu.memref_slice %arg29[%c2_i32] : memref<12x!tpu.dma_semaphore, #tpu.memory_space<semaphore_mem>> -> memref<1x!tpu.dma_semaphore, #tpu.memory_space<semaphore_mem>>
    %5 = tpu.memref_squeeze %4 : memref<1x!tpu.dma_semaphore, #tpu.memory_space<semaphore_mem>> -> memref<!tpu.dma_semaphore, #tpu.memory_space<semaphore_mem>>
    tpu.enqueue_dma source(%arg6 : memref<1x512xf32, #tpu.memory_space<any>>) target(%arg19 : memref<1x512xf32, #tpu.memory_space<vmem>>) target_semaphore(%5 : memref<!tpu.dma_semaphore, #tpu.memory_space<semaphore_mem>>)
    %c3_i32 = arith.constant 3 : i32
    %6 = tpu.memref_slice %arg29[%c3_i32] : memref<12x!tpu.dma_semaphore, #tpu.memory_space<semaphore_mem>> -> memref<1x!tpu.dma_semaphore, #tpu.memory_space<semaphore_mem>>
    %7 = tpu.memref_squeeze %6 : memref<1x!tpu.dma_semaphore, #tpu.memory_space<semaphore_mem>> -> memref<!tpu.dma_semaphore, #tpu.memory_space<semaphore_mem>>
    tpu.enqueue_dma source(%arg7 : memref<128x512xbf16, #tpu.memory_space<any>>) target(%arg20 : memref<128x512xbf16, #tpu.memory_space<vmem>>) target_semaphore(%7 : memref<!tpu.dma_semaphore, #tpu.memory_space<semaphore_mem>>)
    %c4_i32 = arith.constant 4 : i32
    %8 = tpu.memref_slice %arg29[%c4_i32] : memref<12x!tpu.dma_semaphore, #tpu.memory_space<semaphore_mem>> -> memref<1x!tpu.dma_semaphore, #tpu.memory_space<semaphore_mem>>
    %9 = tpu.memref_squeeze %8 : memref<1x!tpu.dma_semaphore, #tpu.memory_space<semaphore_mem>> -> memref<!tpu.dma_semaphore, #tpu.memory_space<semaphore_mem>>
    tpu.enqueue_dma source(%arg8 : memref<128x512xbf16, #tpu.memory_space<any>>) target(%arg21 : memref<128x512xbf16, #tpu.memory_space<vmem>>) target_semaphore(%9 : memref<!tpu.dma_semaphore, #tpu.memory_space<semaphore_mem>>)
    %c5_i32 = arith.constant 5 : i32
    %10 = tpu.memref_slice %arg29[%c5_i32] : memref<12x!tpu.dma_semaphore, #tpu.memory_space<semaphore_mem>> -> memref<1x!tpu.dma_semaphore, #tpu.memory_space<semaphore_mem>>
    %11 = tpu.memref_squeeze %10 : memref<1x!tpu.dma_semaphore, #tpu.memory_space<semaphore_mem>> -> memref<!tpu.dma_semaphore, #tpu.memory_space<semaphore_mem>>
    tpu.enqueue_dma source(%arg9 : memref<1x512xf32, #tpu.memory_space<any>>) target(%arg22 : memref<1x512xf32, #tpu.memory_space<vmem>>) target_semaphore(%11 : memref<!tpu.dma_semaphore, #tpu.memory_space<semaphore_mem>>)
    %c6_i32 = arith.constant 6 : i32
    %12 = tpu.memref_slice %arg29[%c6_i32] : memref<12x!tpu.dma_semaphore, #tpu.memory_space<semaphore_mem>> -> memref<1x!tpu.dma_semaphore, #tpu.memory_space<semaphore_mem>>
    %13 = tpu.memref_squeeze %12 : memref<1x!tpu.dma_semaphore, #tpu.memory_space<semaphore_mem>> -> memref<!tpu.dma_semaphore, #tpu.memory_space<semaphore_mem>>
    tpu.enqueue_dma source(%arg10 : memref<640x256xbf16, #tpu.memory_space<any>>) target(%arg23 : memref<640x256xbf16, #tpu.memory_space<vmem>>) target_semaphore(%13 : memref<!tpu.dma_semaphore, #tpu.memory_space<semaphore_mem>>)
    %c7_i32 = arith.constant 7 : i32
    %14 = tpu.memref_slice %arg29[%c7_i32] : memref<12x!tpu.dma_semaphore, #tpu.memory_space<semaphore_mem>> -> memref<1x!tpu.dma_semaphore, #tpu.memory_space<semaphore_mem>>
    %15 = tpu.memref_squeeze %14 : memref<1x!tpu.dma_semaphore, #tpu.memory_space<semaphore_mem>> -> memref<!tpu.dma_semaphore, #tpu.memory_space<semaphore_mem>>
    tpu.enqueue_dma source(%arg11 : memref<1x256xf32, #tpu.memory_space<any>>) target(%arg24 : memref<1x256xf32, #tpu.memory_space<vmem>>) target_semaphore(%15 : memref<!tpu.dma_semaphore, #tpu.memory_space<semaphore_mem>>)
    %c8_i32 = arith.constant 8 : i32
    %16 = tpu.memref_slice %arg29[%c8_i32] : memref<12x!tpu.dma_semaphore, #tpu.memory_space<semaphore_mem>> -> memref<1x!tpu.dma_semaphore, #tpu.memory_space<semaphore_mem>>
    %17 = tpu.memref_squeeze %16 : memref<1x!tpu.dma_semaphore, #tpu.memory_space<semaphore_mem>> -> memref<!tpu.dma_semaphore, #tpu.memory_space<semaphore_mem>>
    tpu.enqueue_dma source(%arg12 : memref<256x128xbf16, #tpu.memory_space<any>>) target(%arg25 : memref<256x128xbf16, #tpu.memory_space<vmem>>) target_semaphore(%17 : memref<!tpu.dma_semaphore, #tpu.memory_space<semaphore_mem>>)
    %c9_i32 = arith.constant 9 : i32
    %18 = tpu.memref_slice %arg29[%c9_i32] : memref<12x!tpu.dma_semaphore, #tpu.memory_space<semaphore_mem>> -> memref<1x!tpu.dma_semaphore, #tpu.memory_space<semaphore_mem>>
    %19 = tpu.memref_squeeze %18 : memref<1x!tpu.dma_semaphore, #tpu.memory_space<semaphore_mem>> -> memref<!tpu.dma_semaphore, #tpu.memory_space<semaphore_mem>>
    tpu.enqueue_dma source(%arg13 : memref<1x128xf32, #tpu.memory_space<any>>) target(%arg26 : memref<1x128xf32, #tpu.memory_space<vmem>>) target_semaphore(%19 : memref<!tpu.dma_semaphore, #tpu.memory_space<semaphore_mem>>)
    %c10_i32 = arith.constant 10 : i32
    %20 = tpu.memref_slice %arg29[%c10_i32] : memref<12x!tpu.dma_semaphore, #tpu.memory_space<semaphore_mem>> -> memref<1x!tpu.dma_semaphore, #tpu.memory_space<semaphore_mem>>
    %21 = tpu.memref_squeeze %20 : memref<1x!tpu.dma_semaphore, #tpu.memory_space<semaphore_mem>> -> memref<!tpu.dma_semaphore, #tpu.memory_space<semaphore_mem>>
    tpu.enqueue_dma source(%arg14 : memref<128x128xbf16, #tpu.memory_space<any>>) target(%arg27 : memref<128x128xbf16, #tpu.memory_space<vmem>>) target_semaphore(%21 : memref<!tpu.dma_semaphore, #tpu.memory_space<semaphore_mem>>)
    %c11_i32 = arith.constant 11 : i32
    %22 = tpu.memref_slice %arg29[%c11_i32] : memref<12x!tpu.dma_semaphore, #tpu.memory_space<semaphore_mem>> -> memref<1x!tpu.dma_semaphore, #tpu.memory_space<semaphore_mem>>
    %23 = tpu.memref_squeeze %22 : memref<1x!tpu.dma_semaphore, #tpu.memory_space<semaphore_mem>> -> memref<!tpu.dma_semaphore, #tpu.memory_space<semaphore_mem>>
    tpu.enqueue_dma source(%arg15 : memref<1x128xf32, #tpu.memory_space<any>>) target(%arg28 : memref<1x128xf32, #tpu.memory_space<vmem>>) target_semaphore(%23 : memref<!tpu.dma_semaphore, #tpu.memory_space<semaphore_mem>>)
    %c0 = arith.constant 0 : index
    %c0_0 = arith.constant 0 : index
    %c0_1 = arith.constant 0 : index
    %24 = vector.load %arg0[%c0, %c0_0, %c0_1] : memref<5x8x128xbf16, #tpu.memory_space<vmem>>, vector<5x8x128xbf16>
    %25 = vector.shape_cast %24 : vector<5x8x128xbf16> to vector<40x128xbf16>
    %c0_2 = arith.constant 0 : index
    %c0_3 = arith.constant 0 : index
    %26 = vector.load %arg1[%c0_2, %c0_3] : memref<128x512xbf16, #tpu.memory_space<vmem>>, vector<128x512xbf16>
    %c0_4 = arith.constant 0 : index
    %c0_5 = arith.constant 0 : index
    %27 = vector.load %arg2[%c0_4, %c0_5] : memref<128x512xbf16, #tpu.memory_space<vmem>>, vector<128x512xbf16>
    %c0_6 = arith.constant 0 : index
    %c0_7 = arith.constant 0 : index
    %28 = vector.load %arg3[%c0_6, %c0_7] : memref<1x512xf32, #tpu.memory_space<vmem>>, vector<1x512xf32>
    %cst = arith.constant dense<0.000000e+00> : vector<40x512xf32>
    %29 = tpu.matmul %25, %26, %cst {dimension_numbers = #tpu.dot_dimension_numbers<[1], [0], [0], [1], [0, 0, 1, 1], [], []>} : vector<40x128xbf16>, vector<128x512xbf16>, vector<40x512xf32> -> vector<40x512xf32>
    %30 = vector.broadcast %28 : vector<1x512xf32> to vector<40x512xf32>
    %31 = arith.addf %29, %30 : vector<40x512xf32>
    %cst_8 = arith.constant 0.000000e+00 : f32
    %32 = vector.broadcast %cst_8 : f32 to vector<8x128xf32>
    %cst_9 = arith.constant 0.000000e+00 : f32
    %33 = vector.broadcast %cst_9 : f32 to vector<8x128xf32>
    %34 = vector.extract_strided_slice %31 {offsets = [0, 0], sizes = [8, 512], strides = [1, 1]} : vector<40x512xf32> to vector<8x512xf32>
    %35 = arith.truncf %32 : vector<8x128xf32> to vector<8x128xbf16>
    %cst_10 = arith.constant dense<0.000000e+00> : vector<8x512xf32>
    %36 = tpu.matmul %35, %27, %cst_10 {dimension_numbers = #tpu.dot_dimension_numbers<[1], [0], [0], [1], [0, 0, 1, 1], [], []>} : vector<8x128xbf16>, vector<128x512xbf16>, vector<8x512xf32> -> vector<8x512xf32>
    %37 = arith.addf %34, %36 : vector<8x512xf32>
    %38 = vector.extract_strided_slice %37 {offsets = [0, 0], sizes = [8, 128], strides = [1, 1]} : vector<8x512xf32> to vector<8x128xf32>
    %cst_11 = arith.constant 5.000000e-01 : f32
    %39 = vector.broadcast %cst_11 : f32 to vector<8x128xf32>
    %40 = arith.mulf %39, %38 : vector<8x128xf32>
    %41 = math.tanh %40 : vector<8x128xf32>
    %cst_12 = arith.constant 5.000000e-01 : f32
    %42 = vector.broadcast %cst_12 : f32 to vector<8x128xf32>
    %43 = arith.mulf %42, %41 : vector<8x128xf32>
    %cst_13 = arith.constant 5.000000e-01 : f32
    %44 = vector.broadcast %cst_13 : f32 to vector<8x128xf32>
    %45 = arith.addf %43, %44 : vector<8x128xf32>
    %46 = vector.extract_strided_slice %37 {offsets = [0, 128], sizes = [8, 128], strides = [1, 1]} : vector<8x512xf32> to vector<8x128xf32>
    %cst_14 = arith.constant 5.000000e-01 : f32
    %47 = vector.broadcast %cst_14 : f32 to vector<8x128xf32>
    %48 = arith.mulf %47, %46 : vector<8x128xf32>
    %49 = math.tanh %48 : vector<8x128xf32>
    %cst_15 = arith.constant 5.000000e-01 : f32
    %50 = vector.broadcast %cst_15 : f32 to vector<8x128xf32>
    %51 = arith.mulf %50, %49 : vector<8x128xf32>
    %cst_16 = arith.constant 5.000000e-01 : f32
    %52 = vector.broadcast %cst_16 : f32 to vector<8x128xf32>
    %53 = arith.addf %51, %52 : vector<8x128xf32>
    %54 = vector.extract_strided_slice %37 {offsets = [0, 256], sizes = [8, 128], strides = [1, 1]} : vector<8x512xf32> to vector<8x128xf32>
    %55 = math.tanh %54 : vector<8x128xf32>
    %56 = vector.extract_strided_slice %37 {offsets = [0, 384], sizes = [8, 128], strides = [1, 1]} : vector<8x512xf32> to vector<8x128xf32>
    %cst_17 = arith.constant 5.000000e-01 : f32
    %57 = vector.broadcast %cst_17 : f32 to vector<8x128xf32>
    %58 = arith.mulf %57, %56 : vector<8x128xf32>
    %59 = math.tanh %58 : vector<8x128xf32>
    %cst_18 = arith.constant 5.000000e-01 : f32
    %60 = vector.broadcast %cst_18 : f32 to vector<8x128xf32>
    %61 = arith.mulf %60, %59 : vector<8x128xf32>
    %cst_19 = arith.constant 5.000000e-01 : f32
    %62 = vector.broadcast %cst_19 : f32 to vector<8x128xf32>
    %63 = arith.addf %61, %62 : vector<8x128xf32>
    %64 = arith.mulf %53, %33 : vector<8x128xf32>
    %65 = arith.mulf %45, %55 : vector<8x128xf32>
    %66 = arith.addf %64, %65 : vector<8x128xf32>
    %67 = math.tanh %66 : vector<8x128xf32>
    %68 = arith.mulf %63, %67 : vector<8x128xf32>
    %69 = vector.extract_strided_slice %31 {offsets = [8, 0], sizes = [8, 512], strides = [1, 1]} : vector<40x512xf32> to vector<8x512xf32>
    %70 = arith.truncf %68 : vector<8x128xf32> to vector<8x128xbf16>
    %cst_20 = arith.constant dense<0.000000e+00> : vector<8x512xf32>
    %71 = tpu.matmul %70, %27, %cst_20 {dimension_numbers = #tpu.dot_dimension_numbers<[1], [0], [0], [1], [0, 0, 1, 1], [], []>} : vector<8x128xbf16>, vector<128x512xbf16>, vector<8x512xf32> -> vector<8x512xf32>
    %72 = arith.addf %69, %71 : vector<8x512xf32>
    %73 = vector.extract_strided_slice %72 {offsets = [0, 0], sizes = [8, 128], strides = [1, 1]} : vector<8x512xf32> to vector<8x128xf32>
    %cst_21 = arith.constant 5.000000e-01 : f32
    %74 = vector.broadcast %cst_21 : f32 to vector<8x128xf32>
    %75 = arith.mulf %74, %73 : vector<8x128xf32>
    %76 = math.tanh %75 : vector<8x128xf32>
    %cst_22 = arith.constant 5.000000e-01 : f32
    %77 = vector.broadcast %cst_22 : f32 to vector<8x128xf32>
    %78 = arith.mulf %77, %76 : vector<8x128xf32>
    %cst_23 = arith.constant 5.000000e-01 : f32
    %79 = vector.broadcast %cst_23 : f32 to vector<8x128xf32>
    %80 = arith.addf %78, %79 : vector<8x128xf32>
    %81 = vector.extract_strided_slice %72 {offsets = [0, 128], sizes = [8, 128], strides = [1, 1]} : vector<8x512xf32> to vector<8x128xf32>
    %cst_24 = arith.constant 5.000000e-01 : f32
    %82 = vector.broadcast %cst_24 : f32 to vector<8x128xf32>
    %83 = arith.mulf %82, %81 : vector<8x128xf32>
    %84 = math.tanh %83 : vector<8x128xf32>
    %cst_25 = arith.constant 5.000000e-01 : f32
    %85 = vector.broadcast %cst_25 : f32 to vector<8x128xf32>
    %86 = arith.mulf %85, %84 : vector<8x128xf32>
    %cst_26 = arith.constant 5.000000e-01 : f32
    %87 = vector.broadcast %cst_26 : f32 to vector<8x128xf32>
    %88 = arith.addf %86, %87 : vector<8x128xf32>
    %89 = vector.extract_strided_slice %72 {offsets = [0, 256], sizes = [8, 128], strides = [1, 1]} : vector<8x512xf32> to vector<8x128xf32>
    %90 = math.tanh %89 : vector<8x128xf32>
    %91 = vector.extract_strided_slice %72 {offsets = [0, 384], sizes = [8, 128], strides = [1, 1]} : vector<8x512xf32> to vector<8x128xf32>
    %cst_27 = arith.constant 5.000000e-01 : f32
    %92 = vector.broadcast %cst_27 : f32 to vector<8x128xf32>
    %93 = arith.mulf %92, %91 : vector<8x128xf32>
    %94 = math.tanh %93 : vector<8x128xf32>
    %cst_28 = arith.constant 5.000000e-01 : f32
    %95 = vector.broadcast %cst_28 : f32 to vector<8x128xf32>
    %96 = arith.mulf %95, %94 : vector<8x128xf32>
    %cst_29 = arith.constant 5.000000e-01 : f32
    %97 = vector.broadcast %cst_29 : f32 to vector<8x128xf32>
    %98 = arith.addf %96, %97 : vector<8x128xf32>
    %99 = arith.mulf %88, %66 : vector<8x128xf32>
    %100 = arith.mulf %80, %90 : vector<8x128xf32>
    %101 = arith.addf %99, %100 : vector<8x128xf32>
    %102 = math.tanh %101 : vector<8x128xf32>
    %103 = arith.mulf %98, %102 : vector<8x128xf32>
    %104 = vector.extract_strided_slice %31 {offsets = [16, 0], sizes = [8, 512], strides = [1, 1]} : vector<40x512xf32> to vector<8x512xf32>
    %105 = arith.truncf %103 : vector<8x128xf32> to vector<8x128xbf16>
    %cst_30 = arith.constant dense<0.000000e+00> : vector<8x512xf32>
    %106 = tpu.matmul %105, %27, %cst_30 {dimension_numbers = #tpu.dot_dimension_numbers<[1], [0], [0], [1], [0, 0, 1, 1], [], []>} : vector<8x128xbf16>, vector<128x512xbf16>, vector<8x512xf32> -> vector<8x512xf32>
    %107 = arith.addf %104, %106 : vector<8x512xf32>
    %108 = vector.extract_strided_slice %107 {offsets = [0, 0], sizes = [8, 128], strides = [1, 1]} : vector<8x512xf32> to vector<8x128xf32>
    %cst_31 = arith.constant 5.000000e-01 : f32
    %109 = vector.broadcast %cst_31 : f32 to vector<8x128xf32>
    %110 = arith.mulf %109, %108 : vector<8x128xf32>
    %111 = math.tanh %110 : vector<8x128xf32>
    %cst_32 = arith.constant 5.000000e-01 : f32
    %112 = vector.broadcast %cst_32 : f32 to vector<8x128xf32>
    %113 = arith.mulf %112, %111 : vector<8x128xf32>
    %cst_33 = arith.constant 5.000000e-01 : f32
    %114 = vector.broadcast %cst_33 : f32 to vector<8x128xf32>
    %115 = arith.addf %113, %114 : vector<8x128xf32>
    %116 = vector.extract_strided_slice %107 {offsets = [0, 128], sizes = [8, 128], strides = [1, 1]} : vector<8x512xf32> to vector<8x128xf32>
    %cst_34 = arith.constant 5.000000e-01 : f32
    %117 = vector.broadcast %cst_34 : f32 to vector<8x128xf32>
    %118 = arith.mulf %117, %116 : vector<8x128xf32>
    %119 = math.tanh %118 : vector<8x128xf32>
    %cst_35 = arith.constant 5.000000e-01 : f32
    %120 = vector.broadcast %cst_35 : f32 to vector<8x128xf32>
    %121 = arith.mulf %120, %119 : vector<8x128xf32>
    %cst_36 = arith.constant 5.000000e-01 : f32
    %122 = vector.broadcast %cst_36 : f32 to vector<8x128xf32>
    %123 = arith.addf %121, %122 : vector<8x128xf32>
    %124 = vector.extract_strided_slice %107 {offsets = [0, 256], sizes = [8, 128], strides = [1, 1]} : vector<8x512xf32> to vector<8x128xf32>
    %125 = math.tanh %124 : vector<8x128xf32>
    %126 = vector.extract_strided_slice %107 {offsets = [0, 384], sizes = [8, 128], strides = [1, 1]} : vector<8x512xf32> to vector<8x128xf32>
    %cst_37 = arith.constant 5.000000e-01 : f32
    %127 = vector.broadcast %cst_37 : f32 to vector<8x128xf32>
    %128 = arith.mulf %127, %126 : vector<8x128xf32>
    %129 = math.tanh %128 : vector<8x128xf32>
    %cst_38 = arith.constant 5.000000e-01 : f32
    %130 = vector.broadcast %cst_38 : f32 to vector<8x128xf32>
    %131 = arith.mulf %130, %129 : vector<8x128xf32>
    %cst_39 = arith.constant 5.000000e-01 : f32
    %132 = vector.broadcast %cst_39 : f32 to vector<8x128xf32>
    %133 = arith.addf %131, %132 : vector<8x128xf32>
    %134 = arith.mulf %123, %101 : vector<8x128xf32>
    %135 = arith.mulf %115, %125 : vector<8x128xf32>
    %136 = arith.addf %134, %135 : vector<8x128xf32>
    %137 = math.tanh %136 : vector<8x128xf32>
    %138 = arith.mulf %133, %137 : vector<8x128xf32>
    %139 = vector.extract_strided_slice %31 {offsets = [24, 0], sizes = [8, 512], strides = [1, 1]} : vector<40x512xf32> to vector<8x512xf32>
    %140 = arith.truncf %138 : vector<8x128xf32> to vector<8x128xbf16>
    %cst_40 = arith.constant dense<0.000000e+00> : vector<8x512xf32>
    %141 = tpu.matmul %140, %27, %cst_40 {dimension_numbers = #tpu.dot_dimension_numbers<[1], [0], [0], [1], [0, 0, 1, 1], [], []>} : vector<8x128xbf16>, vector<128x512xbf16>, vector<8x512xf32> -> vector<8x512xf32>
    %142 = arith.addf %139, %141 : vector<8x512xf32>
    %143 = vector.extract_strided_slice %142 {offsets = [0, 0], sizes = [8, 128], strides = [1, 1]} : vector<8x512xf32> to vector<8x128xf32>
    %cst_41 = arith.constant 5.000000e-01 : f32
    %144 = vector.broadcast %cst_41 : f32 to vector<8x128xf32>
    %145 = arith.mulf %144, %143 : vector<8x128xf32>
    %146 = math.tanh %145 : vector<8x128xf32>
    %cst_42 = arith.constant 5.000000e-01 : f32
    %147 = vector.broadcast %cst_42 : f32 to vector<8x128xf32>
    %148 = arith.mulf %147, %146 : vector<8x128xf32>
    %cst_43 = arith.constant 5.000000e-01 : f32
    %149 = vector.broadcast %cst_43 : f32 to vector<8x128xf32>
    %150 = arith.addf %148, %149 : vector<8x128xf32>
    %151 = vector.extract_strided_slice %142 {offsets = [0, 128], sizes = [8, 128], strides = [1, 1]} : vector<8x512xf32> to vector<8x128xf32>
    %cst_44 = arith.constant 5.000000e-01 : f32
    %152 = vector.broadcast %cst_44 : f32 to vector<8x128xf32>
    %153 = arith.mulf %152, %151 : vector<8x128xf32>
    %154 = math.tanh %153 : vector<8x128xf32>
    %cst_45 = arith.constant 5.000000e-01 : f32
    %155 = vector.broadcast %cst_45 : f32 to vector<8x128xf32>
    %156 = arith.mulf %155, %154 : vector<8x128xf32>
    %cst_46 = arith.constant 5.000000e-01 : f32
    %157 = vector.broadcast %cst_46 : f32 to vector<8x128xf32>
    %158 = arith.addf %156, %157 : vector<8x128xf32>
    %159 = vector.extract_strided_slice %142 {offsets = [0, 256], sizes = [8, 128], strides = [1, 1]} : vector<8x512xf32> to vector<8x128xf32>
    %160 = math.tanh %159 : vector<8x128xf32>
    %161 = vector.extract_strided_slice %142 {offsets = [0, 384], sizes = [8, 128], strides = [1, 1]} : vector<8x512xf32> to vector<8x128xf32>
    %cst_47 = arith.constant 5.000000e-01 : f32
    %162 = vector.broadcast %cst_47 : f32 to vector<8x128xf32>
    %163 = arith.mulf %162, %161 : vector<8x128xf32>
    %164 = math.tanh %163 : vector<8x128xf32>
    %cst_48 = arith.constant 5.000000e-01 : f32
    %165 = vector.broadcast %cst_48 : f32 to vector<8x128xf32>
    %166 = arith.mulf %165, %164 : vector<8x128xf32>
    %cst_49 = arith.constant 5.000000e-01 : f32
    %167 = vector.broadcast %cst_49 : f32 to vector<8x128xf32>
    %168 = arith.addf %166, %167 : vector<8x128xf32>
    %169 = arith.mulf %158, %136 : vector<8x128xf32>
    %170 = arith.mulf %150, %160 : vector<8x128xf32>
    %171 = arith.addf %169, %170 : vector<8x128xf32>
    %172 = math.tanh %171 : vector<8x128xf32>
    %173 = arith.mulf %168, %172 : vector<8x128xf32>
    %174 = vector.extract_strided_slice %31 {offsets = [32, 0], sizes = [8, 512], strides = [1, 1]} : vector<40x512xf32> to vector<8x512xf32>
    %175 = arith.truncf %173 : vector<8x128xf32> to vector<8x128xbf16>
    %cst_50 = arith.constant dense<0.000000e+00> : vector<8x512xf32>
    %176 = tpu.matmul %175, %27, %cst_50 {dimension_numbers = #tpu.dot_dimension_numbers<[1], [0], [0], [1], [0, 0, 1, 1], [], []>} : vector<8x128xbf16>, vector<128x512xbf16>, vector<8x512xf32> -> vector<8x512xf32>
    %177 = arith.addf %174, %176 : vector<8x512xf32>
    %178 = vector.extract_strided_slice %177 {offsets = [0, 0], sizes = [8, 128], strides = [1, 1]} : vector<8x512xf32> to vector<8x128xf32>
    %cst_51 = arith.constant 5.000000e-01 : f32
    %179 = vector.broadcast %cst_51 : f32 to vector<8x128xf32>
    %180 = arith.mulf %179, %178 : vector<8x128xf32>
    %181 = math.tanh %180 : vector<8x128xf32>
    %cst_52 = arith.constant 5.000000e-01 : f32
    %182 = vector.broadcast %cst_52 : f32 to vector<8x128xf32>
    %183 = arith.mulf %182, %181 : vector<8x128xf32>
    %cst_53 = arith.constant 5.000000e-01 : f32
    %184 = vector.broadcast %cst_53 : f32 to vector<8x128xf32>
    %185 = arith.addf %183, %184 : vector<8x128xf32>
    %186 = vector.extract_strided_slice %177 {offsets = [0, 128], sizes = [8, 128], strides = [1, 1]} : vector<8x512xf32> to vector<8x128xf32>
    %cst_54 = arith.constant 5.000000e-01 : f32
    %187 = vector.broadcast %cst_54 : f32 to vector<8x128xf32>
    %188 = arith.mulf %187, %186 : vector<8x128xf32>
    %189 = math.tanh %188 : vector<8x128xf32>
    %cst_55 = arith.constant 5.000000e-01 : f32
    %190 = vector.broadcast %cst_55 : f32 to vector<8x128xf32>
    %191 = arith.mulf %190, %189 : vector<8x128xf32>
    %cst_56 = arith.constant 5.000000e-01 : f32
    %192 = vector.broadcast %cst_56 : f32 to vector<8x128xf32>
    %193 = arith.addf %191, %192 : vector<8x128xf32>
    %194 = vector.extract_strided_slice %177 {offsets = [0, 256], sizes = [8, 128], strides = [1, 1]} : vector<8x512xf32> to vector<8x128xf32>
    %195 = math.tanh %194 : vector<8x128xf32>
    %196 = vector.extract_strided_slice %177 {offsets = [0, 384], sizes = [8, 128], strides = [1, 1]} : vector<8x512xf32> to vector<8x128xf32>
    %cst_57 = arith.constant 5.000000e-01 : f32
    %197 = vector.broadcast %cst_57 : f32 to vector<8x128xf32>
    %198 = arith.mulf %197, %196 : vector<8x128xf32>
    %199 = math.tanh %198 : vector<8x128xf32>
    %cst_58 = arith.constant 5.000000e-01 : f32
    %200 = vector.broadcast %cst_58 : f32 to vector<8x128xf32>
    %201 = arith.mulf %200, %199 : vector<8x128xf32>
    %cst_59 = arith.constant 5.000000e-01 : f32
    %202 = vector.broadcast %cst_59 : f32 to vector<8x128xf32>
    %203 = arith.addf %201, %202 : vector<8x128xf32>
    %204 = arith.mulf %193, %171 : vector<8x128xf32>
    %205 = arith.mulf %185, %195 : vector<8x128xf32>
    %206 = arith.addf %204, %205 : vector<8x128xf32>
    %207 = math.tanh %206 : vector<8x128xf32>
    %208 = arith.mulf %203, %207 : vector<8x128xf32>
    %c0_i32_60 = arith.constant 0 : i32
    %209 = tpu.memref_slice %arg29[%c0_i32_60] : memref<12x!tpu.dma_semaphore, #tpu.memory_space<semaphore_mem>> -> memref<1x!tpu.dma_semaphore, #tpu.memory_space<semaphore_mem>>
    %210 = tpu.memref_squeeze %209 : memref<1x!tpu.dma_semaphore, #tpu.memory_space<semaphore_mem>> -> memref<!tpu.dma_semaphore, #tpu.memory_space<semaphore_mem>>
    tpu.wait_dma2 semaphore(%210 : memref<!tpu.dma_semaphore, #tpu.memory_space<semaphore_mem>>) src(%arg4 : memref<128x512xbf16, #tpu.memory_space<any>>) dst(%arg17 : memref<128x512xbf16, #tpu.memory_space<vmem>>)
    %c1_i32_61 = arith.constant 1 : i32
    %211 = tpu.memref_slice %arg29[%c1_i32_61] : memref<12x!tpu.dma_semaphore, #tpu.memory_space<semaphore_mem>> -> memref<1x!tpu.dma_semaphore, #tpu.memory_space<semaphore_mem>>
    %212 = tpu.memref_squeeze %211 : memref<1x!tpu.dma_semaphore, #tpu.memory_space<semaphore_mem>> -> memref<!tpu.dma_semaphore, #tpu.memory_space<semaphore_mem>>
    tpu.wait_dma2 semaphore(%212 : memref<!tpu.dma_semaphore, #tpu.memory_space<semaphore_mem>>) src(%arg5 : memref<128x512xbf16, #tpu.memory_space<any>>) dst(%arg18 : memref<128x512xbf16, #tpu.memory_space<vmem>>)
    %c2_i32_62 = arith.constant 2 : i32
    %213 = tpu.memref_slice %arg29[%c2_i32_62] : memref<12x!tpu.dma_semaphore, #tpu.memory_space<semaphore_mem>> -> memref<1x!tpu.dma_semaphore, #tpu.memory_space<semaphore_mem>>
    %214 = tpu.memref_squeeze %213 : memref<1x!tpu.dma_semaphore, #tpu.memory_space<semaphore_mem>> -> memref<!tpu.dma_semaphore, #tpu.memory_space<semaphore_mem>>
    tpu.wait_dma2 semaphore(%214 : memref<!tpu.dma_semaphore, #tpu.memory_space<semaphore_mem>>) src(%arg6 : memref<1x512xf32, #tpu.memory_space<any>>) dst(%arg19 : memref<1x512xf32, #tpu.memory_space<vmem>>)
    %215 = tpu.concatenate %68, %103, %138, %173, %208 in 0 : vector<8x128xf32>, vector<8x128xf32>, vector<8x128xf32>, vector<8x128xf32>, vector<8x128xf32> -> vector<40x128xf32>
    %c0_63 = arith.constant 0 : index
    %c0_64 = arith.constant 0 : index
    %216 = vector.load %arg17[%c0_63, %c0_64] : memref<128x512xbf16, #tpu.memory_space<vmem>>, vector<128x512xbf16>
    %c0_65 = arith.constant 0 : index
    %c0_66 = arith.constant 0 : index
    %217 = vector.load %arg18[%c0_65, %c0_66] : memref<128x512xbf16, #tpu.memory_space<vmem>>, vector<128x512xbf16>
    %c0_67 = arith.constant 0 : index
    %c0_68 = arith.constant 0 : index
    %218 = vector.load %arg19[%c0_67, %c0_68] : memref<1x512xf32, #tpu.memory_space<vmem>>, vector<1x512xf32>
    %219 = arith.truncf %215 : vector<40x128xf32> to vector<40x128xbf16>
    %cst_69 = arith.constant dense<0.000000e+00> : vector<40x512xf32>
    %220 = tpu.matmul %219, %216, %cst_69 {dimension_numbers = #tpu.dot_dimension_numbers<[1], [0], [0], [1], [0, 0, 1, 1], [], []>} : vector<40x128xbf16>, vector<128x512xbf16>, vector<40x512xf32> -> vector<40x512xf32>
    %221 = vector.broadcast %218 : vector<1x512xf32> to vector<40x512xf32>
    %222 = arith.addf %220, %221 : vector<40x512xf32>
    %cst_70 = arith.constant 0.000000e+00 : f32
    %223 = vector.broadcast %cst_70 : f32 to vector<8x128xf32>
    %cst_71 = arith.constant 0.000000e+00 : f32
    %224 = vector.broadcast %cst_71 : f32 to vector<8x128xf32>
    %225 = vector.extract_strided_slice %222 {offsets = [0, 0], sizes = [8, 512], strides = [1, 1]} : vector<40x512xf32> to vector<8x512xf32>
    %226 = arith.truncf %223 : vector<8x128xf32> to vector<8x128xbf16>
    %cst_72 = arith.constant dense<0.000000e+00> : vector<8x512xf32>
    %227 = tpu.matmul %226, %217, %cst_72 {dimension_numbers = #tpu.dot_dimension_numbers<[1], [0], [0], [1], [0, 0, 1, 1], [], []>} : vector<8x128xbf16>, vector<128x512xbf16>, vector<8x512xf32> -> vector<8x512xf32>
    %228 = arith.addf %225, %227 : vector<8x512xf32>
    %229 = vector.extract_strided_slice %228 {offsets = [0, 0], sizes = [8, 128], strides = [1, 1]} : vector<8x512xf32> to vector<8x128xf32>
    %cst_73 = arith.constant 5.000000e-01 : f32
    %230 = vector.broadcast %cst_73 : f32 to vector<8x128xf32>
    %231 = arith.mulf %230, %229 : vector<8x128xf32>
    %232 = math.tanh %231 : vector<8x128xf32>
    %cst_74 = arith.constant 5.000000e-01 : f32
    %233 = vector.broadcast %cst_74 : f32 to vector<8x128xf32>
    %234 = arith.mulf %233, %232 : vector<8x128xf32>
    %cst_75 = arith.constant 5.000000e-01 : f32
    %235 = vector.broadcast %cst_75 : f32 to vector<8x128xf32>
    %236 = arith.addf %234, %235 : vector<8x128xf32>
    %237 = vector.extract_strided_slice %228 {offsets = [0, 128], sizes = [8, 128], strides = [1, 1]} : vector<8x512xf32> to vector<8x128xf32>
    %cst_76 = arith.constant 5.000000e-01 : f32
    %238 = vector.broadcast %cst_76 : f32 to vector<8x128xf32>
    %239 = arith.mulf %238, %237 : vector<8x128xf32>
    %240 = math.tanh %239 : vector<8x128xf32>
    %cst_77 = arith.constant 5.000000e-01 : f32
    %241 = vector.broadcast %cst_77 : f32 to vector<8x128xf32>
    %242 = arith.mulf %241, %240 : vector<8x128xf32>
    %cst_78 = arith.constant 5.000000e-01 : f32
    %243 = vector.broadcast %cst_78 : f32 to vector<8x128xf32>
    %244 = arith.addf %242, %243 : vector<8x128xf32>
    %245 = vector.extract_strided_slice %228 {offsets = [0, 256], sizes = [8, 128], strides = [1, 1]} : vector<8x512xf32> to vector<8x128xf32>
    %246 = math.tanh %245 : vector<8x128xf32>
    %247 = vector.extract_strided_slice %228 {offsets = [0, 384], sizes = [8, 128], strides = [1, 1]} : vector<8x512xf32> to vector<8x128xf32>
    %cst_79 = arith.constant 5.000000e-01 : f32
    %248 = vector.broadcast %cst_79 : f32 to vector<8x128xf32>
    %249 = arith.mulf %248, %247 : vector<8x128xf32>
    %250 = math.tanh %249 : vector<8x128xf32>
    %cst_80 = arith.constant 5.000000e-01 : f32
    %251 = vector.broadcast %cst_80 : f32 to vector<8x128xf32>
    %252 = arith.mulf %251, %250 : vector<8x128xf32>
    %cst_81 = arith.constant 5.000000e-01 : f32
    %253 = vector.broadcast %cst_81 : f32 to vector<8x128xf32>
    %254 = arith.addf %252, %253 : vector<8x128xf32>
    %255 = arith.mulf %244, %224 : vector<8x128xf32>
    %256 = arith.mulf %236, %246 : vector<8x128xf32>
    %257 = arith.addf %255, %256 : vector<8x128xf32>
    %258 = math.tanh %257 : vector<8x128xf32>
    %259 = arith.mulf %254, %258 : vector<8x128xf32>
    %260 = vector.extract_strided_slice %222 {offsets = [8, 0], sizes = [8, 512], strides = [1, 1]} : vector<40x512xf32> to vector<8x512xf32>
    %261 = arith.truncf %259 : vector<8x128xf32> to vector<8x128xbf16>
    %cst_82 = arith.constant dense<0.000000e+00> : vector<8x512xf32>
    %262 = tpu.matmul %261, %217, %cst_82 {dimension_numbers = #tpu.dot_dimension_numbers<[1], [0], [0], [1], [0, 0, 1, 1], [], []>} : vector<8x128xbf16>, vector<128x512xbf16>, vector<8x512xf32> -> vector<8x512xf32>
    %263 = arith.addf %260, %262 : vector<8x512xf32>
    %264 = vector.extract_strided_slice %263 {offsets = [0, 0], sizes = [8, 128], strides = [1, 1]} : vector<8x512xf32> to vector<8x128xf32>
    %cst_83 = arith.constant 5.000000e-01 : f32
    %265 = vector.broadcast %cst_83 : f32 to vector<8x128xf32>
    %266 = arith.mulf %265, %264 : vector<8x128xf32>
    %267 = math.tanh %266 : vector<8x128xf32>
    %cst_84 = arith.constant 5.000000e-01 : f32
    %268 = vector.broadcast %cst_84 : f32 to vector<8x128xf32>
    %269 = arith.mulf %268, %267 : vector<8x128xf32>
    %cst_85 = arith.constant 5.000000e-01 : f32
    %270 = vector.broadcast %cst_85 : f32 to vector<8x128xf32>
    %271 = arith.addf %269, %270 : vector<8x128xf32>
    %272 = vector.extract_strided_slice %263 {offsets = [0, 128], sizes = [8, 128], strides = [1, 1]} : vector<8x512xf32> to vector<8x128xf32>
    %cst_86 = arith.constant 5.000000e-01 : f32
    %273 = vector.broadcast %cst_86 : f32 to vector<8x128xf32>
    %274 = arith.mulf %273, %272 : vector<8x128xf32>
    %275 = math.tanh %274 : vector<8x128xf32>
    %cst_87 = arith.constant 5.000000e-01 : f32
    %276 = vector.broadcast %cst_87 : f32 to vector<8x128xf32>
    %277 = arith.mulf %276, %275 : vector<8x128xf32>
    %cst_88 = arith.constant 5.000000e-01 : f32
    %278 = vector.broadcast %cst_88 : f32 to vector<8x128xf32>
    %279 = arith.addf %277, %278 : vector<8x128xf32>
    %280 = vector.extract_strided_slice %263 {offsets = [0, 256], sizes = [8, 128], strides = [1, 1]} : vector<8x512xf32> to vector<8x128xf32>
    %281 = math.tanh %280 : vector<8x128xf32>
    %282 = vector.extract_strided_slice %263 {offsets = [0, 384], sizes = [8, 128], strides = [1, 1]} : vector<8x512xf32> to vector<8x128xf32>
    %cst_89 = arith.constant 5.000000e-01 : f32
    %283 = vector.broadcast %cst_89 : f32 to vector<8x128xf32>
    %284 = arith.mulf %283, %282 : vector<8x128xf32>
    %285 = math.tanh %284 : vector<8x128xf32>
    %cst_90 = arith.constant 5.000000e-01 : f32
    %286 = vector.broadcast %cst_90 : f32 to vector<8x128xf32>
    %287 = arith.mulf %286, %285 : vector<8x128xf32>
    %cst_91 = arith.constant 5.000000e-01 : f32
    %288 = vector.broadcast %cst_91 : f32 to vector<8x128xf32>
    %289 = arith.addf %287, %288 : vector<8x128xf32>
    %290 = arith.mulf %279, %257 : vector<8x128xf32>
    %291 = arith.mulf %271, %281 : vector<8x128xf32>
    %292 = arith.addf %290, %291 : vector<8x128xf32>
    %293 = math.tanh %292 : vector<8x128xf32>
    %294 = arith.mulf %289, %293 : vector<8x128xf32>
    %295 = vector.extract_strided_slice %222 {offsets = [16, 0], sizes = [8, 512], strides = [1, 1]} : vector<40x512xf32> to vector<8x512xf32>
    %296 = arith.truncf %294 : vector<8x128xf32> to vector<8x128xbf16>
    %cst_92 = arith.constant dense<0.000000e+00> : vector<8x512xf32>
    %297 = tpu.matmul %296, %217, %cst_92 {dimension_numbers = #tpu.dot_dimension_numbers<[1], [0], [0], [1], [0, 0, 1, 1], [], []>} : vector<8x128xbf16>, vector<128x512xbf16>, vector<8x512xf32> -> vector<8x512xf32>
    %298 = arith.addf %295, %297 : vector<8x512xf32>
    %299 = vector.extract_strided_slice %298 {offsets = [0, 0], sizes = [8, 128], strides = [1, 1]} : vector<8x512xf32> to vector<8x128xf32>
    %cst_93 = arith.constant 5.000000e-01 : f32
    %300 = vector.broadcast %cst_93 : f32 to vector<8x128xf32>
    %301 = arith.mulf %300, %299 : vector<8x128xf32>
    %302 = math.tanh %301 : vector<8x128xf32>
    %cst_94 = arith.constant 5.000000e-01 : f32
    %303 = vector.broadcast %cst_94 : f32 to vector<8x128xf32>
    %304 = arith.mulf %303, %302 : vector<8x128xf32>
    %cst_95 = arith.constant 5.000000e-01 : f32
    %305 = vector.broadcast %cst_95 : f32 to vector<8x128xf32>
    %306 = arith.addf %304, %305 : vector<8x128xf32>
    %307 = vector.extract_strided_slice %298 {offsets = [0, 128], sizes = [8, 128], strides = [1, 1]} : vector<8x512xf32> to vector<8x128xf32>
    %cst_96 = arith.constant 5.000000e-01 : f32
    %308 = vector.broadcast %cst_96 : f32 to vector<8x128xf32>
    %309 = arith.mulf %308, %307 : vector<8x128xf32>
    %310 = math.tanh %309 : vector<8x128xf32>
    %cst_97 = arith.constant 5.000000e-01 : f32
    %311 = vector.broadcast %cst_97 : f32 to vector<8x128xf32>
    %312 = arith.mulf %311, %310 : vector<8x128xf32>
    %cst_98 = arith.constant 5.000000e-01 : f32
    %313 = vector.broadcast %cst_98 : f32 to vector<8x128xf32>
    %314 = arith.addf %312, %313 : vector<8x128xf32>
    %315 = vector.extract_strided_slice %298 {offsets = [0, 256], sizes = [8, 128], strides = [1, 1]} : vector<8x512xf32> to vector<8x128xf32>
    %316 = math.tanh %315 : vector<8x128xf32>
    %317 = vector.extract_strided_slice %298 {offsets = [0, 384], sizes = [8, 128], strides = [1, 1]} : vector<8x512xf32> to vector<8x128xf32>
    %cst_99 = arith.constant 5.000000e-01 : f32
    %318 = vector.broadcast %cst_99 : f32 to vector<8x128xf32>
    %319 = arith.mulf %318, %317 : vector<8x128xf32>
    %320 = math.tanh %319 : vector<8x128xf32>
    %cst_100 = arith.constant 5.000000e-01 : f32
    %321 = vector.broadcast %cst_100 : f32 to vector<8x128xf32>
    %322 = arith.mulf %321, %320 : vector<8x128xf32>
    %cst_101 = arith.constant 5.000000e-01 : f32
    %323 = vector.broadcast %cst_101 : f32 to vector<8x128xf32>
    %324 = arith.addf %322, %323 : vector<8x128xf32>
    %325 = arith.mulf %314, %292 : vector<8x128xf32>
    %326 = arith.mulf %306, %316 : vector<8x128xf32>
    %327 = arith.addf %325, %326 : vector<8x128xf32>
    %328 = math.tanh %327 : vector<8x128xf32>
    %329 = arith.mulf %324, %328 : vector<8x128xf32>
    %330 = vector.extract_strided_slice %222 {offsets = [24, 0], sizes = [8, 512], strides = [1, 1]} : vector<40x512xf32> to vector<8x512xf32>
    %331 = arith.truncf %329 : vector<8x128xf32> to vector<8x128xbf16>
    %cst_102 = arith.constant dense<0.000000e+00> : vector<8x512xf32>
    %332 = tpu.matmul %331, %217, %cst_102 {dimension_numbers = #tpu.dot_dimension_numbers<[1], [0], [0], [1], [0, 0, 1, 1], [], []>} : vector<8x128xbf16>, vector<128x512xbf16>, vector<8x512xf32> -> vector<8x512xf32>
    %333 = arith.addf %330, %332 : vector<8x512xf32>
    %334 = vector.extract_strided_slice %333 {offsets = [0, 0], sizes = [8, 128], strides = [1, 1]} : vector<8x512xf32> to vector<8x128xf32>
    %cst_103 = arith.constant 5.000000e-01 : f32
    %335 = vector.broadcast %cst_103 : f32 to vector<8x128xf32>
    %336 = arith.mulf %335, %334 : vector<8x128xf32>
    %337 = math.tanh %336 : vector<8x128xf32>
    %cst_104 = arith.constant 5.000000e-01 : f32
    %338 = vector.broadcast %cst_104 : f32 to vector<8x128xf32>
    %339 = arith.mulf %338, %337 : vector<8x128xf32>
    %cst_105 = arith.constant 5.000000e-01 : f32
    %340 = vector.broadcast %cst_105 : f32 to vector<8x128xf32>
    %341 = arith.addf %339, %340 : vector<8x128xf32>
    %342 = vector.extract_strided_slice %333 {offsets = [0, 128], sizes = [8, 128], strides = [1, 1]} : vector<8x512xf32> to vector<8x128xf32>
    %cst_106 = arith.constant 5.000000e-01 : f32
    %343 = vector.broadcast %cst_106 : f32 to vector<8x128xf32>
    %344 = arith.mulf %343, %342 : vector<8x128xf32>
    %345 = math.tanh %344 : vector<8x128xf32>
    %cst_107 = arith.constant 5.000000e-01 : f32
    %346 = vector.broadcast %cst_107 : f32 to vector<8x128xf32>
    %347 = arith.mulf %346, %345 : vector<8x128xf32>
    %cst_108 = arith.constant 5.000000e-01 : f32
    %348 = vector.broadcast %cst_108 : f32 to vector<8x128xf32>
    %349 = arith.addf %347, %348 : vector<8x128xf32>
    %350 = vector.extract_strided_slice %333 {offsets = [0, 256], sizes = [8, 128], strides = [1, 1]} : vector<8x512xf32> to vector<8x128xf32>
    %351 = math.tanh %350 : vector<8x128xf32>
    %352 = vector.extract_strided_slice %333 {offsets = [0, 384], sizes = [8, 128], strides = [1, 1]} : vector<8x512xf32> to vector<8x128xf32>
    %cst_109 = arith.constant 5.000000e-01 : f32
    %353 = vector.broadcast %cst_109 : f32 to vector<8x128xf32>
    %354 = arith.mulf %353, %352 : vector<8x128xf32>
    %355 = math.tanh %354 : vector<8x128xf32>
    %cst_110 = arith.constant 5.000000e-01 : f32
    %356 = vector.broadcast %cst_110 : f32 to vector<8x128xf32>
    %357 = arith.mulf %356, %355 : vector<8x128xf32>
    %cst_111 = arith.constant 5.000000e-01 : f32
    %358 = vector.broadcast %cst_111 : f32 to vector<8x128xf32>
    %359 = arith.addf %357, %358 : vector<8x128xf32>
    %360 = arith.mulf %349, %327 : vector<8x128xf32>
    %361 = arith.mulf %341, %351 : vector<8x128xf32>
    %362 = arith.addf %360, %361 : vector<8x128xf32>
    %363 = math.tanh %362 : vector<8x128xf32>
    %364 = arith.mulf %359, %363 : vector<8x128xf32>
    %365 = vector.extract_strided_slice %222 {offsets = [32, 0], sizes = [8, 512], strides = [1, 1]} : vector<40x512xf32> to vector<8x512xf32>
    %366 = arith.truncf %364 : vector<8x128xf32> to vector<8x128xbf16>
    %cst_112 = arith.constant dense<0.000000e+00> : vector<8x512xf32>
    %367 = tpu.matmul %366, %217, %cst_112 {dimension_numbers = #tpu.dot_dimension_numbers<[1], [0], [0], [1], [0, 0, 1, 1], [], []>} : vector<8x128xbf16>, vector<128x512xbf16>, vector<8x512xf32> -> vector<8x512xf32>
    %368 = arith.addf %365, %367 : vector<8x512xf32>
    %369 = vector.extract_strided_slice %368 {offsets = [0, 0], sizes = [8, 128], strides = [1, 1]} : vector<8x512xf32> to vector<8x128xf32>
    %cst_113 = arith.constant 5.000000e-01 : f32
    %370 = vector.broadcast %cst_113 : f32 to vector<8x128xf32>
    %371 = arith.mulf %370, %369 : vector<8x128xf32>
    %372 = math.tanh %371 : vector<8x128xf32>
    %cst_114 = arith.constant 5.000000e-01 : f32
    %373 = vector.broadcast %cst_114 : f32 to vector<8x128xf32>
    %374 = arith.mulf %373, %372 : vector<8x128xf32>
    %cst_115 = arith.constant 5.000000e-01 : f32
    %375 = vector.broadcast %cst_115 : f32 to vector<8x128xf32>
    %376 = arith.addf %374, %375 : vector<8x128xf32>
    %377 = vector.extract_strided_slice %368 {offsets = [0, 128], sizes = [8, 128], strides = [1, 1]} : vector<8x512xf32> to vector<8x128xf32>
    %cst_116 = arith.constant 5.000000e-01 : f32
    %378 = vector.broadcast %cst_116 : f32 to vector<8x128xf32>
    %379 = arith.mulf %378, %377 : vector<8x128xf32>
    %380 = math.tanh %379 : vector<8x128xf32>
    %cst_117 = arith.constant 5.000000e-01 : f32
    %381 = vector.broadcast %cst_117 : f32 to vector<8x128xf32>
    %382 = arith.mulf %381, %380 : vector<8x128xf32>
    %cst_118 = arith.constant 5.000000e-01 : f32
    %383 = vector.broadcast %cst_118 : f32 to vector<8x128xf32>
    %384 = arith.addf %382, %383 : vector<8x128xf32>
    %385 = vector.extract_strided_slice %368 {offsets = [0, 256], sizes = [8, 128], strides = [1, 1]} : vector<8x512xf32> to vector<8x128xf32>
    %386 = math.tanh %385 : vector<8x128xf32>
    %387 = vector.extract_strided_slice %368 {offsets = [0, 384], sizes = [8, 128], strides = [1, 1]} : vector<8x512xf32> to vector<8x128xf32>
    %cst_119 = arith.constant 5.000000e-01 : f32
    %388 = vector.broadcast %cst_119 : f32 to vector<8x128xf32>
    %389 = arith.mulf %388, %387 : vector<8x128xf32>
    %390 = math.tanh %389 : vector<8x128xf32>
    %cst_120 = arith.constant 5.000000e-01 : f32
    %391 = vector.broadcast %cst_120 : f32 to vector<8x128xf32>
    %392 = arith.mulf %391, %390 : vector<8x128xf32>
    %cst_121 = arith.constant 5.000000e-01 : f32
    %393 = vector.broadcast %cst_121 : f32 to vector<8x128xf32>
    %394 = arith.addf %392, %393 : vector<8x128xf32>
    %395 = arith.mulf %384, %362 : vector<8x128xf32>
    %396 = arith.mulf %376, %386 : vector<8x128xf32>
    %397 = arith.addf %395, %396 : vector<8x128xf32>
    %398 = math.tanh %397 : vector<8x128xf32>
    %399 = arith.mulf %394, %398 : vector<8x128xf32>
    %c3_i32_122 = arith.constant 3 : i32
    %400 = tpu.memref_slice %arg29[%c3_i32_122] : memref<12x!tpu.dma_semaphore, #tpu.memory_space<semaphore_mem>> -> memref<1x!tpu.dma_semaphore, #tpu.memory_space<semaphore_mem>>
    %401 = tpu.memref_squeeze %400 : memref<1x!tpu.dma_semaphore, #tpu.memory_space<semaphore_mem>> -> memref<!tpu.dma_semaphore, #tpu.memory_space<semaphore_mem>>
    tpu.wait_dma2 semaphore(%401 : memref<!tpu.dma_semaphore, #tpu.memory_space<semaphore_mem>>) src(%arg7 : memref<128x512xbf16, #tpu.memory_space<any>>) dst(%arg20 : memref<128x512xbf16, #tpu.memory_space<vmem>>)
    %c4_i32_123 = arith.constant 4 : i32
    %402 = tpu.memref_slice %arg29[%c4_i32_123] : memref<12x!tpu.dma_semaphore, #tpu.memory_space<semaphore_mem>> -> memref<1x!tpu.dma_semaphore, #tpu.memory_space<semaphore_mem>>
    %403 = tpu.memref_squeeze %402 : memref<1x!tpu.dma_semaphore, #tpu.memory_space<semaphore_mem>> -> memref<!tpu.dma_semaphore, #tpu.memory_space<semaphore_mem>>
    tpu.wait_dma2 semaphore(%403 : memref<!tpu.dma_semaphore, #tpu.memory_space<semaphore_mem>>) src(%arg8 : memref<128x512xbf16, #tpu.memory_space<any>>) dst(%arg21 : memref<128x512xbf16, #tpu.memory_space<vmem>>)
    %c5_i32_124 = arith.constant 5 : i32
    %404 = tpu.memref_slice %arg29[%c5_i32_124] : memref<12x!tpu.dma_semaphore, #tpu.memory_space<semaphore_mem>> -> memref<1x!tpu.dma_semaphore, #tpu.memory_space<semaphore_mem>>
    %405 = tpu.memref_squeeze %404 : memref<1x!tpu.dma_semaphore, #tpu.memory_space<semaphore_mem>> -> memref<!tpu.dma_semaphore, #tpu.memory_space<semaphore_mem>>
    tpu.wait_dma2 semaphore(%405 : memref<!tpu.dma_semaphore, #tpu.memory_space<semaphore_mem>>) src(%arg9 : memref<1x512xf32, #tpu.memory_space<any>>) dst(%arg22 : memref<1x512xf32, #tpu.memory_space<vmem>>)
    %406 = tpu.concatenate %259, %294, %329, %364, %399 in 0 : vector<8x128xf32>, vector<8x128xf32>, vector<8x128xf32>, vector<8x128xf32>, vector<8x128xf32> -> vector<40x128xf32>
    %c0_125 = arith.constant 0 : index
    %c0_126 = arith.constant 0 : index
    %407 = vector.load %arg20[%c0_125, %c0_126] : memref<128x512xbf16, #tpu.memory_space<vmem>>, vector<128x512xbf16>
    %c0_127 = arith.constant 0 : index
    %c0_128 = arith.constant 0 : index
    %408 = vector.load %arg21[%c0_127, %c0_128] : memref<128x512xbf16, #tpu.memory_space<vmem>>, vector<128x512xbf16>
    %c0_129 = arith.constant 0 : index
    %c0_130 = arith.constant 0 : index
    %409 = vector.load %arg22[%c0_129, %c0_130] : memref<1x512xf32, #tpu.memory_space<vmem>>, vector<1x512xf32>
    %410 = arith.truncf %406 : vector<40x128xf32> to vector<40x128xbf16>
    %cst_131 = arith.constant dense<0.000000e+00> : vector<40x512xf32>
    %411 = tpu.matmul %410, %407, %cst_131 {dimension_numbers = #tpu.dot_dimension_numbers<[1], [0], [0], [1], [0, 0, 1, 1], [], []>} : vector<40x128xbf16>, vector<128x512xbf16>, vector<40x512xf32> -> vector<40x512xf32>
    %412 = vector.broadcast %409 : vector<1x512xf32> to vector<40x512xf32>
    %413 = arith.addf %411, %412 : vector<40x512xf32>
    %cst_132 = arith.constant 0.000000e+00 : f32
    %414 = vector.broadcast %cst_132 : f32 to vector<8x128xf32>
    %cst_133 = arith.constant 0.000000e+00 : f32
    %415 = vector.broadcast %cst_133 : f32 to vector<8x128xf32>
    %416 = vector.extract_strided_slice %413 {offsets = [0, 0], sizes = [8, 512], strides = [1, 1]} : vector<40x512xf32> to vector<8x512xf32>
    %417 = arith.truncf %414 : vector<8x128xf32> to vector<8x128xbf16>
    %cst_134 = arith.constant dense<0.000000e+00> : vector<8x512xf32>
    %418 = tpu.matmul %417, %408, %cst_134 {dimension_numbers = #tpu.dot_dimension_numbers<[1], [0], [0], [1], [0, 0, 1, 1], [], []>} : vector<8x128xbf16>, vector<128x512xbf16>, vector<8x512xf32> -> vector<8x512xf32>
    %419 = arith.addf %416, %418 : vector<8x512xf32>
    %420 = vector.extract_strided_slice %419 {offsets = [0, 0], sizes = [8, 128], strides = [1, 1]} : vector<8x512xf32> to vector<8x128xf32>
    %cst_135 = arith.constant 5.000000e-01 : f32
    %421 = vector.broadcast %cst_135 : f32 to vector<8x128xf32>
    %422 = arith.mulf %421, %420 : vector<8x128xf32>
    %423 = math.tanh %422 : vector<8x128xf32>
    %cst_136 = arith.constant 5.000000e-01 : f32
    %424 = vector.broadcast %cst_136 : f32 to vector<8x128xf32>
    %425 = arith.mulf %424, %423 : vector<8x128xf32>
    %cst_137 = arith.constant 5.000000e-01 : f32
    %426 = vector.broadcast %cst_137 : f32 to vector<8x128xf32>
    %427 = arith.addf %425, %426 : vector<8x128xf32>
    %428 = vector.extract_strided_slice %419 {offsets = [0, 128], sizes = [8, 128], strides = [1, 1]} : vector<8x512xf32> to vector<8x128xf32>
    %cst_138 = arith.constant 5.000000e-01 : f32
    %429 = vector.broadcast %cst_138 : f32 to vector<8x128xf32>
    %430 = arith.mulf %429, %428 : vector<8x128xf32>
    %431 = math.tanh %430 : vector<8x128xf32>
    %cst_139 = arith.constant 5.000000e-01 : f32
    %432 = vector.broadcast %cst_139 : f32 to vector<8x128xf32>
    %433 = arith.mulf %432, %431 : vector<8x128xf32>
    %cst_140 = arith.constant 5.000000e-01 : f32
    %434 = vector.broadcast %cst_140 : f32 to vector<8x128xf32>
    %435 = arith.addf %433, %434 : vector<8x128xf32>
    %436 = vector.extract_strided_slice %419 {offsets = [0, 256], sizes = [8, 128], strides = [1, 1]} : vector<8x512xf32> to vector<8x128xf32>
    %437 = math.tanh %436 : vector<8x128xf32>
    %438 = vector.extract_strided_slice %419 {offsets = [0, 384], sizes = [8, 128], strides = [1, 1]} : vector<8x512xf32> to vector<8x128xf32>
    %cst_141 = arith.constant 5.000000e-01 : f32
    %439 = vector.broadcast %cst_141 : f32 to vector<8x128xf32>
    %440 = arith.mulf %439, %438 : vector<8x128xf32>
    %441 = math.tanh %440 : vector<8x128xf32>
    %cst_142 = arith.constant 5.000000e-01 : f32
    %442 = vector.broadcast %cst_142 : f32 to vector<8x128xf32>
    %443 = arith.mulf %442, %441 : vector<8x128xf32>
    %cst_143 = arith.constant 5.000000e-01 : f32
    %444 = vector.broadcast %cst_143 : f32 to vector<8x128xf32>
    %445 = arith.addf %443, %444 : vector<8x128xf32>
    %446 = arith.mulf %435, %415 : vector<8x128xf32>
    %447 = arith.mulf %427, %437 : vector<8x128xf32>
    %448 = arith.addf %446, %447 : vector<8x128xf32>
    %449 = math.tanh %448 : vector<8x128xf32>
    %450 = arith.mulf %445, %449 : vector<8x128xf32>
    %451 = vector.extract_strided_slice %413 {offsets = [8, 0], sizes = [8, 512], strides = [1, 1]} : vector<40x512xf32> to vector<8x512xf32>
    %452 = arith.truncf %450 : vector<8x128xf32> to vector<8x128xbf16>
    %cst_144 = arith.constant dense<0.000000e+00> : vector<8x512xf32>
    %453 = tpu.matmul %452, %408, %cst_144 {dimension_numbers = #tpu.dot_dimension_numbers<[1], [0], [0], [1], [0, 0, 1, 1], [], []>} : vector<8x128xbf16>, vector<128x512xbf16>, vector<8x512xf32> -> vector<8x512xf32>
    %454 = arith.addf %451, %453 : vector<8x512xf32>
    %455 = vector.extract_strided_slice %454 {offsets = [0, 0], sizes = [8, 128], strides = [1, 1]} : vector<8x512xf32> to vector<8x128xf32>
    %cst_145 = arith.constant 5.000000e-01 : f32
    %456 = vector.broadcast %cst_145 : f32 to vector<8x128xf32>
    %457 = arith.mulf %456, %455 : vector<8x128xf32>
    %458 = math.tanh %457 : vector<8x128xf32>
    %cst_146 = arith.constant 5.000000e-01 : f32
    %459 = vector.broadcast %cst_146 : f32 to vector<8x128xf32>
    %460 = arith.mulf %459, %458 : vector<8x128xf32>
    %cst_147 = arith.constant 5.000000e-01 : f32
    %461 = vector.broadcast %cst_147 : f32 to vector<8x128xf32>
    %462 = arith.addf %460, %461 : vector<8x128xf32>
    %463 = vector.extract_strided_slice %454 {offsets = [0, 128], sizes = [8, 128], strides = [1, 1]} : vector<8x512xf32> to vector<8x128xf32>
    %cst_148 = arith.constant 5.000000e-01 : f32
    %464 = vector.broadcast %cst_148 : f32 to vector<8x128xf32>
    %465 = arith.mulf %464, %463 : vector<8x128xf32>
    %466 = math.tanh %465 : vector<8x128xf32>
    %cst_149 = arith.constant 5.000000e-01 : f32
    %467 = vector.broadcast %cst_149 : f32 to vector<8x128xf32>
    %468 = arith.mulf %467, %466 : vector<8x128xf32>
    %cst_150 = arith.constant 5.000000e-01 : f32
    %469 = vector.broadcast %cst_150 : f32 to vector<8x128xf32>
    %470 = arith.addf %468, %469 : vector<8x128xf32>
    %471 = vector.extract_strided_slice %454 {offsets = [0, 256], sizes = [8, 128], strides = [1, 1]} : vector<8x512xf32> to vector<8x128xf32>
    %472 = math.tanh %471 : vector<8x128xf32>
    %473 = vector.extract_strided_slice %454 {offsets = [0, 384], sizes = [8, 128], strides = [1, 1]} : vector<8x512xf32> to vector<8x128xf32>
    %cst_151 = arith.constant 5.000000e-01 : f32
    %474 = vector.broadcast %cst_151 : f32 to vector<8x128xf32>
    %475 = arith.mulf %474, %473 : vector<8x128xf32>
    %476 = math.tanh %475 : vector<8x128xf32>
    %cst_152 = arith.constant 5.000000e-01 : f32
    %477 = vector.broadcast %cst_152 : f32 to vector<8x128xf32>
    %478 = arith.mulf %477, %476 : vector<8x128xf32>
    %cst_153 = arith.constant 5.000000e-01 : f32
    %479 = vector.broadcast %cst_153 : f32 to vector<8x128xf32>
    %480 = arith.addf %478, %479 : vector<8x128xf32>
    %481 = arith.mulf %470, %448 : vector<8x128xf32>
    %482 = arith.mulf %462, %472 : vector<8x128xf32>
    %483 = arith.addf %481, %482 : vector<8x128xf32>
    %484 = math.tanh %483 : vector<8x128xf32>
    %485 = arith.mulf %480, %484 : vector<8x128xf32>
    %486 = vector.extract_strided_slice %413 {offsets = [16, 0], sizes = [8, 512], strides = [1, 1]} : vector<40x512xf32> to vector<8x512xf32>
    %487 = arith.truncf %485 : vector<8x128xf32> to vector<8x128xbf16>
    %cst_154 = arith.constant dense<0.000000e+00> : vector<8x512xf32>
    %488 = tpu.matmul %487, %408, %cst_154 {dimension_numbers = #tpu.dot_dimension_numbers<[1], [0], [0], [1], [0, 0, 1, 1], [], []>} : vector<8x128xbf16>, vector<128x512xbf16>, vector<8x512xf32> -> vector<8x512xf32>
    %489 = arith.addf %486, %488 : vector<8x512xf32>
    %490 = vector.extract_strided_slice %489 {offsets = [0, 0], sizes = [8, 128], strides = [1, 1]} : vector<8x512xf32> to vector<8x128xf32>
    %cst_155 = arith.constant 5.000000e-01 : f32
    %491 = vector.broadcast %cst_155 : f32 to vector<8x128xf32>
    %492 = arith.mulf %491, %490 : vector<8x128xf32>
    %493 = math.tanh %492 : vector<8x128xf32>
    %cst_156 = arith.constant 5.000000e-01 : f32
    %494 = vector.broadcast %cst_156 : f32 to vector<8x128xf32>
    %495 = arith.mulf %494, %493 : vector<8x128xf32>
    %cst_157 = arith.constant 5.000000e-01 : f32
    %496 = vector.broadcast %cst_157 : f32 to vector<8x128xf32>
    %497 = arith.addf %495, %496 : vector<8x128xf32>
    %498 = vector.extract_strided_slice %489 {offsets = [0, 128], sizes = [8, 128], strides = [1, 1]} : vector<8x512xf32> to vector<8x128xf32>
    %cst_158 = arith.constant 5.000000e-01 : f32
    %499 = vector.broadcast %cst_158 : f32 to vector<8x128xf32>
    %500 = arith.mulf %499, %498 : vector<8x128xf32>
    %501 = math.tanh %500 : vector<8x128xf32>
    %cst_159 = arith.constant 5.000000e-01 : f32
    %502 = vector.broadcast %cst_159 : f32 to vector<8x128xf32>
    %503 = arith.mulf %502, %501 : vector<8x128xf32>
    %cst_160 = arith.constant 5.000000e-01 : f32
    %504 = vector.broadcast %cst_160 : f32 to vector<8x128xf32>
    %505 = arith.addf %503, %504 : vector<8x128xf32>
    %506 = vector.extract_strided_slice %489 {offsets = [0, 256], sizes = [8, 128], strides = [1, 1]} : vector<8x512xf32> to vector<8x128xf32>
    %507 = math.tanh %506 : vector<8x128xf32>
    %508 = vector.extract_strided_slice %489 {offsets = [0, 384], sizes = [8, 128], strides = [1, 1]} : vector<8x512xf32> to vector<8x128xf32>
    %cst_161 = arith.constant 5.000000e-01 : f32
    %509 = vector.broadcast %cst_161 : f32 to vector<8x128xf32>
    %510 = arith.mulf %509, %508 : vector<8x128xf32>
    %511 = math.tanh %510 : vector<8x128xf32>
    %cst_162 = arith.constant 5.000000e-01 : f32
    %512 = vector.broadcast %cst_162 : f32 to vector<8x128xf32>
    %513 = arith.mulf %512, %511 : vector<8x128xf32>
    %cst_163 = arith.constant 5.000000e-01 : f32
    %514 = vector.broadcast %cst_163 : f32 to vector<8x128xf32>
    %515 = arith.addf %513, %514 : vector<8x128xf32>
    %516 = arith.mulf %505, %483 : vector<8x128xf32>
    %517 = arith.mulf %497, %507 : vector<8x128xf32>
    %518 = arith.addf %516, %517 : vector<8x128xf32>
    %519 = math.tanh %518 : vector<8x128xf32>
    %520 = arith.mulf %515, %519 : vector<8x128xf32>
    %521 = vector.extract_strided_slice %413 {offsets = [24, 0], sizes = [8, 512], strides = [1, 1]} : vector<40x512xf32> to vector<8x512xf32>
    %522 = arith.truncf %520 : vector<8x128xf32> to vector<8x128xbf16>
    %cst_164 = arith.constant dense<0.000000e+00> : vector<8x512xf32>
    %523 = tpu.matmul %522, %408, %cst_164 {dimension_numbers = #tpu.dot_dimension_numbers<[1], [0], [0], [1], [0, 0, 1, 1], [], []>} : vector<8x128xbf16>, vector<128x512xbf16>, vector<8x512xf32> -> vector<8x512xf32>
    %524 = arith.addf %521, %523 : vector<8x512xf32>
    %525 = vector.extract_strided_slice %524 {offsets = [0, 0], sizes = [8, 128], strides = [1, 1]} : vector<8x512xf32> to vector<8x128xf32>
    %cst_165 = arith.constant 5.000000e-01 : f32
    %526 = vector.broadcast %cst_165 : f32 to vector<8x128xf32>
    %527 = arith.mulf %526, %525 : vector<8x128xf32>
    %528 = math.tanh %527 : vector<8x128xf32>
    %cst_166 = arith.constant 5.000000e-01 : f32
    %529 = vector.broadcast %cst_166 : f32 to vector<8x128xf32>
    %530 = arith.mulf %529, %528 : vector<8x128xf32>
    %cst_167 = arith.constant 5.000000e-01 : f32
    %531 = vector.broadcast %cst_167 : f32 to vector<8x128xf32>
    %532 = arith.addf %530, %531 : vector<8x128xf32>
    %533 = vector.extract_strided_slice %524 {offsets = [0, 128], sizes = [8, 128], strides = [1, 1]} : vector<8x512xf32> to vector<8x128xf32>
    %cst_168 = arith.constant 5.000000e-01 : f32
    %534 = vector.broadcast %cst_168 : f32 to vector<8x128xf32>
    %535 = arith.mulf %534, %533 : vector<8x128xf32>
    %536 = math.tanh %535 : vector<8x128xf32>
    %cst_169 = arith.constant 5.000000e-01 : f32
    %537 = vector.broadcast %cst_169 : f32 to vector<8x128xf32>
    %538 = arith.mulf %537, %536 : vector<8x128xf32>
    %cst_170 = arith.constant 5.000000e-01 : f32
    %539 = vector.broadcast %cst_170 : f32 to vector<8x128xf32>
    %540 = arith.addf %538, %539 : vector<8x128xf32>
    %541 = vector.extract_strided_slice %524 {offsets = [0, 256], sizes = [8, 128], strides = [1, 1]} : vector<8x512xf32> to vector<8x128xf32>
    %542 = math.tanh %541 : vector<8x128xf32>
    %543 = vector.extract_strided_slice %524 {offsets = [0, 384], sizes = [8, 128], strides = [1, 1]} : vector<8x512xf32> to vector<8x128xf32>
    %cst_171 = arith.constant 5.000000e-01 : f32
    %544 = vector.broadcast %cst_171 : f32 to vector<8x128xf32>
    %545 = arith.mulf %544, %543 : vector<8x128xf32>
    %546 = math.tanh %545 : vector<8x128xf32>
    %cst_172 = arith.constant 5.000000e-01 : f32
    %547 = vector.broadcast %cst_172 : f32 to vector<8x128xf32>
    %548 = arith.mulf %547, %546 : vector<8x128xf32>
    %cst_173 = arith.constant 5.000000e-01 : f32
    %549 = vector.broadcast %cst_173 : f32 to vector<8x128xf32>
    %550 = arith.addf %548, %549 : vector<8x128xf32>
    %551 = arith.mulf %540, %518 : vector<8x128xf32>
    %552 = arith.mulf %532, %542 : vector<8x128xf32>
    %553 = arith.addf %551, %552 : vector<8x128xf32>
    %554 = math.tanh %553 : vector<8x128xf32>
    %555 = arith.mulf %550, %554 : vector<8x128xf32>
    %556 = vector.extract_strided_slice %413 {offsets = [32, 0], sizes = [8, 512], strides = [1, 1]} : vector<40x512xf32> to vector<8x512xf32>
    %557 = arith.truncf %555 : vector<8x128xf32> to vector<8x128xbf16>
    %cst_174 = arith.constant dense<0.000000e+00> : vector<8x512xf32>
    %558 = tpu.matmul %557, %408, %cst_174 {dimension_numbers = #tpu.dot_dimension_numbers<[1], [0], [0], [1], [0, 0, 1, 1], [], []>} : vector<8x128xbf16>, vector<128x512xbf16>, vector<8x512xf32> -> vector<8x512xf32>
    %559 = arith.addf %556, %558 : vector<8x512xf32>
    %560 = vector.extract_strided_slice %559 {offsets = [0, 0], sizes = [8, 128], strides = [1, 1]} : vector<8x512xf32> to vector<8x128xf32>
    %cst_175 = arith.constant 5.000000e-01 : f32
    %561 = vector.broadcast %cst_175 : f32 to vector<8x128xf32>
    %562 = arith.mulf %561, %560 : vector<8x128xf32>
    %563 = math.tanh %562 : vector<8x128xf32>
    %cst_176 = arith.constant 5.000000e-01 : f32
    %564 = vector.broadcast %cst_176 : f32 to vector<8x128xf32>
    %565 = arith.mulf %564, %563 : vector<8x128xf32>
    %cst_177 = arith.constant 5.000000e-01 : f32
    %566 = vector.broadcast %cst_177 : f32 to vector<8x128xf32>
    %567 = arith.addf %565, %566 : vector<8x128xf32>
    %568 = vector.extract_strided_slice %559 {offsets = [0, 128], sizes = [8, 128], strides = [1, 1]} : vector<8x512xf32> to vector<8x128xf32>
    %cst_178 = arith.constant 5.000000e-01 : f32
    %569 = vector.broadcast %cst_178 : f32 to vector<8x128xf32>
    %570 = arith.mulf %569, %568 : vector<8x128xf32>
    %571 = math.tanh %570 : vector<8x128xf32>
    %cst_179 = arith.constant 5.000000e-01 : f32
    %572 = vector.broadcast %cst_179 : f32 to vector<8x128xf32>
    %573 = arith.mulf %572, %571 : vector<8x128xf32>
    %cst_180 = arith.constant 5.000000e-01 : f32
    %574 = vector.broadcast %cst_180 : f32 to vector<8x128xf32>
    %575 = arith.addf %573, %574 : vector<8x128xf32>
    %576 = vector.extract_strided_slice %559 {offsets = [0, 256], sizes = [8, 128], strides = [1, 1]} : vector<8x512xf32> to vector<8x128xf32>
    %577 = math.tanh %576 : vector<8x128xf32>
    %578 = vector.extract_strided_slice %559 {offsets = [0, 384], sizes = [8, 128], strides = [1, 1]} : vector<8x512xf32> to vector<8x128xf32>
    %cst_181 = arith.constant 5.000000e-01 : f32
    %579 = vector.broadcast %cst_181 : f32 to vector<8x128xf32>
    %580 = arith.mulf %579, %578 : vector<8x128xf32>
    %581 = math.tanh %580 : vector<8x128xf32>
    %cst_182 = arith.constant 5.000000e-01 : f32
    %582 = vector.broadcast %cst_182 : f32 to vector<8x128xf32>
    %583 = arith.mulf %582, %581 : vector<8x128xf32>
    %cst_183 = arith.constant 5.000000e-01 : f32
    %584 = vector.broadcast %cst_183 : f32 to vector<8x128xf32>
    %585 = arith.addf %583, %584 : vector<8x128xf32>
    %586 = arith.mulf %575, %553 : vector<8x128xf32>
    %587 = arith.mulf %567, %577 : vector<8x128xf32>
    %588 = arith.addf %586, %587 : vector<8x128xf32>
    %589 = math.tanh %588 : vector<8x128xf32>
    %590 = arith.mulf %585, %589 : vector<8x128xf32>
    %c6_i32_184 = arith.constant 6 : i32
    %591 = tpu.memref_slice %arg29[%c6_i32_184] : memref<12x!tpu.dma_semaphore, #tpu.memory_space<semaphore_mem>> -> memref<1x!tpu.dma_semaphore, #tpu.memory_space<semaphore_mem>>
    %592 = tpu.memref_squeeze %591 : memref<1x!tpu.dma_semaphore, #tpu.memory_space<semaphore_mem>> -> memref<!tpu.dma_semaphore, #tpu.memory_space<semaphore_mem>>
    tpu.wait_dma2 semaphore(%592 : memref<!tpu.dma_semaphore, #tpu.memory_space<semaphore_mem>>) src(%arg10 : memref<640x256xbf16, #tpu.memory_space<any>>) dst(%arg23 : memref<640x256xbf16, #tpu.memory_space<vmem>>)
    %c7_i32_185 = arith.constant 7 : i32
    %593 = tpu.memref_slice %arg29[%c7_i32_185] : memref<12x!tpu.dma_semaphore, #tpu.memory_space<semaphore_mem>> -> memref<1x!tpu.dma_semaphore, #tpu.memory_space<semaphore_mem>>
    %594 = tpu.memref_squeeze %593 : memref<1x!tpu.dma_semaphore, #tpu.memory_space<semaphore_mem>> -> memref<!tpu.dma_semaphore, #tpu.memory_space<semaphore_mem>>
    tpu.wait_dma2 semaphore(%594 : memref<!tpu.dma_semaphore, #tpu.memory_space<semaphore_mem>>) src(%arg11 : memref<1x256xf32, #tpu.memory_space<any>>) dst(%arg24 : memref<1x256xf32, #tpu.memory_space<vmem>>)
    %c8_i32_186 = arith.constant 8 : i32
    %595 = tpu.memref_slice %arg29[%c8_i32_186] : memref<12x!tpu.dma_semaphore, #tpu.memory_space<semaphore_mem>> -> memref<1x!tpu.dma_semaphore, #tpu.memory_space<semaphore_mem>>
    %596 = tpu.memref_squeeze %595 : memref<1x!tpu.dma_semaphore, #tpu.memory_space<semaphore_mem>> -> memref<!tpu.dma_semaphore, #tpu.memory_space<semaphore_mem>>
    tpu.wait_dma2 semaphore(%596 : memref<!tpu.dma_semaphore, #tpu.memory_space<semaphore_mem>>) src(%arg12 : memref<256x128xbf16, #tpu.memory_space<any>>) dst(%arg25 : memref<256x128xbf16, #tpu.memory_space<vmem>>)
    %c9_i32_187 = arith.constant 9 : i32
    %597 = tpu.memref_slice %arg29[%c9_i32_187] : memref<12x!tpu.dma_semaphore, #tpu.memory_space<semaphore_mem>> -> memref<1x!tpu.dma_semaphore, #tpu.memory_space<semaphore_mem>>
    %598 = tpu.memref_squeeze %597 : memref<1x!tpu.dma_semaphore, #tpu.memory_space<semaphore_mem>> -> memref<!tpu.dma_semaphore, #tpu.memory_space<semaphore_mem>>
    tpu.wait_dma2 semaphore(%598 : memref<!tpu.dma_semaphore, #tpu.memory_space<semaphore_mem>>) src(%arg13 : memref<1x128xf32, #tpu.memory_space<any>>) dst(%arg26 : memref<1x128xf32, #tpu.memory_space<vmem>>)
    %c10_i32_188 = arith.constant 10 : i32
    %599 = tpu.memref_slice %arg29[%c10_i32_188] : memref<12x!tpu.dma_semaphore, #tpu.memory_space<semaphore_mem>> -> memref<1x!tpu.dma_semaphore, #tpu.memory_space<semaphore_mem>>
    %600 = tpu.memref_squeeze %599 : memref<1x!tpu.dma_semaphore, #tpu.memory_space<semaphore_mem>> -> memref<!tpu.dma_semaphore, #tpu.memory_space<semaphore_mem>>
    tpu.wait_dma2 semaphore(%600 : memref<!tpu.dma_semaphore, #tpu.memory_space<semaphore_mem>>) src(%arg14 : memref<128x128xbf16, #tpu.memory_space<any>>) dst(%arg27 : memref<128x128xbf16, #tpu.memory_space<vmem>>)
    %c11_i32_189 = arith.constant 11 : i32
    %601 = tpu.memref_slice %arg29[%c11_i32_189] : memref<12x!tpu.dma_semaphore, #tpu.memory_space<semaphore_mem>> -> memref<1x!tpu.dma_semaphore, #tpu.memory_space<semaphore_mem>>
    %602 = tpu.memref_squeeze %601 : memref<1x!tpu.dma_semaphore, #tpu.memory_space<semaphore_mem>> -> memref<!tpu.dma_semaphore, #tpu.memory_space<semaphore_mem>>
    tpu.wait_dma2 semaphore(%602 : memref<!tpu.dma_semaphore, #tpu.memory_space<semaphore_mem>>) src(%arg15 : memref<1x128xf32, #tpu.memory_space<any>>) dst(%arg28 : memref<1x128xf32, #tpu.memory_space<vmem>>)
    %603 = tpu.concatenate %450, %485, %520, %555, %590 in 1 : vector<8x128xf32>, vector<8x128xf32>, vector<8x128xf32>, vector<8x128xf32>, vector<8x128xf32> -> vector<8x640xf32>
    %c0_190 = arith.constant 0 : index
    %c0_191 = arith.constant 0 : index
    %604 = vector.load %arg23[%c0_190, %c0_191] : memref<640x256xbf16, #tpu.memory_space<vmem>>, vector<640x256xbf16>
    %605 = arith.truncf %603 : vector<8x640xf32> to vector<8x640xbf16>
    %cst_192 = arith.constant dense<0.000000e+00> : vector<8x256xf32>
    %606 = tpu.matmul %605, %604, %cst_192 {dimension_numbers = #tpu.dot_dimension_numbers<[1], [0], [0], [1], [0, 0, 1, 1], [], []>} : vector<8x640xbf16>, vector<640x256xbf16>, vector<8x256xf32> -> vector<8x256xf32>
    %c0_193 = arith.constant 0 : index
    %c0_194 = arith.constant 0 : index
    %607 = vector.load %arg24[%c0_193, %c0_194] : memref<1x256xf32, #tpu.memory_space<vmem>>, vector<1x256xf32>
    %608 = vector.broadcast %607 : vector<1x256xf32> to vector<8x256xf32>
    %609 = arith.addf %606, %608 : vector<8x256xf32>
    %610 = math.tanh %609 : vector<8x256xf32>
    %c0_195 = arith.constant 0 : index
    %c0_196 = arith.constant 0 : index
    %611 = vector.load %arg25[%c0_195, %c0_196] : memref<256x128xbf16, #tpu.memory_space<vmem>>, vector<256x128xbf16>
    %612 = arith.truncf %610 : vector<8x256xf32> to vector<8x256xbf16>
    %cst_197 = arith.constant dense<0.000000e+00> : vector<8x128xf32>
    %613 = tpu.matmul %612, %611, %cst_197 {dimension_numbers = #tpu.dot_dimension_numbers<[1], [0], [0], [1], [0, 0, 1, 1], [], []>} : vector<8x256xbf16>, vector<256x128xbf16>, vector<8x128xf32> -> vector<8x128xf32>
    %c0_198 = arith.constant 0 : index
    %c0_199 = arith.constant 0 : index
    %614 = vector.load %arg26[%c0_198, %c0_199] : memref<1x128xf32, #tpu.memory_space<vmem>>, vector<1x128xf32>
    %615 = vector.broadcast %614 : vector<1x128xf32> to vector<8x128xf32>
    %616 = arith.addf %613, %615 : vector<8x128xf32>
    %617 = math.tanh %616 : vector<8x128xf32>
    %c0_200 = arith.constant 0 : index
    %c0_201 = arith.constant 0 : index
    %618 = vector.load %arg27[%c0_200, %c0_201] : memref<128x128xbf16, #tpu.memory_space<vmem>>, vector<128x128xbf16>
    %619 = arith.truncf %617 : vector<8x128xf32> to vector<8x128xbf16>
    %cst_202 = arith.constant dense<0.000000e+00> : vector<8x128xf32>
    %620 = tpu.matmul %619, %618, %cst_202 {dimension_numbers = #tpu.dot_dimension_numbers<[1], [0], [0], [1], [0, 0, 1, 1], [], []>} : vector<8x128xbf16>, vector<128x128xbf16>, vector<8x128xf32> -> vector<8x128xf32>
    %c0_203 = arith.constant 0 : index
    %c0_204 = arith.constant 0 : index
    %621 = vector.load %arg28[%c0_203, %c0_204] : memref<1x128xf32, #tpu.memory_space<vmem>>, vector<1x128xf32>
    %622 = vector.broadcast %621 : vector<1x128xf32> to vector<8x128xf32>
    %623 = arith.addf %620, %622 : vector<8x128xf32>
    %c0_205 = arith.constant 0 : index
    %c0_206 = arith.constant 0 : index
    %624 = vector.load %arg16[%c0_205, %c0_206] : memref<8x128xf32, #tpu.memory_space<vmem>>, vector<8x128xf32>
    tpu.vector_store %arg16[%c0_205, %c0_206], %623 {strides = array<i32>} : memref<8x128xf32, #tpu.memory_space<vmem>>, vector<8x128xf32>,
    return
  }
}

</mosaic_0001>

<bundles_post_ra>
// kernel: tpu_custom_call.1
= control target key start
LH: loop header
LB: loop body
LE: loop exit
PB: predicated region body
PF: predicated region fallthrough
CT: control target
= control target key end

     0   :  { %s7038_s0 = inlined_call_operand.hbm [shape: bf16[5,8,128], index: 0, kind: input, shape index: {}]   ;;  %s7039_s1 = inlined_call_operand.hbm [shape: bf16[128,512], index: 1, kind: input, shape index: {}]   ;;  %s7040_s2 = inlined_call_operand.hbm [shape: bf16[128,512], index: 2, kind: input, shape index: {}]   ;;  %s7041_s3 = inlined_call_operand.vmem [shape: f32[1,512], index: 3, kind: input, shape index: {}]   ;;  %s7042_s4 = inlined_call_operand.hbm [shape: bf16[128,512], index: 4, kind: input, shape index: {}]   ;;  %s7043_s5 = inlined_call_operand.hbm [shape: bf16[128,512], index: 5, kind: input, shape index: {}]   ;;  %s7044_s6 = inlined_call_operand.vmem [shape: f32[1,512], index: 6, kind: input, shape index: {}]   ;;  %s7045_s7 = inlined_call_operand.hbm [shape: bf16[128,512], index: 7, kind: input, shape index: {}]   ;;  %s7046_s8 = inlined_call_operand.hbm [shape: bf16[128,512], index: 8, kind: input, shape index: {}]   ;;  %s7047_s9 = inlined_call_operand.vmem [shape: f32[1,512], index: 9, kind: input, shape index: {}]   ;;  %s7048_s10 = inlined_call_operand.hbm [shape: bf16[640,256], index: 10, kind: input, shape index: {}]   ;;  %s7049_s11 = inlined_call_operand.vmem [shape: f32[1,256], index: 11, kind: input, shape index: {}]   ;;  %s7050_s12 = inlined_call_operand.hbm [shape: bf16[256,128], index: 12, kind: input, shape index: {}]   ;;  %s7051_s13 = inlined_call_operand.vmem [shape: f32[1,128], index: 13, kind: input, shape index: {}]   ;;  %s7052_s14 = inlined_call_operand.hbm [shape: bf16[128,128], index: 14, kind: input, shape index: {}]   ;;  %s7053_s15 = inlined_call_operand.vmem [shape: f32[1,128], index: 15, kind: input, shape index: {}]   ;;  %s7054_s16 = inlined_call_operand.hbm [shape: f32[8,128], index: 16, kind: output, shape index: {}]  }
   0x1   :  { %7065 = sst [smem:[#allocation74_spill]] %s7038_s0 }
   0x2   :  { %21 = vsyncpa [#allocation16], 0 }
   0x3   :  { %22 = vsyncpa [#allocation19], 0 }
   0x4   :  { %23 = vsyncpa [#allocation17], 0  ;;  %s5888_s21 = smov [#allocation18]  }
   0x5   :  { %s41_s22 = sshll.u32 %s5888_s21, 4  ;;  %s42_s22 = int_to_ptr.vmem [resolvable:$true] %s41_s22 }
   0x6   :  { %s5646_s23 = scalar_lea.vmem %s42_s22, 4096  ;;  %p5651_p1 = scmp.lt.s32.totalorder %s42_s22, %s42_s22 }
   0x7   :  { %p5647_p0 = scmp.ne.s32.totalorder %s42_s22, %s5646_s23  ;;  %p5652_p2 = scmp.lt.s32.totalorder %s5646_s23, %s5646_s23 }
   0x9   :  { %p5653_p3 = por %p5652_p2, %p5651_p1 }
   0xb   :  { %p5654_p4 = pnand %p5653_p3, %p5647_p0 }
   0xd   :  { %5657 = shalt.err (!%p5654_p4)
}
   0xe   :  { %s5889_s24 = smov 256   ;;  %s5890_s25 = smov 16  }
   0xf   :  { %47 = dma.hbm_to_vmem [thread:$0]  %s7039_s1, 4096, %s42_s22, [#allocation19], %s5889_s24, %s5889_s24, %s5890_s25  }
  0x10   :  { %s5891_s28 = smov [#allocation15]  }
  0x11   :  { %s29_s29 = sshll.u32 %s5891_s28, 4  ;;  %s30_s29 = int_to_ptr.vmem [resolvable:$true] %s29_s29 }
  0x12   :  { %s5666_s30 = scalar_lea.vmem %s30_s29, 320  ;;  %p5671_p6 = scmp.lt.s32.totalorder %s30_s29, %s30_s29 }
  0x13   :  { %p5667_p5 = scmp.ne.s32.totalorder %s30_s29, %s5666_s30  ;;  %p5672_p7 = scmp.lt.s32.totalorder %s5666_s30, %s5666_s30 }
  0x15   :  { %p5673_p8 = por %p5672_p7, %p5671_p6 }
  0x17   :  { %p5674_p9 = pnand %p5673_p8, %p5667_p5 }
  0x19   :  { %5677 = shalt.err (!%p5674_p9)
}
  0x1a   :  { %s5892_s0 = smov 64   ;;  %s5893_s17 = smov 4  }
  0x1b   :  { %s7066_s20 = sld [smem:[#allocation74_spill]]  ;;  %s5894_s21 = smov [#allocation20]  }
  0x1c   :  { %s53_s23 = sshll.u32 %s5894_s21, 4  ;;  %s54_s23 = int_to_ptr.vmem [resolvable:$true] %s53_s23 }
  0x1d   :  { %s5686_s1 = scalar_lea.vmem %s54_s23, 4096  ;;  %p5691_p11 = scmp.lt.s32.totalorder %s54_s23, %s54_s23 }
  0x1e   :  { %p5687_p10 = scmp.ne.s32.totalorder %s54_s23, %s5686_s1  ;;  %p5692_p12 = scmp.lt.s32.totalorder %s5686_s1, %s5686_s1 }
  0x20   :  { %p5693_p13 = por %p5692_p12, %p5691_p11 }
  0x21   :  { %35 = dma.hbm_to_vmem [thread:$0]  %s7066_s20, 320, %s30_s29, [#allocation16], %s5892_s0, %s5892_s0, %s5893_s17  }
  0x22   :  { %p5694_p0 = pnand %p5693_p13, %p5687_p10 }
  0x24   :  { %5697 = shalt.err (!%p5694_p0)
}
  0x25   :  { %59 = dma.hbm_to_vmem [thread:$0]  %s7040_s2, 4096, %s54_s23, [#allocation19], %s5889_s24, %s5889_s24, %s5890_s25  }
  0x26   :  { %5858 = dma.done.wait [#allocation16], 320  }
  0x27   :  { %5859 = vsyncadd [#allocation16], 4294966976 }
  0x28   :  { %5860 = dma.done.wait [#allocation19], 8192  }
  0x29   :  { %5861 = vsyncadd [#allocation19], 4294959104  ;;  %s5895_s27 = smov [#allocation2]   ;;  %s5896_s29 = smov [#allocation3]  }
  0x2a   :  { %s79_s28 = sshll.u32 %s5895_s27, 4  ;;  %s91_s30 = sshll.u32 %s5896_s29, 4  ;;  %s80_s28 = int_to_ptr.vmem [resolvable:$true] %s79_s28  ;;  %s92_s30 = int_to_ptr.vmem [resolvable:$true] %s91_s30 }
  0x2b   :  { %s5706_s0 = scalar_lea.vmem %s80_s28, 4096  ;;  %p5711_p2 = scmp.lt.s32.totalorder %s80_s28, %s80_s28 }
  0x2c   :  { %p5707_p1 = scmp.ne.s32.totalorder %s80_s28, %s5706_s0  ;;  %p5712_p3 = scmp.lt.s32.totalorder %s5706_s0, %s5706_s0 }
  0x2e   :  { %p5713_p4 = por %p5712_p3, %p5711_p2 }
  0x30   :  { %p5714_p5 = pnand %p5713_p4, %p5707_p1 }
  0x32   :  { %5717 = shalt.err (!%p5714_p5)  }
  0x33   :  { %82 = dma.hbm_to_vmem [thread:$0]  %s7042_s4, 4096, %s80_s28, [#allocation14] }
  0x34   :  { %s5726_s2 = scalar_lea.vmem %s92_s30, 4096  ;;  %p5731_p7 = scmp.lt.s32.totalorder %s92_s30, %s92_s30 }
  0x35   :  { %p5727_p6 = scmp.ne.s32.totalorder %s92_s30, %s5726_s2  ;;  %p5732_p8 = scmp.lt.s32.totalorder %s5726_s2, %s5726_s2 }
  0x37   :  { %p5733_p9 = por %p5732_p8, %p5731_p7 }
  0x39   :  { %p5734_p10 = pnand %p5733_p9, %p5727_p6 }
  0x3b   :  { %5737 = shalt.err (!%p5734_p10)  }
  0x3c   :  { %94 = dma.hbm_to_vmem [thread:$0]  %s7043_s5, 4096, %s92_s30, [#allocation14 + $0x1]  ;;  %v114_v0 = vld [vmem:[%s7044_s6] sm:$0xf] }
  0x3d   :  { %115 = vst [vmem:[#allocation4] sm:$0xf] %v114_v0 }
  0x3e   :  { %141 = vsyncadd [#allocation14 + $0x2], 64  ;;  %v185_v1 = vld [vmem:[%s7047_s9] sm:$0xf]  ;;  %s5897_s4 = smov [#allocation5]   ;;  %s5898_s22 = smov [#allocation6]  }
  0x3f   :  { %s150_s1 = sshll.u32 %s5897_s4, 4  ;;  %s162_s26 = sshll.u32 %s5898_s22, 4  ;;  %186 = vst [vmem:[#allocation7] sm:$0xf] %v185_v1  ;;  %s151_s1 = int_to_ptr.vmem [resolvable:$true] %s150_s1  ;;  %s163_s26 = int_to_ptr.vmem [resolvable:$true] %s162_s26 }
  0x40   :  { %s5746_s27 = scalar_lea.vmem %s151_s1, 4096  ;;  %p5751_p12 = scmp.lt.s32.totalorder %s151_s1, %s151_s1 }
  0x41   :  { %p5747_p11 = scmp.ne.s32.totalorder %s151_s1, %s5746_s27  ;;  %p5752_p13 = scmp.lt.s32.totalorder %s5746_s27, %s5746_s27 }
  0x43   :  { %p5753_p0 = por %p5752_p13, %p5751_p12 }
  0x45   :  { %p5754_p1 = pnand %p5753_p0, %p5747_p11 }
  0x47   :  { %5757 = shalt.err (!%p5754_p1)  }
  0x48   :  { %153 = dma.hbm_to_vmem [thread:$0]  %s7045_s7, 4096, %s151_s1, [#allocation14 + $0x3] }
  0x49   :  { %s5766_s28 = scalar_lea.vmem %s163_s26, 4096  ;;  %p5771_p3 = scmp.lt.s32.totalorder %s163_s26, %s163_s26 }
  0x4a   :  { %p5767_p2 = scmp.ne.s32.totalorder %s163_s26, %s5766_s28  ;;  %p5772_p4 = scmp.lt.s32.totalorder %s5766_s28, %s5766_s28 }
  0x4c   :  { %p5773_p5 = por %p5772_p4, %p5771_p3 }
  0x4e   :  { %p5774_p6 = pnand %p5773_p5, %p5767_p2 }
  0x50   :  { %5777 = shalt.err (!%p5774_p6)  }
  0x51   :  { %165 = dma.hbm_to_vmem [thread:$0]  %s7046_s8, 4096, %s163_s26, [#allocation14 + $0x4] }
  0x52   :  { %212 = vsyncadd [#allocation14 + $0x5], 64  ;;  %v244_v2 = vld [vmem:[%s7049_s11] sm:$0x3]  ;;  %s5899_s17 = smov [#allocation8]  }
  0x53   :  { %s221_s18 = sshll.u32 %s5899_s17, 4  ;;  %245 = vst [vmem:[#allocation9] sm:$0x3] %v244_v2  ;;  %s222_s18 = int_to_ptr.vmem [resolvable:$true] %s221_s18 }
  0x54   :  { %s5786_s7 = scalar_lea.vmem %s222_s18, 10240  ;;  %p5791_p8 = scmp.lt.s32.totalorder %s222_s18, %s222_s18 }
  0x55   :  { %p5787_p7 = scmp.ne.s32.totalorder %s222_s18, %s5786_s7  ;;  %p5792_p9 = scmp.lt.s32.totalorder %s5786_s7, %s5786_s7 }
  0x57   :  { %p5793_p10 = por %p5792_p9, %p5791_p8 }
  0x59   :  { %p5794_p11 = pnand %p5793_p10, %p5787_p7 }
  0x5b   :  { %5797 = shalt.err (!%p5794_p11)  }
  0x5c   :  { %224 = dma.hbm_to_vmem [thread:$0]  %s7048_s10, 10240, %s222_s18, [#allocation14 + $0x6] }
  0x5d   :  { %271 = vsyncadd [#allocation14 + $0x7], 32  ;;  %v303_v3 = vld [vmem:[%s7051_s13] sm:$0x1]  ;;  %s5900_s11 = smov [#allocation10]  }
  0x5e   :  { %s280_s19 = sshll.u32 %s5900_s11, 4  ;;  %304 = vst [vmem:[#allocation11] sm:$0x1] %v303_v3  ;;  %s281_s19 = int_to_ptr.vmem [resolvable:$true] %s280_s19 }
  0x5f   :  { %s5806_s20 = scalar_lea.vmem %s281_s19, 2048  ;;  %p5811_p13 = scmp.lt.s32.totalorder %s281_s19, %s281_s19 }
  0x60   :  { %p5807_p12 = scmp.ne.s32.totalorder %s281_s19, %s5806_s20  ;;  %p5812_p0 = scmp.lt.s32.totalorder %s5806_s20, %s5806_s20 }
  0x62   :  { %p5813_p1 = por %p5812_p0, %p5811_p13 }
  0x64   :  { %p5814_p2 = pnand %p5813_p1, %p5807_p12 }
  0x66   :  { %5817 = shalt.err (!%p5814_p2)  }
  0x67   :  { %283 = dma.hbm_to_vmem [thread:$0]  %s7050_s12, 2048, %s281_s19, [#allocation14 + $0x8] }
  0x68   :  { %330 = vsyncadd [#allocation14 + $0x9], 16  ;;  %v362_v4 = vld [vmem:[%s7053_s15] sm:$0x1]  ;;  %s5901_s13 = smov [#allocation12]  }
  0x69   :  { %s339_s1 = sshll.u32 %s5901_s13, 4  ;;  %363 = vst [vmem:[#allocation13] sm:$0x1] %v362_v4  ;;  %s340_s1 = int_to_ptr.vmem [resolvable:$true] %s339_s1 }
  0x6a   :  { %s5826_s22 = scalar_lea.vmem %s340_s1, 1024  ;;  %p5831_p4 = scmp.lt.s32.totalorder %s340_s1, %s340_s1 }
  0x6b   :  { %p5827_p3 = scmp.ne.s32.totalorder %s340_s1, %s5826_s22  ;;  %p5832_p5 = scmp.lt.s32.totalorder %s5826_s22, %s5826_s22 }
  0x6d   :  { %p5833_p6 = por %p5832_p5, %p5831_p4 }
  0x6f   :  { %p5834_p7 = pnand %p5833_p6, %p5827_p3 }
  0x71   :  { %5837 = shalt.err (!%p5834_p7)  }
  0x72   :  { %342 = dma.hbm_to_vmem [thread:$0]  %s7052_s14, 1024, %s340_s1, [#allocation14 + $0xa] }
  0x73   :  { %389 = vsyncadd [#allocation14 + $0xb], 16  ;;  %v5047_v5 = vld [vmem:[#allocation18 + $0xe4] ss:$16 sps:$4 sm:$0xff]   ;;  %v7055_v6 = vmov 0   ;;  %v5095_v40 = vld [vmem:[#allocation15] sm:$0xff]  }
  0x74   :  { %689 = vmatprep.mubr.bf16.mxu0 %v7055_v6  ;;  %750 = vmatprep.mubr.bf16.mxu1 %v7055_v6  ;;  %v5049_v7 = vld [vmem:[#allocation18 + $0xec] ss:$16 sps:$4 sm:$0xff]   ;;  %v5051_v8 = vld [vmem:[#allocation18 + $0xe0] ss:$16 sps:$4 sm:$0xff]   ;;  %v5052_v9 = vld [vmem:[#allocation18 + $0xe8] ss:$16 sps:$4 sm:$0xff]  }
  0x75   :  { %657 = vmatprep.subr.bf16.mxu0 %v5047_v5  ;;  %v5053_v10 = vld [vmem:[#allocation18 + $0xc4] ss:$16 sps:$4 sm:$0xff]   ;;  %718 = vmatprep.subr.bf16.mxu1 %v5049_v7  ;;  %v5055_v11 = vld [vmem:[#allocation18 + $0xcc] ss:$16 sps:$4 sm:$0xff]   ;;  %v5057_v12 = vld [vmem:[#allocation18 + $0xc0] ss:$16 sps:$4 sm:$0xff]  }
  0x76   :  { %658 = vmatpush1.bf16.msra.mxu0 %v5051_v8  ;;  %719 = vmatpush1.bf16.msra.mxu1 %v5052_v9  ;;  %v5058_v13 = vld [vmem:[#allocation18 + $0xc8] ss:$16 sps:$4 sm:$0xff]   ;;  %v5059_v14 = vld [vmem:[#allocation18 + $0xa4] ss:$16 sps:$4 sm:$0xff]   ;;  %v5061_v15 = vld [vmem:[#allocation18 + $0xac] ss:$16 sps:$4 sm:$0xff]  }
  0x77   :  { %659 = vmatprep.subr.bf16.mxu0 %v5053_v10  ;;  %720 = vmatprep.subr.bf16.mxu1 %v5055_v11  ;;  %v5063_v16 = vld [vmem:[#allocation18 + $0xa0] ss:$16 sps:$4 sm:$0xff]   ;;  %v5064_v17 = vld [vmem:[#allocation18 + $0xa8] ss:$16 sps:$4 sm:$0xff]   ;;  %v5065_v18 = vld [vmem:[#allocation18 + $0x84] ss:$16 sps:$4 sm:$0xff]   ;;  %v461_v10 = vlaneseq }
  0x78   :  { %v5067_v19 = vld [vmem:[#allocation18 + $0x8c] ss:$16 sps:$4 sm:$0xff]   ;;  %v5069_v20 = vld [vmem:[#allocation18 + $0x80] ss:$16 sps:$4 sm:$0xff]   ;;  %v5070_v21 = vld [vmem:[#allocation18 + $0x88] ss:$16 sps:$4 sm:$0xff]  }
  0x79   :  { %v5071_v22 = vld [vmem:[#allocation18 + $0x64] ss:$16 sps:$4 sm:$0xff]   ;;  %v5073_v23 = vld [vmem:[#allocation18 + $0x6c] ss:$16 sps:$4 sm:$0xff]   ;;  %v5075_v24 = vld [vmem:[#allocation18 + $0x60] ss:$16 sps:$4 sm:$0xff]  }
  0x7a   :  { %660 = vmatpush1.bf16.msra.mxu0 %v5057_v12  ;;  %721 = vmatpush1.bf16.msra.mxu1 %v5058_v13  ;;  %v5076_v25 = vld [vmem:[#allocation18 + $0x68] ss:$16 sps:$4 sm:$0xff]   ;;  %v5077_v26 = vld [vmem:[#allocation18 + $0x44] ss:$16 sps:$4 sm:$0xff]   ;;  %v5079_v27 = vld [vmem:[#allocation18 + $0x4c] ss:$16 sps:$4 sm:$0xff]  }
  0x7b   :  { %661 = vmatprep.subr.bf16.mxu0 %v5059_v14  ;;  %722 = vmatprep.subr.bf16.mxu1 %v5061_v15  ;;  %v5081_v28 = vld [vmem:[#allocation18 + $0x40] ss:$16 sps:$4 sm:$0xff]   ;;  %v5082_v29 = vld [vmem:[#allocation18 + $0x48] ss:$16 sps:$4 sm:$0xff]   ;;  %v5083_v30 = vld [vmem:[#allocation18 + $0x24] ss:$16 sps:$4 sm:$0xff]  }
  0x7c   :  { %v5085_v31 = vld [vmem:[#allocation18 + $0x2c] ss:$16 sps:$4 sm:$0xff]   ;;  %v5087_v32 = vld [vmem:[#allocation18 + $0x20] ss:$16 sps:$4 sm:$0xff]   ;;  %v5088_v33 = vld [vmem:[#allocation18 + $0x28] ss:$16 sps:$4 sm:$0xff]  }
  0x7d   :  { %v5089_v34 = vld [vmem:[#allocation18 + $0x4] ss:$16 sps:$4 sm:$0xff]   ;;  %v5091_v35 = vld [vmem:[#allocation18 + $0xc] ss:$16 sps:$4 sm:$0xff]   ;;  %v5093_v36 = vld [vmem:[#allocation18] ss:$16 sps:$4 sm:$0xff]  }
  0x7e   :  { %662 = vmatpush1.bf16.msra.mxu0 %v5063_v16  ;;  %723 = vmatpush1.bf16.msra.mxu1 %v5064_v17  ;;  %v5094_v37 = vld [vmem:[#allocation18 + $0x8] ss:$16 sps:$4 sm:$0xff]   ;;  %v6038_v38 = vld [vmem:[#allocation20 + $0xe4] ss:$16 sps:$4 sm:$0xff]   ;;  %v6040_v39 = vld [vmem:[#allocation20 + $0xec] ss:$16 sps:$4 sm:$0xff]  }
  0x7f   :  { %663 = vmatprep.subr.bf16.mxu0 %v5065_v18  ;;  %724 = vmatprep.subr.bf16.mxu1 %v5067_v19  ;;  %v6042_v41 = vld [vmem:[#allocation20 + $0xe0] ss:$16 sps:$4 sm:$0xff]   ;;  %v6045_v42 = vld [vmem:[#allocation20 + $0xe8] ss:$16 sps:$4 sm:$0xff]   ;;  %v6047_v43 = vld [vmem:[#allocation20 + $0xc4] ss:$16 sps:$4 sm:$0xff]  }
  0x80   :  { %v6050_v44 = vld [vmem:[#allocation20 + $0xcc] ss:$16 sps:$4 sm:$0xff]   ;;  %v6053_v45 = vld [vmem:[#allocation20 + $0xc0] ss:$16 sps:$4 sm:$0xff]   ;;  %v6055_v46 = vld [vmem:[#allocation20 + $0xc8] ss:$16 sps:$4 sm:$0xff]  }
  0x81   :  { %v6059_v47 = vld [vmem:[#allocation20 + $0xa4] ss:$16 sps:$4 sm:$0xff]   ;;  %v6062_v48 = vld [vmem:[#allocation20 + $0xac] ss:$16 sps:$4 sm:$0xff]   ;;  %v6065_v49 = vld [vmem:[#allocation20 + $0xa0] ss:$16 sps:$4 sm:$0xff]  }
  0x82   :  { %664 = vmatpush1.bf16.msra.mxu0 %v5069_v20  ;;  %725 = vmatpush1.bf16.msra.mxu1 %v5070_v21  ;;  %v5114_v50 = vld [vmem:[#allocation15 + $0x8] sm:$0xff]   ;;  %v6076_v53 = vld [vmem:[#allocation20 + $0x8c] ss:$16 sps:$4 sm:$0xff]   ;;  %v6079_v54 = vld [vmem:[#allocation20 + $0x80] ss:$16 sps:$4 sm:$0xff]   ;;  %v462_v11 = vshrl.u32 %v461_v10, 7 }
  0x83   :  { %665 = vmatprep.subr.bf16.mxu0 %v5071_v22  ;;  %726 = vmatprep.subr.bf16.mxu1 %v5073_v23  ;;  %v6069_v51 = vld [vmem:[#allocation20 + $0xa8] ss:$16 sps:$4 sm:$0xff]   ;;  %v6073_v52 = vld [vmem:[#allocation20 + $0x84] ss:$16 sps:$4 sm:$0xff]   ;;  %v6088_v57 = vld [vmem:[#allocation20 + $0x6c] ss:$16 sps:$4 sm:$0xff]  }
  0x84   :  { %v6083_v55 = vld [vmem:[#allocation20 + $0x88] ss:$16 sps:$4 sm:$0xff]   ;;  %v6085_v56 = vld [vmem:[#allocation20 + $0x64] ss:$16 sps:$4 sm:$0xff]   ;;  %v5127_v58 = vld [vmem:[#allocation15 + $0x10] ss:$0 sps:$4 sm:$0xff]  }
  0x85   :  { %v6093_v59 = vld [vmem:[#allocation20 + $0x60] ss:$16 sps:$4 sm:$0xff]   ;;  %v6097_v60 = vld [vmem:[#allocation20 + $0x68] ss:$16 sps:$4 sm:$0xff]   ;;  %v6099_v61 = vld [vmem:[#allocation20 + $0x44] ss:$16 sps:$4 sm:$0xff]  }
  0x86   :  { %666 = vmatpush1.bf16.msra.mxu0 %v5075_v24  ;;  %727 = vmatpush1.bf16.msra.mxu1 %v5076_v25  ;;  %v6102_v62 = vld [vmem:[#allocation20 + $0x4c] ss:$16 sps:$4 sm:$0xff]   ;;  %v6105_v63 = vld [vmem:[#allocation20 + $0x40] ss:$16 sps:$4 sm:$0xff]   ;;  %v6109_v0 = vld [vmem:[#allocation20 + $0x48] ss:$16 sps:$4 sm:$0xff]  }
  0x87   :  { %667 = vmatprep.subr.bf16.mxu0 %v5077_v26  ;;  %728 = vmatprep.subr.bf16.mxu1 %v5079_v27  ;;  %v6111_v1 = vld [vmem:[#allocation20 + $0x24] ss:$16 sps:$4 sm:$0xff]   ;;  %v6114_v2 = vld [vmem:[#allocation20 + $0x2c] ss:$16 sps:$4 sm:$0xff]   ;;  %v6119_v3 = vld [vmem:[#allocation20 + $0x20] ss:$16 sps:$4 sm:$0xff]  }
  0x88   :  { %v6123_v4 = vld [vmem:[#allocation20 + $0x28] ss:$16 sps:$4 sm:$0xff]   ;;  %v6125_v5 = vld [vmem:[#allocation20 + $0x4] ss:$16 sps:$4 sm:$0xff]   ;;  %v6128_v7 = vld [vmem:[#allocation20 + $0xc] ss:$16 sps:$4 sm:$0xff]  }
  0x89   :  { %v6131_v8 = vld [vmem:[#allocation20] ss:$16 sps:$4 sm:$0xff]   ;;  %v6135_v9 = vld [vmem:[#allocation20 + $0x8] ss:$16 sps:$4 sm:$0xff]   ;;  %v6178_v12 = vsub.s32 2, %v462_v11  ;;  %v6180_v13 = vsub.s32 0, %v462_v11 }
  0x8a   :  { %668 = vmatpush1.bf16.msra.mxu0 %v5081_v28  ;;  %729 = vmatpush1.bf16.msra.mxu1 %v5082_v29  ;;  %v459_v14 = vld [vmem:[%s7041_s3] sm:$0xf]  ;;  %v6185_v16 = vsub.s32 3, %v462_v11  ;;  %v6187_v17 = vsub.s32 1, %v462_v11 }
  0x8b   :  { %669 = vmatprep.subr.bf16.mxu0 %v5083_v30  ;;  %730 = vmatprep.subr.bf16.mxu1 %v5085_v31  ;;  %7067 = vst [vmem:[#allocation58_spill] sm:$0xff] %v6178_v12  ;;  %7068 = vst [vmem:[#allocation59_spill] sm:$0xff] %v6180_v13  ;;  %v472_v20 = vrot.slane %v459_v14, %v6178_v12  ;;  %v464_v21 = vrot.slane %v459_v14, %v6180_v13 }
  0x8c   :  { %7069 = vst [vmem:[#allocation60_spill] sm:$0xff] %v6185_v16  ;;  %7070 = vst [vmem:[#allocation61_spill] sm:$0xff] %v6187_v17  ;;  %v476_v24 = vrot.slane %v459_v14, %v6185_v16  ;;  %v468_v25 = vrot.slane %v459_v14, %v6187_v17 }
  0x8e   :  { %670 = vmatpush1.bf16.msra.mxu0 %v5087_v32  ;;  %731 = vmatpush1.bf16.msra.mxu1 %v5088_v33 }
  0x8f   :  { %671 = vmatprep.subr.bf16.mxu0 %v5089_v34  ;;  %732 = vmatprep.subr.bf16.mxu1 %v5091_v35 }
  0x92   :  { %672 = vmatpush1.bf16.msra.mxu0 %v5093_v36  ;;  %733 = vmatpush1.bf16.msra.mxu1 %v5094_v37 }
  0x93   :  { %939 = vmatprep.subr.bf16.mxu0 %v6038_v38  ;;  %980 = vmatprep.subr.bf16.mxu1 %v6040_v39 }
  0x95   :  { %690 = vmatmul.mubr.bf16.vlgmr.msra.gmra.mxu0 %v5095_v40  ;;  %751 = vmatmul.mubr.bf16.vlgmr.msra.gmra.mxu1 %v5095_v40 }
  0x96   :  { %940 = vmatpush1.bf16.msra.mxu0 %v6042_v41  ;;  %981 = vmatpush1.bf16.msra.mxu1 %v6045_v42 }
  0x97   :  { %941 = vmatprep.subr.bf16.mxu0 %v6047_v43  ;;  %982 = vmatprep.subr.bf16.mxu1 %v6050_v44 }
  0x98   :  { %699 = vmatprep.mubr.bf16.mxu0 %v7055_v6  ;;  %760 = vmatprep.mubr.bf16.mxu1 %v7055_v6 }
  0x9a   :  { %942 = vmatpush1.bf16.msra.mxu0 %v6053_v45  ;;  %983 = vmatpush1.bf16.msra.mxu1 %v6055_v46 }
  0x9b   :  { %943 = vmatprep.subr.bf16.mxu0 %v6059_v47  ;;  %984 = vmatprep.subr.bf16.mxu1 %v6062_v48 }
  0x9d   :  { %700 = vmatmul.mubr.bf16.gmra.mxu0 %v5114_v50  ;;  %761 = vmatmul.mubr.bf16.gmra.mxu1 %v5114_v50 }
  0x9e   :  { %944 = vmatpush1.bf16.msra.mxu0 %v6065_v49  ;;  %985 = vmatpush1.bf16.msra.mxu1 %v6069_v51 }
  0x9f   :  { %945 = vmatprep.subr.bf16.mxu0 %v6073_v52  ;;  %986 = vmatprep.subr.bf16.mxu1 %v6076_v53 }
  0xa0   :  { %709 = vmatprep.mubr.bf16.mxu0 %v7055_v6  ;;  %770 = vmatprep.mubr.bf16.mxu1 %v7055_v6 }
  0xa2   :  { %946 = vmatpush1.bf16.msra.mxu0 %v6079_v54  ;;  %987 = vmatpush1.bf16.msra.mxu1 %v6083_v55 }
  0xa3   :  { %947 = vmatprep.subr.bf16.mxu0 %v6085_v56  ;;  %988 = vmatprep.subr.bf16.mxu1 %v6088_v57 }
  0xa5   :  { %710 = vmatmul.mubr.bf16.gmra.mxu0 %v5127_v58  ;;  %771 = vmatmul.mubr.bf16.gmra.mxu1 %v5127_v58 }
  0xa6   :  { %948 = vmatpush1.bf16.msra.mxu0 %v6093_v59  ;;  %989 = vmatpush1.bf16.msra.mxu1 %v6097_v60 }
  0xa7   :  { %949 = vmatprep.subr.bf16.mxu0 %v6099_v61  ;;  %990 = vmatprep.subr.bf16.mxu1 %v6102_v62 }
  0xa8   :  { %971 = vmatprep.mubr.bf16.mxu0 %v7055_v6  ;;  %1012 = vmatprep.mubr.bf16.mxu1 %v7055_v6 }
  0xaa   :  { %950 = vmatpush1.bf16.msra.mxu0 %v6105_v63  ;;  %991 = vmatpush1.bf16.msra.mxu1 %v6109_v0 }
  0xab   :  { %951 = vmatprep.subr.bf16.mxu0 %v6111_v1  ;;  %992 = vmatprep.subr.bf16.mxu1 %v6114_v2 }
  0xae   :  { %952 = vmatpush1.bf16.msra.mxu0 %v6119_v3  ;;  %993 = vmatpush1.bf16.msra.mxu1 %v6123_v4 }
  0xaf   :  { %953 = vmatprep.subr.bf16.mxu0 %v6125_v5  ;;  %994 = vmatprep.subr.bf16.mxu1 %v6128_v7 }
  0xb2   :  { %954 = vmatpush1.bf16.msra.mxu0 %v6131_v8  ;;  %995 = vmatpush1.bf16.msra.mxu1 %v6135_v9 }
  0xb3   :  { %1044 = vmatprep.subr.bf16.mxu0 %v6038_v38  ;;  %1085 = vmatprep.subr.bf16.mxu1 %v6040_v39 }
  0xb5   :  { %972 = vmatmul.mubr.bf16.vlgmr.msra.gmra.mxu0 %v7055_v6  ;;  %1013 = vmatmul.mubr.bf16.vlgmr.msra.gmra.mxu1 %v7055_v6 }
  0xb6   :  { %1045 = vmatpush1.bf16.msra.mxu0 %v6042_v41  ;;  %1086 = vmatpush1.bf16.msra.mxu1 %v6045_v42 }
  0xb7   :  { %1046 = vmatprep.subr.bf16.mxu0 %v6047_v43  ;;  %1087 = vmatprep.subr.bf16.mxu1 %v6050_v44 }
  0xb8   :  { %1076 = vmatprep.mubr.bf16.mxu0 %v7055_v6  ;;  %1117 = vmatprep.mubr.bf16.mxu1 %v7055_v6 }
  0xba   :  { %1047 = vmatpush1.bf16.msra.mxu0 %v6053_v45  ;;  %1088 = vmatpush1.bf16.msra.mxu1 %v6055_v46 }
  0xbb   :  { %1048 = vmatprep.subr.bf16.mxu0 %v6059_v47  ;;  %1089 = vmatprep.subr.bf16.mxu1 %v6062_v48 }
  0xbe   :  { %1049 = vmatpush1.bf16.msra.mxu0 %v6065_v49  ;;  %1090 = vmatpush1.bf16.msra.mxu1 %v6069_v51 }
  0xbf   :  { %1050 = vmatprep.subr.bf16.mxu0 %v6073_v52  ;;  %1091 = vmatprep.subr.bf16.mxu1 %v6076_v53 }
  0xc2   :  { %1051 = vmatpush1.bf16.msra.mxu0 %v6079_v54  ;;  %1092 = vmatpush1.bf16.msra.mxu1 %v6083_v55 }
  0xc3   :  { %1052 = vmatprep.subr.bf16.mxu0 %v6085_v56  ;;  %1093 = vmatprep.subr.bf16.mxu1 %v6088_v57 }
  0xc6   :  { %1053 = vmatpush1.bf16.msra.mxu0 %v6093_v59  ;;  %1094 = vmatpush1.bf16.msra.mxu1 %v6097_v60 }
  0xc7   :  { %1054 = vmatprep.subr.bf16.mxu0 %v6099_v61  ;;  %1095 = vmatprep.subr.bf16.mxu1 %v6102_v62 }
  0xca   :  { %1055 = vmatpush1.bf16.msra.mxu0 %v6105_v63  ;;  %1096 = vmatpush1.bf16.msra.mxu1 %v6109_v0 }
  0xcb   :  { %1056 = vmatprep.subr.bf16.mxu0 %v6111_v1  ;;  %1097 = vmatprep.subr.bf16.mxu1 %v6114_v2 }
  0xce   :  { %1057 = vmatpush1.bf16.msra.mxu0 %v6119_v3  ;;  %1098 = vmatpush1.bf16.msra.mxu1 %v6123_v4 }
  0xcf   :  { %1058 = vmatprep.subr.bf16.mxu0 %v6125_v5  ;;  %1099 = vmatprep.subr.bf16.mxu1 %v6128_v7 }
  0xd2   :  { %1059 = vmatpush1.bf16.msra.mxu0 %v6131_v8  ;;  %1100 = vmatpush1.bf16.msra.mxu1 %v6135_v9 }
  0xd3   :  { %1149 = vmatprep.subr.bf16.mxu0 %v6038_v38  ;;  %1190 = vmatprep.subr.bf16.mxu1 %v6040_v39 }
 0x155   :  { %v691_v15 = vpop.f32.mrf.mxu0  ;;  %v752_v18 = vpop.f32.mrf.mxu1 }
 0x157   :  { %v693_v19 = vpop.f32.mrf.mxu0  ;;  %v754_v22 = vpop.f32.mrf.mxu1 }
 0x159   :  { %v695_v23 = vpop.f32.mrf.mxu0  ;;  %v756_v27 = vpop.f32.mrf.mxu1 }
 0x15a   :  { %v6193_v26 = vadd.f32 %v695_v23, %v464_v21  ;;  %v6195_v29 = vadd.f32 %v756_v27, %v472_v20 }
 0x15b   :  { %v697_v28 = vpop.f32.mrf.mxu0  ;;  %v758_v31 = vpop.f32.mrf.mxu1 }
 0x15c   :  { %v6197_v30 = vadd.f32 %v697_v28, %v468_v25  ;;  %v6199_v32 = vadd.f32 %v758_v31, %v476_v24 }
 0x15d   :  { %v701_v33 = vpop.f32.mrf.mxu0  ;;  %v762_v35 = vpop.f32.mrf.mxu1 }
 0x15e   :  { %v6201_v34 = vadd.f32 %v701_v33, %v464_v21  ;;  %v6203_v37 = vadd.f32 %v762_v35, %v472_v20 }
 0x15f   :  { %v703_v36 = vpop.f32.mrf.mxu0  ;;  %v764_v50 = vpop.f32.mrf.mxu1 }
 0x160   :  { %7071 = vst [vmem:[#allocation62_spill] sm:$0xff] %v6203_v37  ;;  %v6205_v40 = vadd.f32 %v703_v36, %v468_v25  ;;  %v6207_v10 = vadd.f32 %v764_v50, %v476_v24 }
 0x161   :  { %v705_v58 = vpop.f32.mrf.mxu0  ;;  %v766_v14 = vpop.f32.mrf.mxu1 }
 0x162   :  { %7072 = vst [vmem:[#allocation63_spill] sm:$0xff] %v6205_v40  ;;  %7073 = vst [vmem:[#allocation64_spill] sm:$0xff] %v6207_v10  ;;  %v6209_v11 = vadd.f32 %v705_v58, %v464_v21  ;;  %v6211_v27 = vadd.f32 %v766_v14, %v472_v20  ;;  %v694_v10 = vadd.f32 %v693_v19, %v468_v25 }
 0x163   :  { %v707_v23 = vpop.f32.mrf.mxu0  ;;  %v768_v31 = vpop.f32.mrf.mxu1 }
 0x164   :  { %7074 = vst [vmem:[#allocation65_spill] sm:$0xff] %v6209_v11  ;;  %7075 = vst [vmem:[#allocation66_spill] sm:$0xff] %v6211_v27  ;;  %v6213_v28 = vadd.f32 %v707_v23, %v468_v25  ;;  %v6215_v6 = vadd.f32 %v768_v31, %v476_v24 }
 0x165   :  { %v711_v33 = vpop.f32.mrf.mxu0  ;;  %v772_v36 = vpop.f32.mrf.mxu1 }
 0x166   :  { %7076 = vst [vmem:[#allocation67_spill] sm:$0xff] %v6213_v28  ;;  %7077 = vst [vmem:[#allocation68_spill] sm:$0xff] %v6215_v6  ;;  %v6217_v35 = vadd.f32 %v711_v33, %v464_v21  ;;  %v6219_v16 = vadd.f32 %v772_v36, %v472_v20  ;;  %v692_v28 = vadd.f32 %v691_v15, %v464_v21 }
 0x167   :  { %v713_v17 = vpop.f32.mrf.mxu0  ;;  %v774_v58 = vpop.f32.mrf.mxu1 }
 0x168   :  { %7078 = vst [vmem:[#allocation69_spill] sm:$0xff] %v6217_v35  ;;  %7079 = vst [vmem:[#allocation70_spill] sm:$0xff] %v6219_v16  ;;  %v6221_v50 = vadd.f32 %v713_v17, %v468_v25  ;;  %v6223_v12 = vadd.f32 %v774_v58, %v476_v24  ;;  %v753_v16 = vadd.f32 %v752_v18, %v472_v20 }
 0x169   :  { %v715_v13 = vpop.f32.mrf.mxu0  ;;  %v776_v14 = vpop.f32.mrf.mxu1 }
 0x16a   :  { %7080 = vst [vmem:[#allocation71_spill] sm:$0xff] %v6221_v50 }
 0x16b   :  { %v716_v27 = vpop.f32.mrf.mxu0  ;;  %v777_v23 = vpop.f32.mrf.mxu1 }
 0x16c   :  { %v755_v27 = vadd.f32 %v754_v22, %v476_v24 }
 0x175   :  { %v973_v11 = vpop.f32.mrf.mxu0  ;;  %v1014_v6 = vpop.f32.mrf.mxu1 }
 0x176   :  { %v1021_v31 = vadd.f32 %v973_v11, %v692_v28  ;;  %v1023_v58 = vadd.f32 %v1014_v6, %v753_v16 }
 0x177   :  { %v975_v33 = vpop.f32.mrf.mxu0  ;;  %v1016_v40 = vpop.f32.mrf.mxu1 }
 0x178   :  { %v1025_v35 = vmul.f32 0.5, %v1021_v31  ;;  %v1022_v37 = vadd.f32 %v975_v33, %v694_v10  ;;  %v1024_v15 = vadd.f32 %v1016_v40, %v755_v27 }
 0x179   :  { %v977_v36 = vpop.f32.mrf.mxu0  ;;  %v1018_v50 = vpop.f32.mrf.mxu1 }
 0x17a   :  { %5146 = vtanh.f32 %v1025_v35  ;;  %v1029_v17 = vmul.f32 0.5, %v1022_v37  ;;  %v1034_v21 = vmul.f32 0.5, %v1024_v15  ;;  %v7081_v50 = vmov 0  }
 0x17b   :  { %v978_v13 = vpop.f32.mrf.mxu0  ;;  %v1019_v14 = vpop.f32.mrf.mxu1 }
 0x17c   :  { %5148 = vtanh.f32 %v1029_v17 }
 0x17d   :  { %5150 = vtanh.f32 %v1023_v58 }
 0x17e   :  { %5152 = vtanh.f32 %v1034_v21 }
 0x187   :  { %v5147_v19 = vpop.eup %5146 }
 0x188   :  { %v1027_v25 = vmul.f32 0.5, %v5147_v19 }
 0x189   :  { %v5149_v11 = vpop.eup %5148 }
 0x18a   :  { %v1028_v28 = vadd.f32 0.5, %v1027_v25  ;;  %v1031_v23 = vmul.f32 0.5, %v5149_v11  ;;  %v5151_v31 = vpop.eup %5150 }
 0x18b   :  { %v5153_v6 = vpop.eup %5152 }
 0x18c   :  { %v1032_v10 = vadd.f32 0.5, %v1031_v23  ;;  %v1039_v20 = vmul.f32 %v5151_v31, %v1028_v28  ;;  %v1036_v16 = vmul.f32 0.5, %v5153_v6 }
 0x18e   :  { %v1038_v18 = vmul.f32 0.0, %v1032_v10  ;;  %v1037_v22 = vadd.f32 0.5, %v1036_v16 }
 0x190   :  { %v6225_v37 = vadd.f32 %v1039_v20, %v1038_v18 }
 0x192   :  { %5154 = vtanh.f32 %v6225_v37 }
 0x19f   :  { %v5155_v24 = vpop.eup %5154 }
 0x1a0   :  { %v6228_v40 = vmul.f32 %v5155_v24, %v1037_v22 }
 0x1a2   :  { %v1043_v35 = vpack.c.bf16 %v6228_v40, %v6228_v40 }
 0x1a4   :  { %1077 = vmatmul.mubr.bf16.vlgmr.msra.gmra.mxu0 %v1043_v35  ;;  %1118 = vmatmul.mubr.bf16.vlgmr.msra.gmra.mxu1 %v1043_v35 }
 0x1a5   :  { %1150 = vmatpush1.bf16.msra.mxu0 %v6042_v41  ;;  %1191 = vmatpush1.bf16.msra.mxu1 %v6045_v42 }
 0x1a6   :  { %1151 = vmatprep.subr.bf16.mxu0 %v6047_v43  ;;  %1192 = vmatprep.subr.bf16.mxu1 %v6050_v44 }
 0x1a7   :  { %1181 = vmatprep.mubr.bf16.mxu0 %v7081_v50  ;;  %1222 = vmatprep.mubr.bf16.mxu1 %v7081_v50 }
 0x1a9   :  { %1152 = vmatpush1.bf16.msra.mxu0 %v6053_v45  ;;  %1193 = vmatpush1.bf16.msra.mxu1 %v6055_v46 }
 0x1aa   :  { %1153 = vmatprep.subr.bf16.mxu0 %v6059_v47  ;;  %1194 = vmatprep.subr.bf16.mxu1 %v6062_v48 }
 0x1ad   :  { %1154 = vmatpush1.bf16.msra.mxu0 %v6065_v49  ;;  %1195 = vmatpush1.bf16.msra.mxu1 %v6069_v51 }
 0x1ae   :  { %1155 = vmatprep.subr.bf16.mxu0 %v6073_v52  ;;  %1196 = vmatprep.subr.bf16.mxu1 %v6076_v53 }
 0x1b1   :  { %1156 = vmatpush1.bf16.msra.mxu0 %v6079_v54  ;;  %1197 = vmatpush1.bf16.msra.mxu1 %v6083_v55 }
 0x1b2   :  { %1157 = vmatprep.subr.bf16.mxu0 %v6085_v56  ;;  %1198 = vmatprep.subr.bf16.mxu1 %v6088_v57 }
 0x1b5   :  { %1158 = vmatpush1.bf16.msra.mxu0 %v6093_v59  ;;  %1199 = vmatpush1.bf16.msra.mxu1 %v6097_v60 }
 0x1b6   :  { %1159 = vmatprep.subr.bf16.mxu0 %v6099_v61  ;;  %1200 = vmatprep.subr.bf16.mxu1 %v6102_v62 }
 0x1b9   :  { %1160 = vmatpush1.bf16.msra.mxu0 %v6105_v63  ;;  %1201 = vmatpush1.bf16.msra.mxu1 %v6109_v0 }
 0x1ba   :  { %1161 = vmatprep.subr.bf16.mxu0 %v6111_v1  ;;  %1202 = vmatprep.subr.bf16.mxu1 %v6114_v2 }
 0x1bd   :  { %1162 = vmatpush1.bf16.msra.mxu0 %v6119_v3  ;;  %1203 = vmatpush1.bf16.msra.mxu1 %v6123_v4 }
 0x1be   :  { %1163 = vmatprep.subr.bf16.mxu0 %v6125_v5  ;;  %1204 = vmatprep.subr.bf16.mxu1 %v6128_v7 }
 0x1c1   :  { %1164 = vmatpush1.bf16.msra.mxu0 %v6131_v8  ;;  %1205 = vmatpush1.bf16.msra.mxu1 %v6135_v9 }
 0x1c2   :  { %1254 = vmatprep.subr.bf16.mxu0 %v6038_v38  ;;  %1295 = vmatprep.subr.bf16.mxu1 %v6040_v39 }
 0x264   :  { %v1078_v33 = vpop.f32.mrf.mxu0  ;;  %v1119_v36 = vpop.f32.mrf.mxu1 }
 0x265   :  { %v1126_v17 = vadd.f32 %v1078_v33, %v6193_v26  ;;  %v1128_v19 = vadd.f32 %v1119_v36, %v6195_v29 }
 0x266   :  { %v1080_v13 = vpop.f32.mrf.mxu0  ;;  %v1121_v58 = vpop.f32.mrf.mxu1 }
 0x267   :  { %v1130_v14 = vmul.f32 0.5, %v1126_v17  ;;  %v1127_v27 = vadd.f32 %v1080_v13, %v6197_v30  ;;  %v1129_v23 = vadd.f32 %v1121_v58, %v6199_v32 }
 0x268   :  { %v1082_v15 = vpop.f32.mrf.mxu0  ;;  %v1123_v21 = vpop.f32.mrf.mxu1 }
 0x269   :  { %5156 = vtanh.f32 %v1130_v14  ;;  %v1134_v25 = vmul.f32 0.5, %v1127_v27  ;;  %v1139_v10 = vmul.f32 0.5, %v1129_v23  ;;  %v7083_v23 = vld [vmem:[#allocation62_spill] sm:$0xff] }
 0x26a   :  { %v1083_v11 = vpop.f32.mrf.mxu0  ;;  %v1124_v28 = vpop.f32.mrf.mxu1 }
 0x26b   :  { %5158 = vtanh.f32 %v1134_v25 }
 0x26c   :  { %5160 = vtanh.f32 %v1128_v19  ;;  %v7082_v19 = vld [vmem:[#allocation63_spill] sm:$0xff] }
 0x26d   :  { %5162 = vtanh.f32 %v1139_v10 }
 0x276   :  { %v5157_v31 = vpop.eup %5156 }
 0x277   :  { %v1132_v26 = vmul.f32 0.5, %v5157_v31 }
 0x278   :  { %v5159_v18 = vpop.eup %5158 }
 0x279   :  { %v1133_v20 = vadd.f32 0.5, %v1132_v26  ;;  %v1136_v6 = vmul.f32 0.5, %v5159_v18  ;;  %v5161_v30 = vpop.eup %5160 }
 0x27a   :  { %v5163_v35 = vpop.eup %5162 }
 0x27b   :  { %v1137_v16 = vadd.f32 0.5, %v1136_v6  ;;  %v1144_v22 = vmul.f32 %v5161_v30, %v1133_v20  ;;  %v1141_v33 = vmul.f32 0.5, %v5163_v35 }
 0x27d   :  { %v1143_v24 = vmul.f32 %v1137_v16, %v6225_v37  ;;  %v1142_v36 = vadd.f32 0.5, %v1141_v33 }
 0x27f   :  { %v6271_v29 = vadd.f32 %v1144_v22, %v1143_v24 }
 0x281   :  { %5164 = vtanh.f32 %v6271_v29 }
 0x28e   :  { %v5165_v32 = vpop.eup %5164 }
 0x28f   :  { %v6274_v17 = vmul.f32 %v5165_v32, %v1142_v36 }
 0x291   :  { %v1148_v13 = vpack.c.bf16 %v6274_v17, %v6274_v17 }
 0x293   :  { %1182 = vmatmul.mubr.bf16.vlgmr.msra.gmra.mxu0 %v1148_v13  ;;  %1223 = vmatmul.mubr.bf16.vlgmr.msra.gmra.mxu1 %v1148_v13 }
 0x294   :  { %1255 = vmatpush1.bf16.msra.mxu0 %v6042_v41  ;;  %1296 = vmatpush1.bf16.msra.mxu1 %v6045_v42 }
 0x295   :  { %1256 = vmatprep.subr.bf16.mxu0 %v6047_v43  ;;  %1297 = vmatprep.subr.bf16.mxu1 %v6050_v44 }
 0x296   :  { %1286 = vmatprep.mubr.bf16.mxu0 %v7081_v50  ;;  %1327 = vmatprep.mubr.bf16.mxu1 %v7081_v50 }
 0x298   :  { %1257 = vmatpush1.bf16.msra.mxu0 %v6053_v45  ;;  %1298 = vmatpush1.bf16.msra.mxu1 %v6055_v46 }
 0x299   :  { %1258 = vmatprep.subr.bf16.mxu0 %v6059_v47  ;;  %1299 = vmatprep.subr.bf16.mxu1 %v6062_v48 }
 0x29c   :  { %1259 = vmatpush1.bf16.msra.mxu0 %v6065_v49  ;;  %1300 = vmatpush1.bf16.msra.mxu1 %v6069_v51 }
 0x29d   :  { %1260 = vmatprep.subr.bf16.mxu0 %v6073_v52  ;;  %1301 = vmatprep.subr.bf16.mxu1 %v6076_v53 }
 0x2a0   :  { %1261 = vmatpush1.bf16.msra.mxu0 %v6079_v54  ;;  %1302 = vmatpush1.bf16.msra.mxu1 %v6083_v55 }
 0x2a1   :  { %1262 = vmatprep.subr.bf16.mxu0 %v6085_v56  ;;  %1303 = vmatprep.subr.bf16.mxu1 %v6088_v57 }
 0x2a4   :  { %1263 = vmatpush1.bf16.msra.mxu0 %v6093_v59  ;;  %1304 = vmatpush1.bf16.msra.mxu1 %v6097_v60 }
 0x2a5   :  { %1264 = vmatprep.subr.bf16.mxu0 %v6099_v61  ;;  %1305 = vmatprep.subr.bf16.mxu1 %v6102_v62 }
 0x2a8   :  { %1265 = vmatpush1.bf16.msra.mxu0 %v6105_v63  ;;  %1306 = vmatpush1.bf16.msra.mxu1 %v6109_v0 }
 0x2a9   :  { %1266 = vmatprep.subr.bf16.mxu0 %v6111_v1  ;;  %1307 = vmatprep.subr.bf16.mxu1 %v6114_v2 }
 0x2ac   :  { %1267 = vmatpush1.bf16.msra.mxu0 %v6119_v3  ;;  %1308 = vmatpush1.bf16.msra.mxu1 %v6123_v4 }
 0x2ad   :  { %1268 = vmatprep.subr.bf16.mxu0 %v6125_v5  ;;  %1309 = vmatprep.subr.bf16.mxu1 %v6128_v7 }
 0x2b0   :  { %1269 = vmatpush1.bf16.msra.mxu0 %v6131_v8  ;;  %1310 = vmatpush1.bf16.msra.mxu1 %v6135_v9 }
 0x2b1   :  { %1359 = vmatprep.subr.bf16.mxu0 %v6038_v38  ;;  %1400 = vmatprep.subr.bf16.mxu1 %v6040_v39  ;;  %v7084_v38 = vld [vmem:[#allocation64_spill] sm:$0xff] }
 0x353   :  { %v1183_v37 = vpop.f32.mrf.mxu0  ;;  %v1224_v58 = vpop.f32.mrf.mxu1 }
 0x354   :  { %v1231_v14 = vadd.f32 %v1183_v37, %v6201_v34  ;;  %v1233_v10 = vadd.f32 %v1224_v58, %v7083_v23 }
 0x355   :  { %v1185_v27 = vpop.f32.mrf.mxu0  ;;  %v1226_v15 = vpop.f32.mrf.mxu1 }
 0x356   :  { %v1235_v21 = vmul.f32 0.5, %v1231_v14  ;;  %v1232_v25 = vadd.f32 %v1185_v27, %v7082_v19  ;;  %v1234_v39 = vadd.f32 %v1226_v15, %v7084_v38 }
 0x357   :  { %v1187_v11 = vpop.f32.mrf.mxu0  ;;  %v1228_v28 = vpop.f32.mrf.mxu1 }
 0x358   :  { %5166 = vtanh.f32 %v1235_v21  ;;  %v1239_v31 = vmul.f32 0.5, %v1232_v25  ;;  %v1244_v20 = vmul.f32 0.5, %v1234_v39  ;;  %v7090_v39 = vld [vmem:[#allocation71_spill] sm:$0xff] }
 0x359   :  { %v1188_v26 = vpop.f32.mrf.mxu0  ;;  %v1229_v18 = vpop.f32.mrf.mxu1 }
 0x35a   :  { %5168 = vtanh.f32 %v1239_v31 }
 0x35b   :  { %5170 = vtanh.f32 %v1233_v10  ;;  %v7089_v10 = vld [vmem:[#allocation69_spill] sm:$0xff] }
 0x35c   :  { %5172 = vtanh.f32 %v1244_v20 }
 0x365   :  { %v5167_v6 = vpop.eup %5166 }
 0x366   :  { %v1237_v34 = vmul.f32 0.5, %v5167_v6 }
 0x367   :  { %v5169_v30 = vpop.eup %5168 }
 0x368   :  { %v1238_v16 = vadd.f32 0.5, %v1237_v34  ;;  %v1241_v22 = vmul.f32 0.5, %v5169_v30  ;;  %v5171_v24 = vpop.eup %5170  ;;  %v7091_v30 = vld [vmem:[#allocation70_spill] sm:$0xff] }
 0x369   :  { %v5173_v13 = vpop.eup %5172 }
 0x36a   :  { %v1242_v35 = vadd.f32 0.5, %v1241_v22  ;;  %v1249_v33 = vmul.f32 %v5171_v24, %v1238_v16  ;;  %v1246_v37 = vmul.f32 0.5, %v5173_v13 }
 0x36c   :  { %v1248_v36 = vmul.f32 %v1242_v35, %v6271_v29  ;;  %v1247_v58 = vadd.f32 0.5, %v1246_v37 }
 0x36e   :  { %v6317_v32 = vadd.f32 %v1249_v33, %v1248_v36 }
 0x370   :  { %5174 = vtanh.f32 %v6317_v32 }
 0x37d   :  { %v5175_v14 = vpop.eup %5174 }
 0x37e   :  { %v6320_v27 = vmul.f32 %v5175_v14, %v1247_v58 }
 0x380   :  { %v1253_v15 = vpack.c.bf16 %v6320_v27, %v6320_v27 }
 0x382   :  { %1287 = vmatmul.mubr.bf16.vlgmr.msra.gmra.mxu0 %v1253_v15  ;;  %1328 = vmatmul.mubr.bf16.vlgmr.msra.gmra.mxu1 %v1253_v15 }
 0x383   :  { %1360 = vmatpush1.bf16.msra.mxu0 %v6042_v41  ;;  %1401 = vmatpush1.bf16.msra.mxu1 %v6045_v42 }
 0x384   :  { %1361 = vmatprep.subr.bf16.mxu0 %v6047_v43  ;;  %1402 = vmatprep.subr.bf16.mxu1 %v6050_v44  ;;  %v7085_v43 = vld [vmem:[#allocation65_spill] sm:$0xff] }
 0x385   :  { %1391 = vmatprep.mubr.bf16.mxu0 %v7081_v50  ;;  %1432 = vmatprep.mubr.bf16.mxu1 %v7081_v50 }
 0x387   :  { %1362 = vmatpush1.bf16.msra.mxu0 %v6053_v45  ;;  %1403 = vmatpush1.bf16.msra.mxu1 %v6055_v46 }
 0x388   :  { %1363 = vmatprep.subr.bf16.mxu0 %v6059_v47  ;;  %1404 = vmatprep.subr.bf16.mxu1 %v6062_v48  ;;  %v7086_v48 = vld [vmem:[#allocation67_spill] sm:$0xff] }
 0x38b   :  { %1364 = vmatpush1.bf16.msra.mxu0 %v6065_v49  ;;  %1405 = vmatpush1.bf16.msra.mxu1 %v6069_v51 }
 0x38c   :  { %1365 = vmatprep.subr.bf16.mxu0 %v6073_v52  ;;  %1406 = vmatprep.subr.bf16.mxu1 %v6076_v53  ;;  %v7087_v53 = vld [vmem:[#allocation66_spill] sm:$0xff] }
 0x38f   :  { %1366 = vmatpush1.bf16.msra.mxu0 %v6079_v54  ;;  %1407 = vmatpush1.bf16.msra.mxu1 %v6083_v55 }
 0x390   :  { %1367 = vmatprep.subr.bf16.mxu0 %v6085_v56  ;;  %1408 = vmatprep.subr.bf16.mxu1 %v6088_v57 }
 0x393   :  { %1368 = vmatpush1.bf16.msra.mxu0 %v6093_v59  ;;  %1409 = vmatpush1.bf16.msra.mxu1 %v6097_v60  ;;  %v7088_v59 = vld [vmem:[#allocation68_spill] sm:$0xff] }
 0x394   :  { %1369 = vmatprep.subr.bf16.mxu0 %v6099_v61  ;;  %1410 = vmatprep.subr.bf16.mxu1 %v6102_v62 }
 0x397   :  { %1370 = vmatpush1.bf16.msra.mxu0 %v6105_v63  ;;  %1411 = vmatpush1.bf16.msra.mxu1 %v6109_v0 }
 0x398   :  { %1371 = vmatprep.subr.bf16.mxu0 %v6111_v1  ;;  %1412 = vmatprep.subr.bf16.mxu1 %v6114_v2 }
 0x39b   :  { %1372 = vmatpush1.bf16.msra.mxu0 %v6119_v3  ;;  %1413 = vmatpush1.bf16.msra.mxu1 %v6123_v4 }
 0x39c   :  { %1373 = vmatprep.subr.bf16.mxu0 %v6125_v5  ;;  %1414 = vmatprep.subr.bf16.mxu1 %v6128_v7 }
 0x39f   :  { %1374 = vmatpush1.bf16.msra.mxu0 %v6131_v8  ;;  %1415 = vmatpush1.bf16.msra.mxu1 %v6135_v9 }
 0x442   :  { %v1288_v41 = vpop.f32.mrf.mxu0  ;;  %v1329_v42 = vpop.f32.mrf.mxu1 }
 0x443   :  { %v1336_v44 = vadd.f32 %v1288_v41, %v7085_v43  ;;  %v1338_v54 = vadd.f32 %v1329_v42, %v7087_v53 }
 0x444   :  { %v1290_v45 = vpop.f32.mrf.mxu0  ;;  %v1331_v46 = vpop.f32.mrf.mxu1 }
 0x445   :  { %v1340_v47 = vmul.f32 0.5, %v1336_v44  ;;  %v1337_v49 = vadd.f32 %v1290_v45, %v7086_v48  ;;  %v1339_v60 = vadd.f32 %v1331_v46, %v7088_v59 }
 0x446   :  { %v1292_v51 = vpop.f32.mrf.mxu0  ;;  %v1333_v52 = vpop.f32.mrf.mxu1 }
 0x447   :  { %5176 = vtanh.f32 %v1340_v47  ;;  %v1344_v55 = vmul.f32 0.5, %v1337_v49  ;;  %v1349_v61 = vmul.f32 0.5, %v1339_v60 }
 0x448   :  { %v1293_v56 = vpop.f32.mrf.mxu0  ;;  %v1334_v57 = vpop.f32.mrf.mxu1 }
 0x449   :  { %5178 = vtanh.f32 %v1344_v55 }
 0x44a   :  { %5180 = vtanh.f32 %v1338_v54 }
 0x44b   :  { %5182 = vtanh.f32 %v1349_v61 }
 0x454   :  { %v5177_v62 = vpop.eup %5176 }
 0x455   :  { %v1342_v63 = vmul.f32 0.5, %v5177_v62 }
 0x456   :  { %v5179_v0 = vpop.eup %5178 }
 0x457   :  { %v1343_v1 = vadd.f32 0.5, %v1342_v63  ;;  %v1346_v2 = vmul.f32 0.5, %v5179_v0  ;;  %v5181_v3 = vpop.eup %5180 }
 0x458   :  { %v5183_v9 = vpop.eup %5182 }
 0x459   :  { %v1347_v4 = vadd.f32 0.5, %v1346_v2  ;;  %v1354_v5 = vmul.f32 %v5181_v3, %v1343_v1  ;;  %v1351_v29 = vmul.f32 0.5, %v5183_v9 }
 0x45b   :  { %v1353_v7 = vmul.f32 %v1347_v4, %v6317_v32  ;;  %v1352_v21 = vadd.f32 0.5, %v1351_v29 }
 0x45d   :  { %v1355_v8 = vadd.f32 %v1354_v5, %v1353_v7 }
 0x45f   :  { %5184 = vtanh.f32 %v1355_v8 }
 0x46c   :  { %v5185_v19 = vpop.eup %5184 }
 0x46d   :  { %v6361_v25 = vmul.f32 %v5185_v19, %v1352_v21 }
 0x46f   :  { %v1358_v11 = vpack.c.bf16 %v6361_v25, %v6361_v25 }
 0x471   :  { %1392 = vmatmul.mubr.bf16.vlgmr.msra.gmra.mxu0 %v1358_v11  ;;  %1433 = vmatmul.mubr.bf16.vlgmr.msra.gmra.mxu1 %v1358_v11 }
 0x531   :  { %v1393_v28 = vpop.f32.mrf.mxu0  ;;  %v1434_v23 = vpop.f32.mrf.mxu1 }
 0x532   :  { %v1441_v31 = vadd.f32 %v1393_v28, %v7089_v10  ;;  %v1443_v16 = vadd.f32 %v1434_v23, %v7091_v30 }
 0x533   :  { %v1395_v26 = vpop.f32.mrf.mxu0  ;;  %v1436_v18 = vpop.f32.mrf.mxu1 }
 0x534   :  { %v1445_v38 = vmul.f32 0.5, %v1441_v31  ;;  %v1442_v20 = vadd.f32 %v1395_v26, %v7090_v39  ;;  %v1444_v33 = vadd.f32 %v1436_v18, %v6223_v12 }
 0x535   :  { %v1397_v6 = vpop.f32.mrf.mxu0  ;;  %v1438_v34 = vpop.f32.mrf.mxu1 }
 0x536   :  { %5186 = vtanh.f32 %v1445_v38  ;;  %v1449_v22 = vmul.f32 0.5, %v1442_v20  ;;  %v1454_v36 = vmul.f32 0.5, %v1444_v33 }
 0x537   :  { %v1398_v24 = vpop.f32.mrf.mxu0  ;;  %v1439_v35 = vpop.f32.mrf.mxu1 }
 0x538   :  { %5188 = vtanh.f32 %v1449_v22 }
 0x539   :  { %5190 = vtanh.f32 %v1443_v16 }
 0x53a   :  { %5192 = vtanh.f32 %v1454_v36 }
 0x543   :  { %v5187_v32 = vpop.eup %5186 }
 0x544   :  { %v1447_v13 = vmul.f32 0.5, %v5187_v32 }
 0x545   :  { %v5189_v37 = vpop.eup %5188 }
 0x546   :  { %v1448_v58 = vadd.f32 0.5, %v1447_v13  ;;  %v1451_v14 = vmul.f32 0.5, %v5189_v37  ;;  %v5191_v15 = vpop.eup %5190 }
 0x547   :  { %v5193_v45 = vpop.eup %5192 }
 0x548   :  { %v1452_v41 = vadd.f32 0.5, %v1451_v14  ;;  %v1459_v42 = vmul.f32 %v5191_v15, %v1448_v58  ;;  %v1456_v46 = vmul.f32 0.5, %v5193_v45 }
 0x54a   :  { %v1458_v43 = vmul.f32 %v1452_v41, %v1355_v8  ;;  %v1457_v47 = vadd.f32 0.5, %v1456_v46 }
 0x54c   :  { %v1460_v44 = vadd.f32 %v1459_v42, %v1458_v43 }
 0x54e   :  { %5194 = vtanh.f32 %v1460_v44 }
 0x55b   :  { %v5195_v48 = vpop.eup %5194 }
 0x55c   :  { %v6369_v49 = vmul.f32 %v5195_v48, %v1457_v47 }
 0x55d   :  { %5862 = dma.done.wait [#allocation14], 4096 }
 0x55e   :  { %5863 = vsyncadd [#allocation14], 4294963200 }
 0x55f   :  { %5864 = dma.done.wait [#allocation14 + $0x1], 4096 }
 0x560   :  { %5865 = vsyncadd [#allocation14 + $0x1], 4294963200 }
 0x561   :  { %5866 = dma.done.wait [#allocation14 + $0x2], 64 }
 0x562   :  { %5867 = vsyncadd [#allocation14 + $0x2], 4294967232  ;;  %1753 = vmatprep.mubr.bf16.mxu0 %v7081_v50  ;;  %1814 = vmatprep.mubr.bf16.mxu1 %v7081_v50  ;;  %v5196_v12 = vld [vmem:[#allocation2 + $0xe4] ss:$16 sps:$4 sm:$0xff]   ;;  %v5198_v51 = vld [vmem:[#allocation2 + $0xec] ss:$16 sps:$4 sm:$0xff]   ;;  %v1537_v20 = vpack.c.bf16 %v6274_v17, %v6228_v40  ;;  %v1538_v36 = vpack.c.bf16 %v6361_v25, %v6320_v27  ;;  %v1539_v14 = vpack.c.bf16 %v6369_v49, %v6369_v49 }
 0x563   :  { %1721 = vmatprep.subr.bf16.mxu0 %v5196_v12  ;;  %v5200_v52 = vld [vmem:[#allocation2 + $0xe0] ss:$16 sps:$4 sm:$0xff]   ;;  %v5201_v53 = vld [vmem:[#allocation2 + $0xe8] ss:$16 sps:$4 sm:$0xff]   ;;  %1782 = vmatprep.subr.bf16.mxu1 %v5198_v51  ;;  %v5202_v54 = vld [vmem:[#allocation2 + $0xc4] ss:$16 sps:$4 sm:$0xff]  }
 0x564   :  { %1722 = vmatpush1.bf16.msra.mxu0 %v5200_v52  ;;  %1783 = vmatpush1.bf16.msra.mxu1 %v5201_v53  ;;  %v5204_v55 = vld [vmem:[#allocation2 + $0xcc] ss:$16 sps:$4 sm:$0xff]   ;;  %v5206_v56 = vld [vmem:[#allocation2 + $0xc0] ss:$16 sps:$4 sm:$0xff]   ;;  %v5207_v57 = vld [vmem:[#allocation2 + $0xc8] ss:$16 sps:$4 sm:$0xff]  }
 0x565   :  { %1723 = vmatprep.subr.bf16.mxu0 %v5202_v54  ;;  %1784 = vmatprep.subr.bf16.mxu1 %v5204_v55  ;;  %v5208_v59 = vld [vmem:[#allocation2 + $0xa4] ss:$16 sps:$4 sm:$0xff]   ;;  %v5210_v60 = vld [vmem:[#allocation2 + $0xac] ss:$16 sps:$4 sm:$0xff]   ;;  %v5212_v61 = vld [vmem:[#allocation2 + $0xa0] ss:$16 sps:$4 sm:$0xff]  }
 0x566   :  { %v5213_v62 = vld [vmem:[#allocation2 + $0xa8] ss:$16 sps:$4 sm:$0xff]   ;;  %v5214_v63 = vld [vmem:[#allocation2 + $0x84] ss:$16 sps:$4 sm:$0xff]   ;;  %v5216_v0 = vld [vmem:[#allocation2 + $0x8c] ss:$16 sps:$4 sm:$0xff]  }
 0x567   :  { %v5218_v1 = vld [vmem:[#allocation2 + $0x80] ss:$16 sps:$4 sm:$0xff]   ;;  %v5219_v2 = vld [vmem:[#allocation2 + $0x88] ss:$16 sps:$4 sm:$0xff]   ;;  %v5220_v3 = vld [vmem:[#allocation2 + $0x64] ss:$16 sps:$4 sm:$0xff]  }
 0x568   :  { %1724 = vmatpush1.bf16.msra.mxu0 %v5206_v56  ;;  %1785 = vmatpush1.bf16.msra.mxu1 %v5207_v57  ;;  %v5222_v4 = vld [vmem:[#allocation2 + $0x6c] ss:$16 sps:$4 sm:$0xff]   ;;  %v5224_v5 = vld [vmem:[#allocation2 + $0x60] ss:$16 sps:$4 sm:$0xff]   ;;  %v5225_v7 = vld [vmem:[#allocation2 + $0x68] ss:$16 sps:$4 sm:$0xff]  }
 0x569   :  { %1725 = vmatprep.subr.bf16.mxu0 %v5208_v59  ;;  %1786 = vmatprep.subr.bf16.mxu1 %v5210_v60  ;;  %v5226_v8 = vld [vmem:[#allocation2 + $0x44] ss:$16 sps:$4 sm:$0xff]   ;;  %v5228_v9 = vld [vmem:[#allocation2 + $0x4c] ss:$16 sps:$4 sm:$0xff]   ;;  %v5230_v29 = vld [vmem:[#allocation2 + $0x40] ss:$16 sps:$4 sm:$0xff]  }
 0x56a   :  { %v5231_v21 = vld [vmem:[#allocation2 + $0x48] ss:$16 sps:$4 sm:$0xff]   ;;  %v5232_v19 = vld [vmem:[#allocation2 + $0x24] ss:$16 sps:$4 sm:$0xff]   ;;  %v5234_v11 = vld [vmem:[#allocation2 + $0x2c] ss:$16 sps:$4 sm:$0xff]  }
 0x56b   :  { %v5236_v28 = vld [vmem:[#allocation2 + $0x20] ss:$16 sps:$4 sm:$0xff]   ;;  %v5237_v23 = vld [vmem:[#allocation2 + $0x28] ss:$16 sps:$4 sm:$0xff]   ;;  %v5238_v10 = vld [vmem:[#allocation2 + $0x4] ss:$16 sps:$4 sm:$0xff]  }
 0x56c   :  { %1726 = vmatpush1.bf16.msra.mxu0 %v5212_v61  ;;  %1787 = vmatpush1.bf16.msra.mxu1 %v5213_v62  ;;  %v5240_v31 = vld [vmem:[#allocation2 + $0xc] ss:$16 sps:$4 sm:$0xff]   ;;  %v5242_v26 = vld [vmem:[#allocation2] ss:$16 sps:$4 sm:$0xff]   ;;  %v5243_v18 = vld [vmem:[#allocation2 + $0x8] ss:$16 sps:$4 sm:$0xff]  }
 0x56d   :  { %1727 = vmatprep.subr.bf16.mxu0 %v5214_v63  ;;  %1788 = vmatprep.subr.bf16.mxu1 %v5216_v0  ;;  %v6373_v38 = vld [vmem:[#allocation3 + $0xe4] ss:$16 sps:$4 sm:$0xff]   ;;  %v6375_v39 = vld [vmem:[#allocation3 + $0xec] ss:$16 sps:$4 sm:$0xff]   ;;  %v6379_v6 = vld [vmem:[#allocation3 + $0xe0] ss:$16 sps:$4 sm:$0xff]  }
 0x56e   :  { %v6381_v34 = vld [vmem:[#allocation3 + $0xe8] ss:$16 sps:$4 sm:$0xff]   ;;  %v6383_v30 = vld [vmem:[#allocation3 + $0xc4] ss:$16 sps:$4 sm:$0xff]   ;;  %v6387_v16 = vld [vmem:[#allocation3 + $0xcc] ss:$16 sps:$4 sm:$0xff]  }
 0x56f   :  { %v6389_v22 = vld [vmem:[#allocation3 + $0xc0] ss:$16 sps:$4 sm:$0xff]   ;;  %v6393_v40 = vld [vmem:[#allocation3 + $0xc8] ss:$16 sps:$4 sm:$0xff]   ;;  %v6395_v17 = vld [vmem:[#allocation3 + $0xa4] ss:$16 sps:$4 sm:$0xff]  }
 0x570   :  { %1728 = vmatpush1.bf16.msra.mxu0 %v5218_v1  ;;  %1789 = vmatpush1.bf16.msra.mxu1 %v5219_v2  ;;  %v6399_v24 = vld [vmem:[#allocation3 + $0xac] ss:$16 sps:$4 sm:$0xff]   ;;  %v6403_v35 = vld [vmem:[#allocation3 + $0xa0] ss:$16 sps:$4 sm:$0xff]   ;;  %v6405_v33 = vld [vmem:[#allocation3 + $0xa8] ss:$16 sps:$4 sm:$0xff]  }
 0x571   :  { %1729 = vmatprep.subr.bf16.mxu0 %v5220_v3  ;;  %1790 = vmatprep.subr.bf16.mxu1 %v5222_v4  ;;  %v6411_v32 = vld [vmem:[#allocation3 + $0x84] ss:$16 sps:$4 sm:$0xff]   ;;  %v6415_v13 = vld [vmem:[#allocation3 + $0x8c] ss:$16 sps:$4 sm:$0xff]   ;;  %v6419_v37 = vld [vmem:[#allocation3 + $0x80] ss:$16 sps:$4 sm:$0xff]  }
 0x572   :  { %v6421_v27 = vld [vmem:[#allocation3 + $0x88] ss:$16 sps:$4 sm:$0xff]   ;;  %v6425_v25 = vld [vmem:[#allocation3 + $0x64] ss:$16 sps:$4 sm:$0xff]   ;;  %v6427_v58 = vld [vmem:[#allocation3 + $0x6c] ss:$16 sps:$4 sm:$0xff]  }
 0x573   :  { %v6435_v15 = vld [vmem:[#allocation3 + $0x60] ss:$16 sps:$4 sm:$0xff]   ;;  %v6437_v41 = vld [vmem:[#allocation3 + $0x68] ss:$16 sps:$4 sm:$0xff]   ;;  %v6441_v42 = vld [vmem:[#allocation3 + $0x44] ss:$16 sps:$4 sm:$0xff]  }
 0x574   :  { %1730 = vmatpush1.bf16.msra.mxu0 %v5224_v5  ;;  %1791 = vmatpush1.bf16.msra.mxu1 %v5225_v7  ;;  %v6443_v43 = vld [vmem:[#allocation3 + $0x4c] ss:$16 sps:$4 sm:$0xff]   ;;  %v6447_v44 = vld [vmem:[#allocation3 + $0x40] ss:$16 sps:$4 sm:$0xff]   ;;  %v6449_v45 = vld [vmem:[#allocation3 + $0x48] ss:$16 sps:$4 sm:$0xff]  }
 0x575   :  { %1731 = vmatprep.subr.bf16.mxu0 %v5226_v8  ;;  %1792 = vmatprep.subr.bf16.mxu1 %v5228_v9  ;;  %v6453_v46 = vld [vmem:[#allocation3 + $0x24] ss:$16 sps:$4 sm:$0xff]   ;;  %v6455_v47 = vld [vmem:[#allocation3 + $0x2c] ss:$16 sps:$4 sm:$0xff]   ;;  %v6461_v48 = vld [vmem:[#allocation3 + $0x20] ss:$16 sps:$4 sm:$0xff]  }
 0x576   :  { %v6463_v49 = vld [vmem:[#allocation3 + $0x28] ss:$16 sps:$4 sm:$0xff]   ;;  %v6467_v12 = vld [vmem:[#allocation3 + $0x4] ss:$16 sps:$4 sm:$0xff]   ;;  %v6469_v51 = vld [vmem:[#allocation3 + $0xc] ss:$16 sps:$4 sm:$0xff]  }
 0x577   :  { %v6473_v52 = vld [vmem:[#allocation3] ss:$16 sps:$4 sm:$0xff]   ;;  %v6475_v53 = vld [vmem:[#allocation3 + $0x8] ss:$16 sps:$4 sm:$0xff]  }
 0x578   :  { %1732 = vmatpush1.bf16.msra.mxu0 %v5230_v29  ;;  %1793 = vmatpush1.bf16.msra.mxu1 %v5231_v21  ;;  %v1536_v54 = vld [vmem:[#allocation4] sm:$0xf]  ;;  %v7092_v57 = vld [vmem:[#allocation58_spill] sm:$0xff]  ;;  %v7093_v62 = vld [vmem:[#allocation59_spill] sm:$0xff] }
 0x579   :  { %1733 = vmatprep.subr.bf16.mxu0 %v5232_v19  ;;  %1794 = vmatprep.subr.bf16.mxu1 %v5234_v11  ;;  %v1552_v59 = vrot.slane %v1536_v54, %v7092_v57  ;;  %v1544_v63 = vrot.slane %v1536_v54, %v7093_v62  ;;  %v7094_v0 = vld [vmem:[#allocation60_spill] sm:$0xff]  ;;  %v7095_v4 = vld [vmem:[#allocation61_spill] sm:$0xff] }
 0x57a   :  { %v1556_v1 = vrot.slane %v1536_v54, %v7094_v0  ;;  %v1548_v5 = vrot.slane %v1536_v54, %v7095_v4 }
 0x57c   :  { %1734 = vmatpush1.bf16.msra.mxu0 %v5236_v28  ;;  %1795 = vmatpush1.bf16.msra.mxu1 %v5237_v23 }
 0x57d   :  { %1735 = vmatprep.subr.bf16.mxu0 %v5238_v10  ;;  %1796 = vmatprep.subr.bf16.mxu1 %v5240_v31 }
 0x580   :  { %1736 = vmatpush1.bf16.msra.mxu0 %v5242_v26  ;;  %1797 = vmatpush1.bf16.msra.mxu1 %v5243_v18 }
 0x581   :  { %2003 = vmatprep.subr.bf16.mxu0 %v6373_v38  ;;  %2044 = vmatprep.subr.bf16.mxu1 %v6375_v39 }
 0x583   :  { %1754 = vmatmul.mubr.bf16.vlgmr.msra.gmra.mxu0 %v1537_v20  ;;  %1815 = vmatmul.mubr.bf16.vlgmr.msra.gmra.mxu1 %v1537_v20 }
 0x584   :  { %2004 = vmatpush1.bf16.msra.mxu0 %v6379_v6  ;;  %2045 = vmatpush1.bf16.msra.mxu1 %v6381_v34 }
 0x585   :  { %2005 = vmatprep.subr.bf16.mxu0 %v6383_v30  ;;  %2046 = vmatprep.subr.bf16.mxu1 %v6387_v16 }
 0x586   :  { %1763 = vmatprep.mubr.bf16.mxu0 %v7081_v50  ;;  %1824 = vmatprep.mubr.bf16.mxu1 %v7081_v50 }
 0x588   :  { %2006 = vmatpush1.bf16.msra.mxu0 %v6389_v22  ;;  %2047 = vmatpush1.bf16.msra.mxu1 %v6393_v40 }
 0x589   :  { %2007 = vmatprep.subr.bf16.mxu0 %v6395_v17  ;;  %2048 = vmatprep.subr.bf16.mxu1 %v6399_v24 }
 0x58b   :  { %1764 = vmatmul.mubr.bf16.gmra.mxu0 %v1538_v36  ;;  %1825 = vmatmul.mubr.bf16.gmra.mxu1 %v1538_v36 }
 0x58c   :  { %2008 = vmatpush1.bf16.msra.mxu0 %v6403_v35  ;;  %2049 = vmatpush1.bf16.msra.mxu1 %v6405_v33 }
 0x58d   :  { %2009 = vmatprep.subr.bf16.mxu0 %v6411_v32  ;;  %2050 = vmatprep.subr.bf16.mxu1 %v6415_v13 }
 0x58e   :  { %1773 = vmatprep.mubr.bf16.mxu0 %v7081_v50  ;;  %1834 = vmatprep.mubr.bf16.mxu1 %v7081_v50 }
 0x590   :  { %2010 = vmatpush1.bf16.msra.mxu0 %v6419_v37  ;;  %2051 = vmatpush1.bf16.msra.mxu1 %v6421_v27 }
 0x591   :  { %2011 = vmatprep.subr.bf16.mxu0 %v6425_v25  ;;  %2052 = vmatprep.subr.bf16.mxu1 %v6427_v58 }
 0x593   :  { %1774 = vmatmul.mubr.bf16.gmra.mxu0 %v1539_v14  ;;  %1835 = vmatmul.mubr.bf16.gmra.mxu1 %v1539_v14 }
 0x594   :  { %2012 = vmatpush1.bf16.msra.mxu0 %v6435_v15  ;;  %2053 = vmatpush1.bf16.msra.mxu1 %v6437_v41 }
 0x595   :  { %2013 = vmatprep.subr.bf16.mxu0 %v6441_v42  ;;  %2054 = vmatprep.subr.bf16.mxu1 %v6443_v43 }
 0x596   :  { %2035 = vmatprep.mubr.bf16.mxu0 %v7081_v50  ;;  %2076 = vmatprep.mubr.bf16.mxu1 %v7081_v50 }
 0x598   :  { %2014 = vmatpush1.bf16.msra.mxu0 %v6447_v44  ;;  %2055 = vmatpush1.bf16.msra.mxu1 %v6449_v45 }
 0x599   :  { %2015 = vmatprep.subr.bf16.mxu0 %v6453_v46  ;;  %2056 = vmatprep.subr.bf16.mxu1 %v6455_v47 }
 0x59c   :  { %2016 = vmatpush1.bf16.msra.mxu0 %v6461_v48  ;;  %2057 = vmatpush1.bf16.msra.mxu1 %v6463_v49 }
 0x59d   :  { %2017 = vmatprep.subr.bf16.mxu0 %v6467_v12  ;;  %2058 = vmatprep.subr.bf16.mxu1 %v6469_v51 }
 0x5a0   :  { %2018 = vmatpush1.bf16.msra.mxu0 %v6473_v52  ;;  %2059 = vmatpush1.bf16.msra.mxu1 %v6475_v53 }
 0x5a1   :  { %2108 = vmatprep.subr.bf16.mxu0 %v6373_v38  ;;  %2149 = vmatprep.subr.bf16.mxu1 %v6375_v39 }
 0x5a3   :  { %2036 = vmatmul.mubr.bf16.vlgmr.msra.gmra.mxu0 %v7081_v50  ;;  %2077 = vmatmul.mubr.bf16.vlgmr.msra.gmra.mxu1 %v7081_v50 }
 0x5a4   :  { %2109 = vmatpush1.bf16.msra.mxu0 %v6379_v6  ;;  %2150 = vmatpush1.bf16.msra.mxu1 %v6381_v34 }
 0x5a5   :  { %2110 = vmatprep.subr.bf16.mxu0 %v6383_v30  ;;  %2151 = vmatprep.subr.bf16.mxu1 %v6387_v16 }
 0x5a6   :  { %2140 = vmatprep.mubr.bf16.mxu0 %v7081_v50  ;;  %2181 = vmatprep.mubr.bf16.mxu1 %v7081_v50 }
 0x5a8   :  { %2111 = vmatpush1.bf16.msra.mxu0 %v6389_v22  ;;  %2152 = vmatpush1.bf16.msra.mxu1 %v6393_v40 }
 0x5a9   :  { %2112 = vmatprep.subr.bf16.mxu0 %v6395_v17  ;;  %2153 = vmatprep.subr.bf16.mxu1 %v6399_v24 }
 0x5ac   :  { %2113 = vmatpush1.bf16.msra.mxu0 %v6403_v35  ;;  %2154 = vmatpush1.bf16.msra.mxu1 %v6405_v33 }
 0x5ad   :  { %2114 = vmatprep.subr.bf16.mxu0 %v6411_v32  ;;  %2155 = vmatprep.subr.bf16.mxu1 %v6415_v13 }
 0x5b0   :  { %2115 = vmatpush1.bf16.msra.mxu0 %v6419_v37  ;;  %2156 = vmatpush1.bf16.msra.mxu1 %v6421_v27 }
 0x5b1   :  { %2116 = vmatprep.subr.bf16.mxu0 %v6425_v25  ;;  %2157 = vmatprep.subr.bf16.mxu1 %v6427_v58 }
 0x5b4   :  { %2117 = vmatpush1.bf16.msra.mxu0 %v6435_v15  ;;  %2158 = vmatpush1.bf16.msra.mxu1 %v6437_v41 }
 0x5b5   :  { %2118 = vmatprep.subr.bf16.mxu0 %v6441_v42  ;;  %2159 = vmatprep.subr.bf16.mxu1 %v6443_v43 }
 0x5b8   :  { %2119 = vmatpush1.bf16.msra.mxu0 %v6447_v44  ;;  %2160 = vmatpush1.bf16.msra.mxu1 %v6449_v45 }
 0x5b9   :  { %2120 = vmatprep.subr.bf16.mxu0 %v6453_v46  ;;  %2161 = vmatprep.subr.bf16.mxu1 %v6455_v47 }
 0x5bc   :  { %2121 = vmatpush1.bf16.msra.mxu0 %v6461_v48  ;;  %2162 = vmatpush1.bf16.msra.mxu1 %v6463_v49 }
 0x5bd   :  { %2122 = vmatprep.subr.bf16.mxu0 %v6467_v12  ;;  %2163 = vmatprep.subr.bf16.mxu1 %v6469_v51 }
 0x5c0   :  { %2123 = vmatpush1.bf16.msra.mxu0 %v6473_v52  ;;  %2164 = vmatpush1.bf16.msra.mxu1 %v6475_v53 }
 0x5c1   :  { %2213 = vmatprep.subr.bf16.mxu0 %v6373_v38  ;;  %2254 = vmatprep.subr.bf16.mxu1 %v6375_v39 }
 0x643   :  { %v1755_v55 = vpop.f32.mrf.mxu0  ;;  %v1816_v56 = vpop.f32.mrf.mxu1 }
 0x645   :  { %v1757_v60 = vpop.f32.mrf.mxu0  ;;  %v1818_v61 = vpop.f32.mrf.mxu1 }
 0x647   :  { %v1759_v2 = vpop.f32.mrf.mxu0  ;;  %v1820_v3 = vpop.f32.mrf.mxu1 }
 0x648   :  { %v6523_v7 = vadd.f32 %v1759_v2, %v1544_v63  ;;  %v6525_v8 = vadd.f32 %v1820_v3, %v1552_v59 }
 0x649   :  { %v1761_v9 = vpop.f32.mrf.mxu0  ;;  %v1822_v29 = vpop.f32.mrf.mxu1 }
 0x64a   :  { %v6527_v21 = vadd.f32 %v1761_v9, %v1548_v5  ;;  %v6529_v19 = vadd.f32 %v1822_v29, %v1556_v1 }
 0x64b   :  { %v1765_v11 = vpop.f32.mrf.mxu0  ;;  %v1826_v28 = vpop.f32.mrf.mxu1 }
 0x64c   :  { %7096 = vst [vmem:[#allocation63_spill] sm:$0xff] %v6529_v19  ;;  %v6531_v23 = vadd.f32 %v1765_v11, %v1544_v63  ;;  %v6533_v10 = vadd.f32 %v1826_v28, %v1552_v59  ;;  %v1817_v19 = vadd.f32 %v1816_v56, %v1552_v59 }
 0x64d   :  { %v1767_v31 = vpop.f32.mrf.mxu0  ;;  %v1828_v26 = vpop.f32.mrf.mxu1 }
 0x64e   :  { %7097 = vst [vmem:[#allocation62_spill] sm:$0xff] %v6531_v23  ;;  %7098 = vst [vmem:[#allocation64_spill] sm:$0xff] %v6533_v10  ;;  %v6535_v18 = vadd.f32 %v1767_v31, %v1548_v5  ;;  %v6537_v20 = vadd.f32 %v1828_v26, %v1556_v1 }
 0x64f   :  { %v1769_v36 = vpop.f32.mrf.mxu0  ;;  %v1830_v14 = vpop.f32.mrf.mxu1 }
 0x650   :  { %7099 = vst [vmem:[#allocation65_spill] sm:$0xff] %v6535_v18  ;;  %7100 = vst [vmem:[#allocation67_spill] sm:$0xff] %v6537_v20  ;;  %v6539_v54 = vadd.f32 %v1769_v36, %v1544_v63  ;;  %v6541_v2 = vadd.f32 %v1830_v14, %v1552_v59 }
 0x651   :  { %v1771_v3 = vpop.f32.mrf.mxu0  ;;  %v1832_v9 = vpop.f32.mrf.mxu1 }
 0x652   :  { %7101 = vst [vmem:[#allocation66_spill] sm:$0xff] %v6539_v54  ;;  %7102 = vst [vmem:[#allocation68_spill] sm:$0xff] %v6541_v2  ;;  %v6543_v29 = vadd.f32 %v1771_v3, %v1548_v5  ;;  %v6545_v11 = vadd.f32 %v1832_v9, %v1556_v1  ;;  %v1756_v3 = vadd.f32 %v1755_v55, %v1544_v63 }
 0x653   :  { %v1775_v28 = vpop.f32.mrf.mxu0  ;;  %v1836_v4 = vpop.f32.mrf.mxu1 }
 0x654   :  { %7103 = vst [vmem:[#allocation69_spill] sm:$0xff] %v6543_v29  ;;  %7104 = vst [vmem:[#allocation71_spill] sm:$0xff] %v6545_v11  ;;  %v6547_v0 = vadd.f32 %v1775_v28, %v1544_v63  ;;  %v6549_v31 = vadd.f32 %v1836_v4, %v1552_v59  ;;  %v1758_v11 = vadd.f32 %v1757_v60, %v1548_v5 }
 0x655   :  { %v1777_v26 = vpop.f32.mrf.mxu0  ;;  %v1838_v62 = vpop.f32.mrf.mxu1 }
 0x656   :  { %7105 = vst [vmem:[#allocation70_spill] sm:$0xff] %v6547_v0  ;;  %7106 = vst [vmem:[#allocation72_spill] sm:$0xff] %v6549_v31  ;;  %v6551_v57 = vadd.f32 %v1777_v26, %v1548_v5  ;;  %v6553_v36 = vadd.f32 %v1838_v62, %v1556_v1 }
 0x657   :  { %v1779_v14 = vpop.f32.mrf.mxu0  ;;  %v1840_v2 = vpop.f32.mrf.mxu1 }
 0x658   :  { %7107 = vst [vmem:[#allocation73_spill] sm:$0xff] %v6553_v36 }
 0x659   :  { %v1780_v54 = vpop.f32.mrf.mxu0  ;;  %v1841_v20 = vpop.f32.mrf.mxu1 }
 0x65a   :  { %v1819_v54 = vadd.f32 %v1818_v61, %v1556_v1 }
 0x663   :  { %v2037_v29 = vpop.f32.mrf.mxu0  ;;  %v2078_v9 = vpop.f32.mrf.mxu1 }
 0x664   :  { %v2085_v10 = vadd.f32 %v2037_v29, %v1756_v3  ;;  %v2087_v14 = vadd.f32 %v2078_v9, %v1817_v19 }
 0x665   :  { %v2039_v18 = vpop.f32.mrf.mxu0  ;;  %v2080_v28 = vpop.f32.mrf.mxu1 }
 0x666   :  { %v2089_v0 = vmul.f32 0.5, %v2085_v10  ;;  %v2086_v4 = vadd.f32 %v2039_v18, %v1758_v11  ;;  %v2088_v55 = vadd.f32 %v2080_v28, %v1819_v54 }
 0x667   :  { %v2041_v31 = vpop.f32.mrf.mxu0  ;;  %v2082_v23 = vpop.f32.mrf.mxu1 }
 0x668   :  { %5292 = vtanh.f32 %v2089_v0  ;;  %v2093_v26 = vmul.f32 0.5, %v2086_v4  ;;  %v2098_v63 = vmul.f32 0.5, %v2088_v55 }
 0x669   :  { %v2042_v62 = vpop.f32.mrf.mxu0  ;;  %v2083_v36 = vpop.f32.mrf.mxu1 }
 0x66a   :  { %5294 = vtanh.f32 %v2093_v26 }
 0x66b   :  { %5296 = vtanh.f32 %v2087_v14 }
 0x66c   :  { %5298 = vtanh.f32 %v2098_v63 }
 0x675   :  { %v5293_v20 = vpop.eup %5292 }
 0x676   :  { %v2091_v60 = vmul.f32 0.5, %v5293_v20 }
 0x677   :  { %v5295_v5 = vpop.eup %5294 }
 0x678   :  { %v2092_v2 = vadd.f32 0.5, %v2091_v60  ;;  %v2095_v29 = vmul.f32 0.5, %v5295_v5  ;;  %v5297_v18 = vpop.eup %5296  ;;  %v7108_v5 = vld [vmem:[#allocation63_spill] sm:$0xff] }
 0x679   :  { %v5299_v0 = vpop.eup %5298 }
 0x67a   :  { %v2096_v10 = vadd.f32 0.5, %v2095_v29  ;;  %v2103_v56 = vmul.f32 %v5297_v18, %v2092_v2  ;;  %v2100_v19 = vmul.f32 0.5, %v5299_v0 }
 0x67c   :  { %v2102_v23 = vmul.f32 0.0, %v2096_v10  ;;  %v2101_v61 = vadd.f32 0.5, %v2100_v19 }
 0x67e   :  { %v6555_v59 = vadd.f32 %v2103_v56, %v2102_v23 }
 0x680   :  { %5300 = vtanh.f32 %v6555_v59 }
 0x68d   :  { %v5301_v1 = vpop.eup %5300 }
 0x68e   :  { %v6558_v11 = vmul.f32 %v5301_v1, %v2101_v61 }
 0x690   :  { %v2107_v31 = vpack.c.bf16 %v6558_v11, %v6558_v11 }
 0x692   :  { %2141 = vmatmul.mubr.bf16.vlgmr.msra.gmra.mxu0 %v2107_v31  ;;  %2182 = vmatmul.mubr.bf16.vlgmr.msra.gmra.mxu1 %v2107_v31 }
 0x693   :  { %2214 = vmatpush1.bf16.msra.mxu0 %v6379_v6  ;;  %2255 = vmatpush1.bf16.msra.mxu1 %v6381_v34 }
 0x694   :  { %2215 = vmatprep.subr.bf16.mxu0 %v6383_v30  ;;  %2256 = vmatprep.subr.bf16.mxu1 %v6387_v16 }
 0x695   :  { %2245 = vmatprep.mubr.bf16.mxu0 %v7081_v50  ;;  %2286 = vmatprep.mubr.bf16.mxu1 %v7081_v50 }
 0x697   :  { %2216 = vmatpush1.bf16.msra.mxu0 %v6389_v22  ;;  %2257 = vmatpush1.bf16.msra.mxu1 %v6393_v40 }
 0x698   :  { %2217 = vmatprep.subr.bf16.mxu0 %v6395_v17  ;;  %2258 = vmatprep.subr.bf16.mxu1 %v6399_v24 }
 0x69b   :  { %2218 = vmatpush1.bf16.msra.mxu0 %v6403_v35  ;;  %2259 = vmatpush1.bf16.msra.mxu1 %v6405_v33 }
 0x69c   :  { %2219 = vmatprep.subr.bf16.mxu0 %v6411_v32  ;;  %2260 = vmatprep.subr.bf16.mxu1 %v6415_v13 }
 0x69f   :  { %2220 = vmatpush1.bf16.msra.mxu0 %v6419_v37  ;;  %2261 = vmatpush1.bf16.msra.mxu1 %v6421_v27 }
 0x6a0   :  { %2221 = vmatprep.subr.bf16.mxu0 %v6425_v25  ;;  %2262 = vmatprep.subr.bf16.mxu1 %v6427_v58 }
 0x6a3   :  { %2222 = vmatpush1.bf16.msra.mxu0 %v6435_v15  ;;  %2263 = vmatpush1.bf16.msra.mxu1 %v6437_v41 }
 0x6a4   :  { %2223 = vmatprep.subr.bf16.mxu0 %v6441_v42  ;;  %2264 = vmatprep.subr.bf16.mxu1 %v6443_v43 }
 0x6a7   :  { %2224 = vmatpush1.bf16.msra.mxu0 %v6447_v44  ;;  %2265 = vmatpush1.bf16.msra.mxu1 %v6449_v45 }
 0x6a8   :  { %2225 = vmatprep.subr.bf16.mxu0 %v6453_v46  ;;  %2266 = vmatprep.subr.bf16.mxu1 %v6455_v47 }
 0x6ab   :  { %2226 = vmatpush1.bf16.msra.mxu0 %v6461_v48  ;;  %2267 = vmatpush1.bf16.msra.mxu1 %v6463_v49 }
 0x6ac   :  { %2227 = vmatprep.subr.bf16.mxu0 %v6467_v12  ;;  %2268 = vmatprep.subr.bf16.mxu1 %v6469_v51 }
 0x6af   :  { %2228 = vmatpush1.bf16.msra.mxu0 %v6473_v52  ;;  %2269 = vmatpush1.bf16.msra.mxu1 %v6475_v53 }
 0x6b0   :  { %2318 = vmatprep.subr.bf16.mxu0 %v6373_v38  ;;  %2359 = vmatprep.subr.bf16.mxu1 %v6375_v39 }
 0x752   :  { %v2142_v36 = vpop.f32.mrf.mxu0  ;;  %v2183_v3 = vpop.f32.mrf.mxu1 }
 0x753   :  { %v2190_v9 = vadd.f32 %v2142_v36, %v6523_v7  ;;  %v2192_v55 = vadd.f32 %v2183_v3, %v6525_v8 }
 0x754   :  { %v2144_v28 = vpop.f32.mrf.mxu0  ;;  %v2185_v4 = vpop.f32.mrf.mxu1 }
 0x755   :  { %v2194_v26 = vmul.f32 0.5, %v2190_v9  ;;  %v2191_v62 = vadd.f32 %v2144_v28, %v6527_v21  ;;  %v2193_v2 = vadd.f32 %v2185_v4, %v7108_v5 }
 0x756   :  { %v2146_v14 = vpop.f32.mrf.mxu0  ;;  %v2187_v54 = vpop.f32.mrf.mxu1 }
 0x757   :  { %5302 = vtanh.f32 %v2194_v26  ;;  %v2198_v63 = vmul.f32 0.5, %v2191_v62  ;;  %v2203_v29 = vmul.f32 0.5, %v2193_v2  ;;  %v7109_v26 = vld [vmem:[#allocation62_spill] sm:$0xff]  ;;  %v7111_v2 = vld [vmem:[#allocation64_spill] sm:$0xff] }
 0x758   :  { %v2147_v20 = vpop.f32.mrf.mxu0  ;;  %v2188_v60 = vpop.f32.mrf.mxu1 }
 0x759   :  { %5304 = vtanh.f32 %v2198_v63  ;;  %v7110_v63 = vld [vmem:[#allocation65_spill] sm:$0xff] }
 0x75a   :  { %5306 = vtanh.f32 %v2192_v55 }
 0x75b   :  { %5308 = vtanh.f32 %v2203_v29 }
 0x764   :  { %v5303_v10 = vpop.eup %5302 }
 0x765   :  { %v2196_v7 = vmul.f32 0.5, %v5303_v10 }
 0x766   :  { %v5305_v18 = vpop.eup %5304 }
 0x767   :  { %v2197_v23 = vadd.f32 0.5, %v2196_v7  ;;  %v2200_v56 = vmul.f32 0.5, %v5305_v18  ;;  %v5307_v21 = vpop.eup %5306 }
 0x768   :  { %v5309_v1 = vpop.eup %5308 }
 0x769   :  { %v2201_v0 = vadd.f32 0.5, %v2200_v56  ;;  %v2208_v19 = vmul.f32 %v5307_v21, %v2197_v23  ;;  %v2205_v31 = vmul.f32 0.5, %v5309_v1 }
 0x76b   :  { %v2207_v61 = vmul.f32 %v2201_v0, %v6555_v59  ;;  %v2206_v36 = vadd.f32 0.5, %v2205_v31 }
 0x76d   :  { %v6601_v8 = vadd.f32 %v2208_v19, %v2207_v61 }
 0x76f   :  { %5310 = vtanh.f32 %v6601_v8 }
 0x77c   :  { %v5311_v3 = vpop.eup %5310 }
 0x77d   :  { %v6604_v9 = vmul.f32 %v5311_v3, %v2206_v36 }
 0x77f   :  { %v2212_v28 = vpack.c.bf16 %v6604_v9, %v6604_v9 }
 0x781   :  { %2246 = vmatmul.mubr.bf16.vlgmr.msra.gmra.mxu0 %v2212_v28  ;;  %2287 = vmatmul.mubr.bf16.vlgmr.msra.gmra.mxu1 %v2212_v28 }
 0x782   :  { %2319 = vmatpush1.bf16.msra.mxu0 %v6379_v6  ;;  %2360 = vmatpush1.bf16.msra.mxu1 %v6381_v34 }
 0x783   :  { %2320 = vmatprep.subr.bf16.mxu0 %v6383_v30  ;;  %2361 = vmatprep.subr.bf16.mxu1 %v6387_v16 }
 0x784   :  { %2350 = vmatprep.mubr.bf16.mxu0 %v7081_v50  ;;  %2391 = vmatprep.mubr.bf16.mxu1 %v7081_v50 }
 0x786   :  { %2321 = vmatpush1.bf16.msra.mxu0 %v6389_v22  ;;  %2362 = vmatpush1.bf16.msra.mxu1 %v6393_v40 }
 0x787   :  { %2322 = vmatprep.subr.bf16.mxu0 %v6395_v17  ;;  %2363 = vmatprep.subr.bf16.mxu1 %v6399_v24 }
 0x78a   :  { %2323 = vmatpush1.bf16.msra.mxu0 %v6403_v35  ;;  %2364 = vmatpush1.bf16.msra.mxu1 %v6405_v33 }
 0x78b   :  { %2324 = vmatprep.subr.bf16.mxu0 %v6411_v32  ;;  %2365 = vmatprep.subr.bf16.mxu1 %v6415_v13 }
 0x78e   :  { %2325 = vmatpush1.bf16.msra.mxu0 %v6419_v37  ;;  %2366 = vmatpush1.bf16.msra.mxu1 %v6421_v27 }
 0x78f   :  { %2326 = vmatprep.subr.bf16.mxu0 %v6425_v25  ;;  %2367 = vmatprep.subr.bf16.mxu1 %v6427_v58 }
 0x792   :  { %2327 = vmatpush1.bf16.msra.mxu0 %v6435_v15  ;;  %2368 = vmatpush1.bf16.msra.mxu1 %v6437_v41 }
 0x793   :  { %2328 = vmatprep.subr.bf16.mxu0 %v6441_v42  ;;  %2369 = vmatprep.subr.bf16.mxu1 %v6443_v43 }
 0x796   :  { %2329 = vmatpush1.bf16.msra.mxu0 %v6447_v44  ;;  %2370 = vmatpush1.bf16.msra.mxu1 %v6449_v45 }
 0x797   :  { %2330 = vmatprep.subr.bf16.mxu0 %v6453_v46  ;;  %2371 = vmatprep.subr.bf16.mxu1 %v6455_v47 }
 0x79a   :  { %2331 = vmatpush1.bf16.msra.mxu0 %v6461_v48  ;;  %2372 = vmatpush1.bf16.msra.mxu1 %v6463_v49 }
 0x79b   :  { %2332 = vmatprep.subr.bf16.mxu0 %v6467_v12  ;;  %2373 = vmatprep.subr.bf16.mxu1 %v6469_v51 }
 0x79e   :  { %2333 = vmatpush1.bf16.msra.mxu0 %v6473_v52  ;;  %2374 = vmatpush1.bf16.msra.mxu1 %v6475_v53 }
 0x79f   :  { %2423 = vmatprep.subr.bf16.mxu0 %v6373_v38  ;;  %2464 = vmatprep.subr.bf16.mxu1 %v6375_v39  ;;  %v7112_v38 = vld [vmem:[#allocation67_spill] sm:$0xff] }
 0x841   :  { %v2247_v59 = vpop.f32.mrf.mxu0  ;;  %v2288_v4 = vpop.f32.mrf.mxu1 }
 0x842   :  { %v2295_v62 = vadd.f32 %v2247_v59, %v7109_v26  ;;  %v2297_v29 = vadd.f32 %v2288_v4, %v7111_v2 }
 0x843   :  { %v2249_v14 = vpop.f32.mrf.mxu0  ;;  %v2290_v54 = vpop.f32.mrf.mxu1 }
 0x844   :  { %v2299_v55 = vmul.f32 0.5, %v2295_v62  ;;  %v2296_v20 = vadd.f32 %v2249_v14, %v7110_v63  ;;  %v2298_v39 = vadd.f32 %v2290_v54, %v7112_v38 }
 0x845   :  { %v2251_v60 = vpop.f32.mrf.mxu0  ;;  %v2292_v5 = vpop.f32.mrf.mxu1 }
 0x846   :  { %5312 = vtanh.f32 %v2299_v55  ;;  %v2303_v10 = vmul.f32 0.5, %v2296_v20  ;;  %v2308_v23 = vmul.f32 0.5, %v2298_v39 }
 0x847   :  { %v2252_v7 = vpop.f32.mrf.mxu0  ;;  %v2293_v18 = vpop.f32.mrf.mxu1 }
 0x848   :  { %5314 = vtanh.f32 %v2303_v10 }
 0x849   :  { %5316 = vtanh.f32 %v2297_v29  ;;  %v7117_v29 = vld [vmem:[#allocation70_spill] sm:$0xff] }
 0x84a   :  { %5318 = vtanh.f32 %v2308_v23 }
 0x853   :  { %v5313_v56 = vpop.eup %5312 }
 0x854   :  { %v2301_v21 = vmul.f32 0.5, %v5313_v56 }
 0x855   :  { %v5315_v0 = vpop.eup %5314 }
 0x856   :  { %v2302_v19 = vadd.f32 0.5, %v2301_v21  ;;  %v2305_v61 = vmul.f32 0.5, %v5315_v0  ;;  %v5317_v1 = vpop.eup %5316  ;;  %v7118_v21 = vld [vmem:[#allocation72_spill] sm:$0xff] }
 0x857   :  { %v5319_v59 = vpop.eup %5318 }
 0x858   :  { %v2306_v31 = vadd.f32 0.5, %v2305_v61  ;;  %v2313_v36 = vmul.f32 %v5317_v1, %v2302_v19  ;;  %v2310_v4 = vmul.f32 0.5, %v5319_v59 }
 0x85a   :  { %v2312_v3 = vmul.f32 %v2306_v31, %v6601_v8  ;;  %v2311_v26 = vadd.f32 0.5, %v2310_v4  ;;  %v7119_v31 = vld [vmem:[#allocation73_spill] sm:$0xff] }
 0x85c   :  { %v6647_v28 = vadd.f32 %v2313_v36, %v2312_v3 }
 0x85e   :  { %5320 = vtanh.f32 %v6647_v28 }
 0x86b   :  { %v5321_v62 = vpop.eup %5320 }
 0x86c   :  { %v6650_v14 = vmul.f32 %v5321_v62, %v2311_v26 }
 0x86e   :  { %v2317_v54 = vpack.c.bf16 %v6650_v14, %v6650_v14 }
 0x870   :  { %2351 = vmatmul.mubr.bf16.vlgmr.msra.gmra.mxu0 %v2317_v54  ;;  %2392 = vmatmul.mubr.bf16.vlgmr.msra.gmra.mxu1 %v2317_v54 }
 0x871   :  { %2424 = vmatpush1.bf16.msra.mxu0 %v6379_v6  ;;  %2465 = vmatpush1.bf16.msra.mxu1 %v6381_v34 }
 0x872   :  { %2425 = vmatprep.subr.bf16.mxu0 %v6383_v30  ;;  %2466 = vmatprep.subr.bf16.mxu1 %v6387_v16  ;;  %v7113_v30 = vld [vmem:[#allocation66_spill] sm:$0xff] }
 0x873   :  { %2455 = vmatprep.mubr.bf16.mxu0 %v7081_v50  ;;  %2496 = vmatprep.mubr.bf16.mxu1 %v7081_v50 }
 0x875   :  { %2426 = vmatpush1.bf16.msra.mxu0 %v6389_v22  ;;  %2467 = vmatpush1.bf16.msra.mxu1 %v6393_v40 }
 0x876   :  { %2427 = vmatprep.subr.bf16.mxu0 %v6395_v17  ;;  %2468 = vmatprep.subr.bf16.mxu1 %v6399_v24  ;;  %v7114_v24 = vld [vmem:[#allocation69_spill] sm:$0xff] }
 0x879   :  { %2428 = vmatpush1.bf16.msra.mxu0 %v6403_v35  ;;  %2469 = vmatpush1.bf16.msra.mxu1 %v6405_v33 }
 0x87a   :  { %2429 = vmatprep.subr.bf16.mxu0 %v6411_v32  ;;  %2470 = vmatprep.subr.bf16.mxu1 %v6415_v13  ;;  %v7115_v13 = vld [vmem:[#allocation68_spill] sm:$0xff] }
 0x87d   :  { %2430 = vmatpush1.bf16.msra.mxu0 %v6419_v37  ;;  %2471 = vmatpush1.bf16.msra.mxu1 %v6421_v27 }
 0x87e   :  { %2431 = vmatprep.subr.bf16.mxu0 %v6425_v25  ;;  %2472 = vmatprep.subr.bf16.mxu1 %v6427_v58 }
 0x881   :  { %2432 = vmatpush1.bf16.msra.mxu0 %v6435_v15  ;;  %2473 = vmatpush1.bf16.msra.mxu1 %v6437_v41  ;;  %v7116_v15 = vld [vmem:[#allocation71_spill] sm:$0xff] }
 0x882   :  { %2433 = vmatprep.subr.bf16.mxu0 %v6441_v42  ;;  %2474 = vmatprep.subr.bf16.mxu1 %v6443_v43 }
 0x885   :  { %2434 = vmatpush1.bf16.msra.mxu0 %v6447_v44  ;;  %2475 = vmatpush1.bf16.msra.mxu1 %v6449_v45 }
 0x886   :  { %2435 = vmatprep.subr.bf16.mxu0 %v6453_v46  ;;  %2476 = vmatprep.subr.bf16.mxu1 %v6455_v47 }
 0x889   :  { %2436 = vmatpush1.bf16.msra.mxu0 %v6461_v48  ;;  %2477 = vmatpush1.bf16.msra.mxu1 %v6463_v49 }
 0x88a   :  { %2437 = vmatprep.subr.bf16.mxu0 %v6467_v12  ;;  %2478 = vmatprep.subr.bf16.mxu1 %v6469_v51 }
 0x88d   :  { %2438 = vmatpush1.bf16.msra.mxu0 %v6473_v52  ;;  %2479 = vmatpush1.bf16.msra.mxu1 %v6475_v53 }
 0x930   :  { %v2352_v6 = vpop.f32.mrf.mxu0  ;;  %v2393_v34 = vpop.f32.mrf.mxu1 }
 0x931   :  { %v2400_v16 = vadd.f32 %v2352_v6, %v7113_v30  ;;  %v2402_v37 = vadd.f32 %v2393_v34, %v7115_v13 }
 0x932   :  { %v2354_v22 = vpop.f32.mrf.mxu0  ;;  %v2395_v40 = vpop.f32.mrf.mxu1 }
 0x933   :  { %v2404_v17 = vmul.f32 0.5, %v2400_v16  ;;  %v2401_v35 = vadd.f32 %v2354_v22, %v7114_v24  ;;  %v2403_v41 = vadd.f32 %v2395_v40, %v7116_v15 }
 0x934   :  { %v2356_v33 = vpop.f32.mrf.mxu0  ;;  %v2397_v32 = vpop.f32.mrf.mxu1 }
 0x935   :  { %5322 = vtanh.f32 %v2404_v17  ;;  %v2408_v27 = vmul.f32 0.5, %v2401_v35  ;;  %v2413_v42 = vmul.f32 0.5, %v2403_v41 }
 0x936   :  { %v2357_v25 = vpop.f32.mrf.mxu0  ;;  %v2398_v58 = vpop.f32.mrf.mxu1 }
 0x937   :  { %5324 = vtanh.f32 %v2408_v27 }
 0x938   :  { %5326 = vtanh.f32 %v2402_v37 }
 0x939   :  { %5328 = vtanh.f32 %v2413_v42 }
 0x942   :  { %v5323_v43 = vpop.eup %5322 }
 0x943   :  { %v2406_v44 = vmul.f32 0.5, %v5323_v43 }
 0x944   :  { %v5325_v45 = vpop.eup %5324 }
 0x945   :  { %v2407_v46 = vadd.f32 0.5, %v2406_v44  ;;  %v2410_v47 = vmul.f32 0.5, %v5325_v45  ;;  %v5327_v48 = vpop.eup %5326 }
 0x946   :  { %v5329_v53 = vpop.eup %5328 }
 0x947   :  { %v2411_v49 = vadd.f32 0.5, %v2410_v47  ;;  %v2418_v12 = vmul.f32 %v5327_v48, %v2407_v46  ;;  %v2415_v8 = vmul.f32 0.5, %v5329_v53 }
 0x949   :  { %v2417_v51 = vmul.f32 %v2411_v49, %v6647_v28  ;;  %v2416_v55 = vadd.f32 0.5, %v2415_v8 }
 0x94b   :  { %v2419_v52 = vadd.f32 %v2418_v12, %v2417_v51 }
 0x94d   :  { %5330 = vtanh.f32 %v2419_v52 }
 0x95a   :  { %v5331_v63 = vpop.eup %5330 }
 0x95b   :  { %v6691_v20 = vmul.f32 %v5331_v63, %v2416_v55 }
 0x95d   :  { %v2422_v60 = vpack.c.bf16 %v6691_v20, %v6691_v20 }
 0x95f   :  { %2456 = vmatmul.mubr.bf16.vlgmr.msra.gmra.mxu0 %v2422_v60  ;;  %2497 = vmatmul.mubr.bf16.vlgmr.msra.gmra.mxu1 %v2422_v60 }
 0xa1f   :  { %v2457_v5 = vpop.f32.mrf.mxu0  ;;  %v2498_v2 = vpop.f32.mrf.mxu1 }
 0xa20   :  { %v2505_v10 = vadd.f32 %v2457_v5, %v7117_v29  ;;  %v2507_v0 = vadd.f32 %v2498_v2, %v7118_v21 }
 0xa21   :  { %v2459_v7 = vpop.f32.mrf.mxu0  ;;  %v2500_v18 = vpop.f32.mrf.mxu1 }
 0xa22   :  { %v2509_v38 = vmul.f32 0.5, %v2505_v10  ;;  %v2506_v39 = vadd.f32 %v2459_v7, %v6551_v57  ;;  %v2508_v36 = vadd.f32 %v2500_v18, %v7119_v31 }
 0xa23   :  { %v2461_v23 = vpop.f32.mrf.mxu0  ;;  %v2502_v56 = vpop.f32.mrf.mxu1 }
 0xa24   :  { %5332 = vtanh.f32 %v2509_v38  ;;  %v2513_v19 = vmul.f32 0.5, %v2506_v39  ;;  %v2518_v3 = vmul.f32 0.5, %v2508_v36 }
 0xa25   :  { %v2462_v61 = vpop.f32.mrf.mxu0  ;;  %v2503_v1 = vpop.f32.mrf.mxu1 }
 0xa26   :  { %5334 = vtanh.f32 %v2513_v19 }
 0xa27   :  { %5336 = vtanh.f32 %v2507_v0 }
 0xa28   :  { %5338 = vtanh.f32 %v2518_v3 }
 0xa31   :  { %v5333_v28 = vpop.eup %5332 }
 0xa32   :  { %v2511_v59 = vmul.f32 0.5, %v5333_v28 }
 0xa33   :  { %v5335_v4 = vpop.eup %5334 }
 0xa34   :  { %v2512_v26 = vadd.f32 0.5, %v2511_v59  ;;  %v2515_v62 = vmul.f32 0.5, %v5335_v4  ;;  %v5337_v57 = vpop.eup %5336 }
 0xa35   :  { %v5339_v16 = vpop.eup %5338 }
 0xa36   :  { %v2516_v54 = vadd.f32 0.5, %v2515_v62  ;;  %v2523_v6 = vmul.f32 %v5337_v57, %v2512_v26  ;;  %v2520_v22 = vmul.f32 0.5, %v5339_v16 }
 0xa38   :  { %v2522_v34 = vmul.f32 %v2516_v54, %v2419_v52  ;;  %v2521_v40 = vadd.f32 0.5, %v2520_v22 }
 0xa3a   :  { %v2524_v30 = vadd.f32 %v2523_v6, %v2522_v34 }
 0xa3c   :  { %5340 = vtanh.f32 %v2524_v30 }
 0xa49   :  { %v5341_v17 = vpop.eup %5340 }
 0xa4a   :  { %v6699_v24 = vmul.f32 %v5341_v17, %v2521_v40 }
 0xa4b   :  { %5868 = dma.done.wait [#allocation14 + $0x3], 4096 }
 0xa4c   :  { %5869 = vsyncadd [#allocation14 + $0x3], 4294963200 }
 0xa4d   :  { %5870 = dma.done.wait [#allocation14 + $0x4], 4096 }
 0xa4e   :  { %5871 = vsyncadd [#allocation14 + $0x4], 4294963200 }
 0xa4f   :  { %5872 = dma.done.wait [#allocation14 + $0x5], 64 }
 0xa50   :  { %5873 = vsyncadd [#allocation14 + $0x5], 4294967232  ;;  %2814 = vmatprep.mubr.bf16.mxu0 %v7081_v50  ;;  %2875 = vmatprep.mubr.bf16.mxu1 %v7081_v50  ;;  %v5342_v35 = vld [vmem:[#allocation5 + $0xe4] ss:$16 sps:$4 sm:$0xff]   ;;  %v5344_v33 = vld [vmem:[#allocation5 + $0xec] ss:$16 sps:$4 sm:$0xff]   ;;  %v2598_v23 = vpack.c.bf16 %v6604_v9, %v6558_v11  ;;  %v2599_v3 = vpack.c.bf16 %v6691_v20, %v6650_v14  ;;  %v2600_v62 = vpack.c.bf16 %v6699_v24, %v6699_v24 }
 0xa51   :  { %2782 = vmatprep.subr.bf16.mxu0 %v5342_v35  ;;  %v5346_v32 = vld [vmem:[#allocation5 + $0xe0] ss:$16 sps:$4 sm:$0xff]   ;;  %v5347_v13 = vld [vmem:[#allocation5 + $0xe8] ss:$16 sps:$4 sm:$0xff]   ;;  %2843 = vmatprep.subr.bf16.mxu1 %v5344_v33  ;;  %v5348_v37 = vld [vmem:[#allocation5 + $0xc4] ss:$16 sps:$4 sm:$0xff]  }
 0xa52   :  { %2783 = vmatpush1.bf16.msra.mxu0 %v5346_v32  ;;  %2844 = vmatpush1.bf16.msra.mxu1 %v5347_v13  ;;  %v5350_v27 = vld [vmem:[#allocation5 + $0xcc] ss:$16 sps:$4 sm:$0xff]   ;;  %v5352_v25 = vld [vmem:[#allocation5 + $0xc0] ss:$16 sps:$4 sm:$0xff]   ;;  %v5353_v58 = vld [vmem:[#allocation5 + $0xc8] ss:$16 sps:$4 sm:$0xff]  }
 0xa53   :  { %2784 = vmatprep.subr.bf16.mxu0 %v5348_v37  ;;  %2845 = vmatprep.subr.bf16.mxu1 %v5350_v27  ;;  %v5354_v15 = vld [vmem:[#allocation5 + $0xa4] ss:$16 sps:$4 sm:$0xff]   ;;  %v5356_v41 = vld [vmem:[#allocation5 + $0xac] ss:$16 sps:$4 sm:$0xff]   ;;  %v5358_v42 = vld [vmem:[#allocation5 + $0xa0] ss:$16 sps:$4 sm:$0xff]  }
 0xa54   :  { %v5359_v43 = vld [vmem:[#allocation5 + $0xa8] ss:$16 sps:$4 sm:$0xff]   ;;  %v5360_v44 = vld [vmem:[#allocation5 + $0x84] ss:$16 sps:$4 sm:$0xff]   ;;  %v5362_v45 = vld [vmem:[#allocation5 + $0x8c] ss:$16 sps:$4 sm:$0xff]  }
 0xa55   :  { %v5364_v46 = vld [vmem:[#allocation5 + $0x80] ss:$16 sps:$4 sm:$0xff]   ;;  %v5365_v47 = vld [vmem:[#allocation5 + $0x88] ss:$16 sps:$4 sm:$0xff]   ;;  %v5366_v48 = vld [vmem:[#allocation5 + $0x64] ss:$16 sps:$4 sm:$0xff]  }
 0xa56   :  { %2785 = vmatpush1.bf16.msra.mxu0 %v5352_v25  ;;  %2846 = vmatpush1.bf16.msra.mxu1 %v5353_v58  ;;  %v5368_v49 = vld [vmem:[#allocation5 + $0x6c] ss:$16 sps:$4 sm:$0xff]   ;;  %v5370_v12 = vld [vmem:[#allocation5 + $0x60] ss:$16 sps:$4 sm:$0xff]   ;;  %v5371_v51 = vld [vmem:[#allocation5 + $0x68] ss:$16 sps:$4 sm:$0xff]  }
 0xa57   :  { %2786 = vmatprep.subr.bf16.mxu0 %v5354_v15  ;;  %2847 = vmatprep.subr.bf16.mxu1 %v5356_v41  ;;  %v5372_v52 = vld [vmem:[#allocation5 + $0x44] ss:$16 sps:$4 sm:$0xff]   ;;  %v5374_v53 = vld [vmem:[#allocation5 + $0x4c] ss:$16 sps:$4 sm:$0xff]   ;;  %v5376_v8 = vld [vmem:[#allocation5 + $0x40] ss:$16 sps:$4 sm:$0xff]  }
 0xa58   :  { %v5377_v55 = vld [vmem:[#allocation5 + $0x48] ss:$16 sps:$4 sm:$0xff]   ;;  %v5378_v63 = vld [vmem:[#allocation5 + $0x24] ss:$16 sps:$4 sm:$0xff]   ;;  %v5380_v60 = vld [vmem:[#allocation5 + $0x2c] ss:$16 sps:$4 sm:$0xff]  }
 0xa59   :  { %v5382_v5 = vld [vmem:[#allocation5 + $0x20] ss:$16 sps:$4 sm:$0xff]   ;;  %v5383_v2 = vld [vmem:[#allocation5 + $0x28] ss:$16 sps:$4 sm:$0xff]   ;;  %v5384_v29 = vld [vmem:[#allocation5 + $0x4] ss:$16 sps:$4 sm:$0xff]  }
 0xa5a   :  { %2787 = vmatpush1.bf16.msra.mxu0 %v5358_v42  ;;  %2848 = vmatpush1.bf16.msra.mxu1 %v5359_v43  ;;  %v5386_v10 = vld [vmem:[#allocation5 + $0xc] ss:$16 sps:$4 sm:$0xff]   ;;  %v5388_v7 = vld [vmem:[#allocation5] ss:$16 sps:$4 sm:$0xff]   ;;  %v5389_v18 = vld [vmem:[#allocation5 + $0x8] ss:$16 sps:$4 sm:$0xff]  }
 0xa5b   :  { %2788 = vmatprep.subr.bf16.mxu0 %v5360_v44  ;;  %2849 = vmatprep.subr.bf16.mxu1 %v5362_v45  ;;  %v6703_v38 = vld [vmem:[#allocation6 + $0xe4] ss:$16 sps:$4 sm:$0xff]   ;;  %v6705_v39 = vld [vmem:[#allocation6 + $0xec] ss:$16 sps:$4 sm:$0xff]   ;;  %v6709_v56 = vld [vmem:[#allocation6 + $0xe0] ss:$16 sps:$4 sm:$0xff]  }
 0xa5c   :  { %v6711_v21 = vld [vmem:[#allocation6 + $0xe8] ss:$16 sps:$4 sm:$0xff]   ;;  %v6713_v0 = vld [vmem:[#allocation6 + $0xc4] ss:$16 sps:$4 sm:$0xff]   ;;  %v6717_v19 = vld [vmem:[#allocation6 + $0xcc] ss:$16 sps:$4 sm:$0xff]  }
 0xa5d   :  { %v6719_v61 = vld [vmem:[#allocation6 + $0xc0] ss:$16 sps:$4 sm:$0xff]   ;;  %v6723_v11 = vld [vmem:[#allocation6 + $0xc8] ss:$16 sps:$4 sm:$0xff]   ;;  %v6725_v9 = vld [vmem:[#allocation6 + $0xa4] ss:$16 sps:$4 sm:$0xff]  }
 0xa5e   :  { %2789 = vmatpush1.bf16.msra.mxu0 %v5364_v46  ;;  %2850 = vmatpush1.bf16.msra.mxu1 %v5365_v47  ;;  %v6729_v1 = vld [vmem:[#allocation6 + $0xac] ss:$16 sps:$4 sm:$0xff]   ;;  %v6733_v31 = vld [vmem:[#allocation6 + $0xa0] ss:$16 sps:$4 sm:$0xff]   ;;  %v6735_v36 = vld [vmem:[#allocation6 + $0xa8] ss:$16 sps:$4 sm:$0xff]  }
 0xa5f   :  { %2790 = vmatprep.subr.bf16.mxu0 %v5366_v48  ;;  %2851 = vmatprep.subr.bf16.mxu1 %v5368_v49  ;;  %v6741_v28 = vld [vmem:[#allocation6 + $0x84] ss:$16 sps:$4 sm:$0xff]   ;;  %v6745_v59 = vld [vmem:[#allocation6 + $0x8c] ss:$16 sps:$4 sm:$0xff]   ;;  %v6749_v4 = vld [vmem:[#allocation6 + $0x80] ss:$16 sps:$4 sm:$0xff]  }
 0xa60   :  { %v6751_v14 = vld [vmem:[#allocation6 + $0x88] ss:$16 sps:$4 sm:$0xff]   ;;  %v6755_v20 = vld [vmem:[#allocation6 + $0x64] ss:$16 sps:$4 sm:$0xff]   ;;  %v6757_v26 = vld [vmem:[#allocation6 + $0x6c] ss:$16 sps:$4 sm:$0xff]  }
 0xa61   :  { %v6765_v57 = vld [vmem:[#allocation6 + $0x60] ss:$16 sps:$4 sm:$0xff]   ;;  %v6767_v54 = vld [vmem:[#allocation6 + $0x68] ss:$16 sps:$4 sm:$0xff]   ;;  %v6771_v6 = vld [vmem:[#allocation6 + $0x44] ss:$16 sps:$4 sm:$0xff]  }
 0xa62   :  { %2791 = vmatpush1.bf16.msra.mxu0 %v5370_v12  ;;  %2852 = vmatpush1.bf16.msra.mxu1 %v5371_v51  ;;  %v6773_v34 = vld [vmem:[#allocation6 + $0x4c] ss:$16 sps:$4 sm:$0xff]   ;;  %v6777_v30 = vld [vmem:[#allocation6 + $0x40] ss:$16 sps:$4 sm:$0xff]   ;;  %v6779_v16 = vld [vmem:[#allocation6 + $0x48] ss:$16 sps:$4 sm:$0xff]  }
 0xa63   :  { %2792 = vmatprep.subr.bf16.mxu0 %v5372_v52  ;;  %2853 = vmatprep.subr.bf16.mxu1 %v5374_v53  ;;  %v6783_v22 = vld [vmem:[#allocation6 + $0x24] ss:$16 sps:$4 sm:$0xff]   ;;  %v6785_v40 = vld [vmem:[#allocation6 + $0x2c] ss:$16 sps:$4 sm:$0xff]   ;;  %v6791_v17 = vld [vmem:[#allocation6 + $0x20] ss:$16 sps:$4 sm:$0xff]  }
 0xa64   :  { %v6793_v24 = vld [vmem:[#allocation6 + $0x28] ss:$16 sps:$4 sm:$0xff]   ;;  %v6797_v35 = vld [vmem:[#allocation6 + $0x4] ss:$16 sps:$4 sm:$0xff]   ;;  %v6799_v33 = vld [vmem:[#allocation6 + $0xc] ss:$16 sps:$4 sm:$0xff]  }
 0xa65   :  { %v6803_v32 = vld [vmem:[#allocation6] ss:$16 sps:$4 sm:$0xff]   ;;  %v6805_v13 = vld [vmem:[#allocation6 + $0x8] ss:$16 sps:$4 sm:$0xff]  }
 0xa66   :  { %2793 = vmatpush1.bf16.msra.mxu0 %v5376_v8  ;;  %2854 = vmatpush1.bf16.msra.mxu1 %v5377_v55  ;;  %v2597_v37 = vld [vmem:[#allocation7] sm:$0xf]  ;;  %v7120_v58 = vld [vmem:[#allocation58_spill] sm:$0xff]  ;;  %v7121_v43 = vld [vmem:[#allocation59_spill] sm:$0xff] }
 0xa67   :  { %2794 = vmatprep.subr.bf16.mxu0 %v5378_v63  ;;  %2855 = vmatprep.subr.bf16.mxu1 %v5380_v60  ;;  %v2613_v15 = vrot.slane %v2597_v37, %v7120_v58  ;;  %v2605_v44 = vrot.slane %v2597_v37, %v7121_v43  ;;  %v7122_v45 = vld [vmem:[#allocation60_spill] sm:$0xff]  ;;  %v7123_v49 = vld [vmem:[#allocation61_spill] sm:$0xff] }
 0xa68   :  { %v2617_v46 = vrot.slane %v2597_v37, %v7122_v45  ;;  %v2609_v12 = vrot.slane %v2597_v37, %v7123_v49 }
 0xa6a   :  { %2795 = vmatpush1.bf16.msra.mxu0 %v5382_v5  ;;  %2856 = vmatpush1.bf16.msra.mxu1 %v5383_v2 }
 0xa6b   :  { %2796 = vmatprep.subr.bf16.mxu0 %v5384_v29  ;;  %2857 = vmatprep.subr.bf16.mxu1 %v5386_v10 }
 0xa6e   :  { %2797 = vmatpush1.bf16.msra.mxu0 %v5388_v7  ;;  %2858 = vmatpush1.bf16.msra.mxu1 %v5389_v18 }
 0xa6f   :  { %3064 = vmatprep.subr.bf16.mxu0 %v6703_v38  ;;  %3105 = vmatprep.subr.bf16.mxu1 %v6705_v39 }
 0xa71   :  { %2815 = vmatmul.mubr.bf16.vlgmr.msra.gmra.mxu0 %v2598_v23  ;;  %2876 = vmatmul.mubr.bf16.vlgmr.msra.gmra.mxu1 %v2598_v23 }
 0xa72   :  { %3065 = vmatpush1.bf16.msra.mxu0 %v6709_v56  ;;  %3106 = vmatpush1.bf16.msra.mxu1 %v6711_v21 }
 0xa73   :  { %3066 = vmatprep.subr.bf16.mxu0 %v6713_v0  ;;  %3107 = vmatprep.subr.bf16.mxu1 %v6717_v19 }
 0xa74   :  { %2824 = vmatprep.mubr.bf16.mxu0 %v7081_v50  ;;  %2885 = vmatprep.mubr.bf16.mxu1 %v7081_v50 }
 0xa76   :  { %3067 = vmatpush1.bf16.msra.mxu0 %v6719_v61  ;;  %3108 = vmatpush1.bf16.msra.mxu1 %v6723_v11 }
 0xa77   :  { %3068 = vmatprep.subr.bf16.mxu0 %v6725_v9  ;;  %3109 = vmatprep.subr.bf16.mxu1 %v6729_v1 }
 0xa79   :  { %2825 = vmatmul.mubr.bf16.gmra.mxu0 %v2599_v3  ;;  %2886 = vmatmul.mubr.bf16.gmra.mxu1 %v2599_v3 }
 0xa7a   :  { %3069 = vmatpush1.bf16.msra.mxu0 %v6733_v31  ;;  %3110 = vmatpush1.bf16.msra.mxu1 %v6735_v36 }
 0xa7b   :  { %3070 = vmatprep.subr.bf16.mxu0 %v6741_v28  ;;  %3111 = vmatprep.subr.bf16.mxu1 %v6745_v59 }
 0xa7c   :  { %2834 = vmatprep.mubr.bf16.mxu0 %v7081_v50  ;;  %2895 = vmatprep.mubr.bf16.mxu1 %v7081_v50 }
 0xa7e   :  { %3071 = vmatpush1.bf16.msra.mxu0 %v6749_v4  ;;  %3112 = vmatpush1.bf16.msra.mxu1 %v6751_v14 }
 0xa7f   :  { %3072 = vmatprep.subr.bf16.mxu0 %v6755_v20  ;;  %3113 = vmatprep.subr.bf16.mxu1 %v6757_v26 }
 0xa81   :  { %2835 = vmatmul.mubr.bf16.gmra.mxu0 %v2600_v62  ;;  %2896 = vmatmul.mubr.bf16.gmra.mxu1 %v2600_v62 }
 0xa82   :  { %3073 = vmatpush1.bf16.msra.mxu0 %v6765_v57  ;;  %3114 = vmatpush1.bf16.msra.mxu1 %v6767_v54 }
 0xa83   :  { %3074 = vmatprep.subr.bf16.mxu0 %v6771_v6  ;;  %3115 = vmatprep.subr.bf16.mxu1 %v6773_v34 }
 0xa84   :  { %3096 = vmatprep.mubr.bf16.mxu0 %v7081_v50  ;;  %3137 = vmatprep.mubr.bf16.mxu1 %v7081_v50 }
 0xa86   :  { %3075 = vmatpush1.bf16.msra.mxu0 %v6777_v30  ;;  %3116 = vmatpush1.bf16.msra.mxu1 %v6779_v16 }
 0xa87   :  { %3076 = vmatprep.subr.bf16.mxu0 %v6783_v22  ;;  %3117 = vmatprep.subr.bf16.mxu1 %v6785_v40 }
 0xa8a   :  { %3077 = vmatpush1.bf16.msra.mxu0 %v6791_v17  ;;  %3118 = vmatpush1.bf16.msra.mxu1 %v6793_v24 }
 0xa8b   :  { %3078 = vmatprep.subr.bf16.mxu0 %v6797_v35  ;;  %3119 = vmatprep.subr.bf16.mxu1 %v6799_v33 }
 0xa8e   :  { %3079 = vmatpush1.bf16.msra.mxu0 %v6803_v32  ;;  %3120 = vmatpush1.bf16.msra.mxu1 %v6805_v13 }
 0xa8f   :  { %3169 = vmatprep.subr.bf16.mxu0 %v6703_v38  ;;  %3210 = vmatprep.subr.bf16.mxu1 %v6705_v39 }
 0xa91   :  { %3097 = vmatmul.mubr.bf16.vlgmr.msra.gmra.mxu0 %v7081_v50  ;;  %3138 = vmatmul.mubr.bf16.vlgmr.msra.gmra.mxu1 %v7081_v50 }
 0xa92   :  { %3170 = vmatpush1.bf16.msra.mxu0 %v6709_v56  ;;  %3211 = vmatpush1.bf16.msra.mxu1 %v6711_v21 }
 0xa93   :  { %3171 = vmatprep.subr.bf16.mxu0 %v6713_v0  ;;  %3212 = vmatprep.subr.bf16.mxu1 %v6717_v19 }
 0xa94   :  { %3201 = vmatprep.mubr.bf16.mxu0 %v7081_v50  ;;  %3242 = vmatprep.mubr.bf16.mxu1 %v7081_v50 }
 0xa96   :  { %3172 = vmatpush1.bf16.msra.mxu0 %v6719_v61  ;;  %3213 = vmatpush1.bf16.msra.mxu1 %v6723_v11 }
 0xa97   :  { %3173 = vmatprep.subr.bf16.mxu0 %v6725_v9  ;;  %3214 = vmatprep.subr.bf16.mxu1 %v6729_v1 }
 0xa9a   :  { %3174 = vmatpush1.bf16.msra.mxu0 %v6733_v31  ;;  %3215 = vmatpush1.bf16.msra.mxu1 %v6735_v36 }
 0xa9b   :  { %3175 = vmatprep.subr.bf16.mxu0 %v6741_v28  ;;  %3216 = vmatprep.subr.bf16.mxu1 %v6745_v59 }
 0xa9e   :  { %3176 = vmatpush1.bf16.msra.mxu0 %v6749_v4  ;;  %3217 = vmatpush1.bf16.msra.mxu1 %v6751_v14 }
 0xa9f   :  { %3177 = vmatprep.subr.bf16.mxu0 %v6755_v20  ;;  %3218 = vmatprep.subr.bf16.mxu1 %v6757_v26 }
 0xaa2   :  { %3178 = vmatpush1.bf16.msra.mxu0 %v6765_v57  ;;  %3219 = vmatpush1.bf16.msra.mxu1 %v6767_v54 }
 0xaa3   :  { %3179 = vmatprep.subr.bf16.mxu0 %v6771_v6  ;;  %3220 = vmatprep.subr.bf16.mxu1 %v6773_v34 }
 0xaa6   :  { %3180 = vmatpush1.bf16.msra.mxu0 %v6777_v30  ;;  %3221 = vmatpush1.bf16.msra.mxu1 %v6779_v16 }
 0xaa7   :  { %3181 = vmatprep.subr.bf16.mxu0 %v6783_v22  ;;  %3222 = vmatprep.subr.bf16.mxu1 %v6785_v40 }
 0xaaa   :  { %3182 = vmatpush1.bf16.msra.mxu0 %v6791_v17  ;;  %3223 = vmatpush1.bf16.msra.mxu1 %v6793_v24 }
 0xaab   :  { %3183 = vmatprep.subr.bf16.mxu0 %v6797_v35  ;;  %3224 = vmatprep.subr.bf16.mxu1 %v6799_v33 }
 0xaae   :  { %3184 = vmatpush1.bf16.msra.mxu0 %v6803_v32  ;;  %3225 = vmatpush1.bf16.msra.mxu1 %v6805_v13 }
 0xaaf   :  { %3274 = vmatprep.subr.bf16.mxu0 %v6703_v38  ;;  %3315 = vmatprep.subr.bf16.mxu1 %v6705_v39 }
 0xb31   :  { %v2816_v27 = vpop.f32.mrf.mxu0  ;;  %v2877_v25 = vpop.f32.mrf.mxu1 }
 0xb33   :  { %v2818_v41 = vpop.f32.mrf.mxu0  ;;  %v2879_v42 = vpop.f32.mrf.mxu1 }
 0xb35   :  { %v2820_v47 = vpop.f32.mrf.mxu0  ;;  %v2881_v48 = vpop.f32.mrf.mxu1 }
 0xb36   :  { %v6853_v51 = vadd.f32 %v2820_v47, %v2605_v44  ;;  %v6855_v52 = vadd.f32 %v2881_v48, %v2613_v15 }
 0xb37   :  { %v2822_v53 = vpop.f32.mrf.mxu0  ;;  %v2883_v8 = vpop.f32.mrf.mxu1 }
 0xb38   :  { %v6857_v55 = vadd.f32 %v2822_v53, %v2609_v12  ;;  %v6859_v63 = vadd.f32 %v2883_v8, %v2617_v46 }
 0xb39   :  { %v2826_v60 = vpop.f32.mrf.mxu0  ;;  %v2887_v5 = vpop.f32.mrf.mxu1 }
 0xb3a   :  { %7124 = vst [vmem:[#allocation63_spill] sm:$0xff] %v6859_v63  ;;  %v6861_v2 = vadd.f32 %v2826_v60, %v2605_v44  ;;  %v6863_v29 = vadd.f32 %v2887_v5, %v2613_v15  ;;  %v2878_v63 = vadd.f32 %v2877_v25, %v2613_v15 }
 0xb3b   :  { %v2828_v10 = vpop.f32.mrf.mxu0  ;;  %v2889_v7 = vpop.f32.mrf.mxu1 }
 0xb3c   :  { %7125 = vst [vmem:[#allocation62_spill] sm:$0xff] %v6861_v2  ;;  %7126 = vst [vmem:[#allocation65_spill] sm:$0xff] %v6863_v29  ;;  %v6865_v18 = vadd.f32 %v2828_v10, %v2609_v12  ;;  %v6867_v23 = vadd.f32 %v2889_v7, %v2617_v46 }
 0xb3d   :  { %v2830_v3 = vpop.f32.mrf.mxu0  ;;  %v2891_v62 = vpop.f32.mrf.mxu1 }
 0xb3e   :  { %7127 = vst [vmem:[#allocation64_spill] sm:$0xff] %v6865_v18  ;;  %7128 = vst [vmem:[#allocation67_spill] sm:$0xff] %v6867_v23  ;;  %v6869_v37 = vadd.f32 %v2830_v3, %v2605_v44  ;;  %v6871_v58 = vadd.f32 %v2891_v62, %v2613_v15 }
 0xb3f   :  { %v2832_v45 = vpop.f32.mrf.mxu0  ;;  %v2893_v47 = vpop.f32.mrf.mxu1 }
 0xb40   :  { %7129 = vst [vmem:[#allocation66_spill] sm:$0xff] %v6869_v37  ;;  %7130 = vst [vmem:[#allocation69_spill] sm:$0xff] %v6871_v58  ;;  %v6873_v48 = vadd.f32 %v2832_v45, %v2609_v12  ;;  %v6875_v53 = vadd.f32 %v2893_v47, %v2617_v46  ;;  %v2817_v45 = vadd.f32 %v2816_v27, %v2605_v44 }
 0xb41   :  { %v2836_v8 = vpop.f32.mrf.mxu0  ;;  %v2897_v60 = vpop.f32.mrf.mxu1 }
 0xb42   :  { %7131 = vst [vmem:[#allocation68_spill] sm:$0xff] %v6873_v48  ;;  %7132 = vst [vmem:[#allocation71_spill] sm:$0xff] %v6875_v53  ;;  %v6877_v5 = vadd.f32 %v2836_v8, %v2605_v44  ;;  %v6879_v10 = vadd.f32 %v2897_v60, %v2613_v15  ;;  %v2819_v53 = vadd.f32 %v2818_v41, %v2609_v12 }
 0xb43   :  { %v2838_v7 = vpop.f32.mrf.mxu0  ;;  %v2899_v49 = vpop.f32.mrf.mxu1 }
 0xb44   :  { %7133 = vst [vmem:[#allocation70_spill] sm:$0xff] %v6877_v5  ;;  %7134 = vst [vmem:[#allocation72_spill] sm:$0xff] %v6879_v10  ;;  %v6881_v43 = vadd.f32 %v2838_v7, %v2609_v12  ;;  %v6883_v3 = vadd.f32 %v2899_v49, %v2617_v46 }
 0xb45   :  { %v2840_v62 = vpop.f32.mrf.mxu0  ;;  %v2901_v58 = vpop.f32.mrf.mxu1 }
 0xb46   :  { %7135 = vst [vmem:[#allocation73_spill] sm:$0xff] %v6883_v3 }
 0xb47   :  { %v2841_v37 = vpop.f32.mrf.mxu0  ;;  %v2902_v23 = vpop.f32.mrf.mxu1 }
 0xb48   :  { %v2880_v37 = vadd.f32 %v2879_v42, %v2617_v46 }
 0xb51   :  { %v3098_v48 = vpop.f32.mrf.mxu0  ;;  %v3139_v47 = vpop.f32.mrf.mxu1 }
 0xb52   :  { %v3146_v29 = vadd.f32 %v3098_v48, %v2817_v45  ;;  %v3148_v62 = vadd.f32 %v3139_v47, %v2878_v63 }
 0xb53   :  { %v3100_v18 = vpop.f32.mrf.mxu0  ;;  %v3141_v8 = vpop.f32.mrf.mxu1 }
 0xb54   :  { %v3150_v5 = vmul.f32 0.5, %v3146_v29  ;;  %v3147_v60 = vadd.f32 %v3100_v18, %v2819_v53  ;;  %v3149_v27 = vadd.f32 %v3141_v8, %v2880_v37 }
 0xb55   :  { %v3102_v10 = vpop.f32.mrf.mxu0  ;;  %v3143_v2 = vpop.f32.mrf.mxu1 }
 0xb56   :  { %5438 = vtanh.f32 %v3150_v5  ;;  %v3154_v7 = vmul.f32 0.5, %v3147_v60  ;;  %v3159_v44 = vmul.f32 0.5, %v3149_v27 }
 0xb57   :  { %v3103_v49 = vpop.f32.mrf.mxu0  ;;  %v3144_v3 = vpop.f32.mrf.mxu1 }
 0xb58   :  { %5440 = vtanh.f32 %v3154_v7 }
 0xb59   :  { %5442 = vtanh.f32 %v3148_v62 }
 0xb5a   :  { %5444 = vtanh.f32 %v3159_v44 }
 0xb63   :  { %v5439_v23 = vpop.eup %5438 }
 0xb64   :  { %v3152_v41 = vmul.f32 0.5, %v5439_v23 }
 0xb65   :  { %v5441_v12 = vpop.eup %5440 }
 0xb66   :  { %v3153_v58 = vadd.f32 0.5, %v3152_v41  ;;  %v3156_v48 = vmul.f32 0.5, %v5441_v12  ;;  %v5443_v18 = vpop.eup %5442  ;;  %v7136_v12 = vld [vmem:[#allocation63_spill] sm:$0xff] }
 0xb67   :  { %v5445_v63 = vpop.eup %5444 }
 0xb68   :  { %v3157_v29 = vadd.f32 0.5, %v3156_v48  ;;  %v3164_v25 = vmul.f32 %v5443_v18, %v3153_v58  ;;  %v3161_v53 = vmul.f32 0.5, %v5445_v63 }
 0xb6a   :  { %v3163_v2 = vmul.f32 0.0, %v3157_v29  ;;  %v3162_v42 = vadd.f32 0.5, %v3161_v53 }
 0xb6c   :  { %v6885_v15 = vadd.f32 %v3164_v25, %v3163_v2 }
 0xb6e   :  { %5446 = vtanh.f32 %v6885_v15 }
 0xb7b   :  { %v5447_v46 = vpop.eup %5446 }
 0xb7c   :  { %v3167_v5 = vmul.f32 %v5447_v46, %v3162_v42 }
 0xb7e   :  { %v6888_v10 = vpack.c.bf16 %v3167_v5, %v3167_v5 }
 0xb80   :  { %3202 = vmatmul.mubr.bf16.vlgmr.msra.gmra.mxu0 %v6888_v10  ;;  %3243 = vmatmul.mubr.bf16.vlgmr.msra.gmra.mxu1 %v6888_v10 }
 0xb81   :  { %3275 = vmatpush1.bf16.msra.mxu0 %v6709_v56  ;;  %3316 = vmatpush1.bf16.msra.mxu1 %v6711_v21 }
 0xb82   :  { %3276 = vmatprep.subr.bf16.mxu0 %v6713_v0  ;;  %3317 = vmatprep.subr.bf16.mxu1 %v6717_v19 }
 0xb83   :  { %3306 = vmatprep.mubr.bf16.mxu0 %v7081_v50  ;;  %3347 = vmatprep.mubr.bf16.mxu1 %v7081_v50 }
 0xb85   :  { %3277 = vmatpush1.bf16.msra.mxu0 %v6719_v61  ;;  %3318 = vmatpush1.bf16.msra.mxu1 %v6723_v11 }
 0xb86   :  { %3278 = vmatprep.subr.bf16.mxu0 %v6725_v9  ;;  %3319 = vmatprep.subr.bf16.mxu1 %v6729_v1 }
 0xb89   :  { %3279 = vmatpush1.bf16.msra.mxu0 %v6733_v31  ;;  %3320 = vmatpush1.bf16.msra.mxu1 %v6735_v36 }
 0xb8a   :  { %3280 = vmatprep.subr.bf16.mxu0 %v6741_v28  ;;  %3321 = vmatprep.subr.bf16.mxu1 %v6745_v59 }
 0xb8d   :  { %3281 = vmatpush1.bf16.msra.mxu0 %v6749_v4  ;;  %3322 = vmatpush1.bf16.msra.mxu1 %v6751_v14 }
 0xb8e   :  { %3282 = vmatprep.subr.bf16.mxu0 %v6755_v20  ;;  %3323 = vmatprep.subr.bf16.mxu1 %v6757_v26 }
 0xb91   :  { %3283 = vmatpush1.bf16.msra.mxu0 %v6765_v57  ;;  %3324 = vmatpush1.bf16.msra.mxu1 %v6767_v54 }
 0xb92   :  { %3284 = vmatprep.subr.bf16.mxu0 %v6771_v6  ;;  %3325 = vmatprep.subr.bf16.mxu1 %v6773_v34 }
 0xb95   :  { %3285 = vmatpush1.bf16.msra.mxu0 %v6777_v30  ;;  %3326 = vmatpush1.bf16.msra.mxu1 %v6779_v16 }
 0xb96   :  { %3286 = vmatprep.subr.bf16.mxu0 %v6783_v22  ;;  %3327 = vmatprep.subr.bf16.mxu1 %v6785_v40 }
 0xb99   :  { %3287 = vmatpush1.bf16.msra.mxu0 %v6791_v17  ;;  %3328 = vmatpush1.bf16.msra.mxu1 %v6793_v24 }
 0xb9a   :  { %3288 = vmatprep.subr.bf16.mxu0 %v6797_v35  ;;  %3329 = vmatprep.subr.bf16.mxu1 %v6799_v33 }
 0xb9d   :  { %3289 = vmatpush1.bf16.msra.mxu0 %v6803_v32  ;;  %3330 = vmatpush1.bf16.msra.mxu1 %v6805_v13 }
 0xb9e   :  { %3379 = vmatprep.subr.bf16.mxu0 %v6703_v38  ;;  %3420 = vmatprep.subr.bf16.mxu1 %v6705_v39 }
 0xc40   :  { %v3203_v3 = vpop.f32.mrf.mxu0  ;;  %v3244_v45 = vpop.f32.mrf.mxu1 }
 0xc41   :  { %v3251_v47 = vadd.f32 %v3203_v3, %v6853_v51  ;;  %v3253_v27 = vadd.f32 %v3244_v45, %v6855_v52 }
 0xc42   :  { %v3205_v8 = vpop.f32.mrf.mxu0  ;;  %v3246_v60 = vpop.f32.mrf.mxu1 }
 0xc43   :  { %v3255_v7 = vmul.f32 0.5, %v3251_v47  ;;  %v3252_v49 = vadd.f32 %v3205_v8, %v6857_v55  ;;  %v3254_v58 = vadd.f32 %v3246_v60, %v7136_v12 }
 0xc44   :  { %v3207_v62 = vpop.f32.mrf.mxu0  ;;  %v3248_v37 = vpop.f32.mrf.mxu1 }
 0xc45   :  { %5448 = vtanh.f32 %v3255_v7  ;;  %v3259_v44 = vmul.f32 0.5, %v3252_v49  ;;  %v3264_v48 = vmul.f32 0.5, %v3254_v58  ;;  %v7137_v7 = vld [vmem:[#allocation62_spill] sm:$0xff]  ;;  %v7139_v58 = vld [vmem:[#allocation65_spill] sm:$0xff] }
 0xc46   :  { %v3208_v23 = vpop.f32.mrf.mxu0  ;;  %v3249_v41 = vpop.f32.mrf.mxu1 }
 0xc47   :  { %5450 = vtanh.f32 %v3259_v44  ;;  %v7138_v44 = vld [vmem:[#allocation64_spill] sm:$0xff] }
 0xc48   :  { %5452 = vtanh.f32 %v3253_v27 }
 0xc49   :  { %5454 = vtanh.f32 %v3264_v48 }
 0xc52   :  { %v5449_v29 = vpop.eup %5448 }
 0xc53   :  { %v3257_v51 = vmul.f32 0.5, %v5449_v29 }
 0xc54   :  { %v5451_v18 = vpop.eup %5450 }
 0xc55   :  { %v3258_v2 = vadd.f32 0.5, %v3257_v51  ;;  %v3261_v25 = vmul.f32 0.5, %v5451_v18  ;;  %v5453_v55 = vpop.eup %5452 }
 0xc56   :  { %v5455_v46 = vpop.eup %5454 }
 0xc57   :  { %v3262_v63 = vadd.f32 0.5, %v3261_v25  ;;  %v3269_v53 = vmul.f32 %v5453_v55, %v3258_v2  ;;  %v3266_v5 = vmul.f32 0.5, %v5455_v46 }
 0xc59   :  { %v3268_v42 = vmul.f32 %v3262_v63, %v6885_v15  ;;  %v3267_v3 = vadd.f32 0.5, %v3266_v5 }
 0xc5b   :  { %v6931_v52 = vadd.f32 %v3269_v53, %v3268_v42 }
 0xc5d   :  { %5456 = vtanh.f32 %v6931_v52 }
 0xc6a   :  { %v5457_v45 = vpop.eup %5456 }
 0xc6b   :  { %v3272_v47 = vmul.f32 %v5457_v45, %v3267_v3 }
 0xc6d   :  { %v6934_v8 = vpack.c.bf16 %v3272_v47, %v3272_v47 }
 0xc6f   :  { %3307 = vmatmul.mubr.bf16.vlgmr.msra.gmra.mxu0 %v6934_v8  ;;  %3348 = vmatmul.mubr.bf16.vlgmr.msra.gmra.mxu1 %v6934_v8 }
 0xc70   :  { %3380 = vmatpush1.bf16.msra.mxu0 %v6709_v56  ;;  %3421 = vmatpush1.bf16.msra.mxu1 %v6711_v21 }
 0xc71   :  { %3381 = vmatprep.subr.bf16.mxu0 %v6713_v0  ;;  %3422 = vmatprep.subr.bf16.mxu1 %v6717_v19 }
 0xc72   :  { %3411 = vmatprep.mubr.bf16.mxu0 %v7081_v50  ;;  %3452 = vmatprep.mubr.bf16.mxu1 %v7081_v50 }
 0xc74   :  { %3382 = vmatpush1.bf16.msra.mxu0 %v6719_v61  ;;  %3423 = vmatpush1.bf16.msra.mxu1 %v6723_v11 }
 0xc75   :  { %3383 = vmatprep.subr.bf16.mxu0 %v6725_v9  ;;  %3424 = vmatprep.subr.bf16.mxu1 %v6729_v1 }
 0xc78   :  { %3384 = vmatpush1.bf16.msra.mxu0 %v6733_v31  ;;  %3425 = vmatpush1.bf16.msra.mxu1 %v6735_v36 }
 0xc79   :  { %3385 = vmatprep.subr.bf16.mxu0 %v6741_v28  ;;  %3426 = vmatprep.subr.bf16.mxu1 %v6745_v59 }
 0xc7c   :  { %3386 = vmatpush1.bf16.msra.mxu0 %v6749_v4  ;;  %3427 = vmatpush1.bf16.msra.mxu1 %v6751_v14 }
 0xc7d   :  { %3387 = vmatprep.subr.bf16.mxu0 %v6755_v20  ;;  %3428 = vmatprep.subr.bf16.mxu1 %v6757_v26 }
 0xc80   :  { %3388 = vmatpush1.bf16.msra.mxu0 %v6765_v57  ;;  %3429 = vmatpush1.bf16.msra.mxu1 %v6767_v54 }
 0xc81   :  { %3389 = vmatprep.subr.bf16.mxu0 %v6771_v6  ;;  %3430 = vmatprep.subr.bf16.mxu1 %v6773_v34 }
 0xc84   :  { %3390 = vmatpush1.bf16.msra.mxu0 %v6777_v30  ;;  %3431 = vmatpush1.bf16.msra.mxu1 %v6779_v16 }
 0xc85   :  { %3391 = vmatprep.subr.bf16.mxu0 %v6783_v22  ;;  %3432 = vmatprep.subr.bf16.mxu1 %v6785_v40 }
 0xc88   :  { %3392 = vmatpush1.bf16.msra.mxu0 %v6791_v17  ;;  %3433 = vmatpush1.bf16.msra.mxu1 %v6793_v24 }
 0xc89   :  { %3393 = vmatprep.subr.bf16.mxu0 %v6797_v35  ;;  %3434 = vmatprep.subr.bf16.mxu1 %v6799_v33 }
 0xc8c   :  { %3394 = vmatpush1.bf16.msra.mxu0 %v6803_v32  ;;  %3435 = vmatpush1.bf16.msra.mxu1 %v6805_v13 }
 0xc8d   :  { %3484 = vmatprep.subr.bf16.mxu0 %v6703_v38  ;;  %3525 = vmatprep.subr.bf16.mxu1 %v6705_v39  ;;  %v7140_v38 = vld [vmem:[#allocation67_spill] sm:$0xff] }
 0xd2f   :  { %v3308_v15 = vpop.f32.mrf.mxu0  ;;  %v3349_v60 = vpop.f32.mrf.mxu1 }
 0xd30   :  { %v3356_v49 = vadd.f32 %v3308_v15, %v7137_v7  ;;  %v3358_v48 = vadd.f32 %v3349_v60, %v7139_v58 }
 0xd31   :  { %v3310_v62 = vpop.f32.mrf.mxu0  ;;  %v3351_v37 = vpop.f32.mrf.mxu1 }
 0xd32   :  { %v3360_v27 = vmul.f32 0.5, %v3356_v49  ;;  %v3357_v23 = vadd.f32 %v3310_v62, %v7138_v44  ;;  %v3359_v39 = vadd.f32 %v3351_v37, %v7140_v38 }
 0xd33   :  { %v3312_v41 = vpop.f32.mrf.mxu0  ;;  %v3353_v12 = vpop.f32.mrf.mxu1 }
 0xd34   :  { %5458 = vtanh.f32 %v3360_v27  ;;  %v3364_v29 = vmul.f32 0.5, %v3357_v23  ;;  %v3369_v2 = vmul.f32 0.5, %v3359_v39 }
 0xd35   :  { %v3313_v51 = vpop.f32.mrf.mxu0  ;;  %v3354_v18 = vpop.f32.mrf.mxu1 }
 0xd36   :  { %5460 = vtanh.f32 %v3364_v29 }
 0xd37   :  { %5462 = vtanh.f32 %v3358_v48  ;;  %v7145_v48 = vld [vmem:[#allocation70_spill] sm:$0xff] }
 0xd38   :  { %5464 = vtanh.f32 %v3369_v2 }
 0xd41   :  { %v5459_v25 = vpop.eup %5458 }
 0xd42   :  { %v3362_v55 = vmul.f32 0.5, %v5459_v25 }
 0xd43   :  { %v5461_v63 = vpop.eup %5460 }
 0xd44   :  { %v3363_v53 = vadd.f32 0.5, %v3362_v55  ;;  %v3366_v42 = vmul.f32 0.5, %v5461_v63  ;;  %v5463_v46 = vpop.eup %5462  ;;  %v7146_v55 = vld [vmem:[#allocation72_spill] sm:$0xff] }
 0xd45   :  { %v5465_v15 = vpop.eup %5464 }
 0xd46   :  { %v3367_v5 = vadd.f32 0.5, %v3366_v42  ;;  %v3374_v3 = vmul.f32 %v5463_v46, %v3363_v53  ;;  %v3371_v60 = vmul.f32 0.5, %v5465_v15 }
 0xd48   :  { %v3373_v45 = vmul.f32 %v3367_v5, %v6931_v52  ;;  %v3372_v7 = vadd.f32 0.5, %v3371_v60  ;;  %v7147_v5 = vld [vmem:[#allocation73_spill] sm:$0xff] }
 0xd4a   :  { %v6977_v47 = vadd.f32 %v3374_v3, %v3373_v45 }
 0xd4c   :  { %5466 = vtanh.f32 %v6977_v47 }
 0xd59   :  { %v5467_v49 = vpop.eup %5466 }
 0xd5a   :  { %v3377_v62 = vmul.f32 %v5467_v49, %v3372_v7 }
 0xd5c   :  { %v6980_v37 = vpack.c.bf16 %v3377_v62, %v3377_v62 }
 0xd5e   :  { %3412 = vmatmul.mubr.bf16.vlgmr.msra.gmra.mxu0 %v6980_v37  ;;  %3453 = vmatmul.mubr.bf16.vlgmr.msra.gmra.mxu1 %v6980_v37 }
 0xd5f   :  { %3485 = vmatpush1.bf16.msra.mxu0 %v6709_v56  ;;  %3526 = vmatpush1.bf16.msra.mxu1 %v6711_v21 }
 0xd60   :  { %3486 = vmatprep.subr.bf16.mxu0 %v6713_v0  ;;  %3527 = vmatprep.subr.bf16.mxu1 %v6717_v19  ;;  %v7141_v0 = vld [vmem:[#allocation66_spill] sm:$0xff] }
 0xd61   :  { %3516 = vmatprep.mubr.bf16.mxu0 %v7081_v50  ;;  %3557 = vmatprep.mubr.bf16.mxu1 %v7081_v50 }
 0xd63   :  { %3487 = vmatpush1.bf16.msra.mxu0 %v6719_v61  ;;  %3528 = vmatpush1.bf16.msra.mxu1 %v6723_v11 }
 0xd64   :  { %3488 = vmatprep.subr.bf16.mxu0 %v6725_v9  ;;  %3529 = vmatprep.subr.bf16.mxu1 %v6729_v1  ;;  %v7142_v1 = vld [vmem:[#allocation68_spill] sm:$0xff] }
 0xd67   :  { %3489 = vmatpush1.bf16.msra.mxu0 %v6733_v31  ;;  %3530 = vmatpush1.bf16.msra.mxu1 %v6735_v36 }
 0xd68   :  { %3490 = vmatprep.subr.bf16.mxu0 %v6741_v28  ;;  %3531 = vmatprep.subr.bf16.mxu1 %v6745_v59  ;;  %v7143_v59 = vld [vmem:[#allocation69_spill] sm:$0xff] }
 0xd6b   :  { %3491 = vmatpush1.bf16.msra.mxu0 %v6749_v4  ;;  %3532 = vmatpush1.bf16.msra.mxu1 %v6751_v14 }
 0xd6c   :  { %3492 = vmatprep.subr.bf16.mxu0 %v6755_v20  ;;  %3533 = vmatprep.subr.bf16.mxu1 %v6757_v26 }
 0xd6f   :  { %3493 = vmatpush1.bf16.msra.mxu0 %v6765_v57  ;;  %3534 = vmatpush1.bf16.msra.mxu1 %v6767_v54  ;;  %v7144_v57 = vld [vmem:[#allocation71_spill] sm:$0xff] }
 0xd70   :  { %3494 = vmatprep.subr.bf16.mxu0 %v6771_v6  ;;  %3535 = vmatprep.subr.bf16.mxu1 %v6773_v34 }
 0xd73   :  { %3495 = vmatpush1.bf16.msra.mxu0 %v6777_v30  ;;  %3536 = vmatpush1.bf16.msra.mxu1 %v6779_v16 }
 0xd74   :  { %3496 = vmatprep.subr.bf16.mxu0 %v6783_v22  ;;  %3537 = vmatprep.subr.bf16.mxu1 %v6785_v40 }
 0xd77   :  { %3497 = vmatpush1.bf16.msra.mxu0 %v6791_v17  ;;  %3538 = vmatpush1.bf16.msra.mxu1 %v6793_v24 }
 0xd78   :  { %3498 = vmatprep.subr.bf16.mxu0 %v6797_v35  ;;  %3539 = vmatprep.subr.bf16.mxu1 %v6799_v33 }
 0xd7b   :  { %3499 = vmatpush1.bf16.msra.mxu0 %v6803_v32  ;;  %3540 = vmatpush1.bf16.msra.mxu1 %v6805_v13 }
 0xe1e   :  { %v3413_v56 = vpop.f32.mrf.mxu0  ;;  %v3454_v21 = vpop.f32.mrf.mxu1 }
 0xe1f   :  { %v3461_v19 = vadd.f32 %v3413_v56, %v7141_v0  ;;  %v3463_v4 = vadd.f32 %v3454_v21, %v7143_v59 }
 0xe20   :  { %v3415_v61 = vpop.f32.mrf.mxu0  ;;  %v3456_v11 = vpop.f32.mrf.mxu1 }
 0xe21   :  { %v3465_v9 = vmul.f32 0.5, %v3461_v19  ;;  %v3462_v31 = vadd.f32 %v3415_v61, %v7142_v1  ;;  %v3464_v54 = vadd.f32 %v3456_v11, %v7144_v57 }
 0xe22   :  { %v3417_v36 = vpop.f32.mrf.mxu0  ;;  %v3458_v28 = vpop.f32.mrf.mxu1 }
 0xe23   :  { %5468 = vtanh.f32 %v3465_v9  ;;  %v3469_v14 = vmul.f32 0.5, %v3462_v31  ;;  %v3474_v6 = vmul.f32 0.5, %v3464_v54 }
 0xe24   :  { %v3418_v20 = vpop.f32.mrf.mxu0  ;;  %v3459_v26 = vpop.f32.mrf.mxu1 }
 0xe25   :  { %5470 = vtanh.f32 %v3469_v14 }
 0xe26   :  { %5472 = vtanh.f32 %v3463_v4 }
 0xe27   :  { %5474 = vtanh.f32 %v3474_v6 }
 0xe30   :  { %v5469_v34 = vpop.eup %5468 }
 0xe31   :  { %v3467_v30 = vmul.f32 0.5, %v5469_v34 }
 0xe32   :  { %v5471_v16 = vpop.eup %5470 }
 0xe33   :  { %v3468_v22 = vadd.f32 0.5, %v3467_v30  ;;  %v3471_v40 = vmul.f32 0.5, %v5471_v16  ;;  %v5473_v17 = vpop.eup %5472 }
 0xe34   :  { %v5475_v13 = vpop.eup %5474 }
 0xe35   :  { %v3472_v24 = vadd.f32 0.5, %v3471_v40  ;;  %v3479_v35 = vmul.f32 %v5473_v17, %v3468_v22  ;;  %v3476_v52 = vmul.f32 0.5, %v5475_v13 }
 0xe37   :  { %v3478_v33 = vmul.f32 %v3472_v24, %v6977_v47  ;;  %v3477_v27 = vadd.f32 0.5, %v3476_v52 }
 0xe39   :  { %v3480_v32 = vadd.f32 %v3479_v35, %v3478_v33 }
 0xe3b   :  { %5476 = vtanh.f32 %v3480_v32 }
 0xe48   :  { %v5477_v44 = vpop.eup %5476 }
 0xe49   :  { %v3482_v23 = vmul.f32 %v5477_v44, %v3477_v27 }
 0xe4b   :  { %v3483_v41 = vpack.c.bf16 %v3482_v23, %v3482_v23 }
 0xe4d   :  { %3517 = vmatmul.mubr.bf16.vlgmr.msra.gmra.mxu0 %v3483_v41  ;;  %3558 = vmatmul.mubr.bf16.vlgmr.msra.gmra.mxu1 %v3483_v41 }
 0xf0d   :  { %v3518_v12 = vpop.f32.mrf.mxu0  ;;  %v3559_v58 = vpop.f32.mrf.mxu1 }
 0xf0e   :  { %v3566_v29 = vadd.f32 %v3518_v12, %v7145_v48  ;;  %v3568_v63 = vadd.f32 %v3559_v58, %v7146_v55 }
 0xf0f   :  { %v3520_v51 = vpop.f32.mrf.mxu0  ;;  %v3561_v18 = vpop.f32.mrf.mxu1 }
 0xf10   :  { %v3570_v38 = vmul.f32 0.5, %v3566_v29  ;;  %v3567_v39 = vadd.f32 %v3520_v51, %v6881_v43  ;;  %v3569_v3 = vadd.f32 %v3561_v18, %v7147_v5 }
 0xf11   :  { %v3522_v2 = vpop.f32.mrf.mxu0  ;;  %v3563_v25 = vpop.f32.mrf.mxu1 }
 0xf12   :  { %5478 = vtanh.f32 %v3570_v38  ;;  %v3574_v53 = vmul.f32 0.5, %v3567_v39  ;;  %v3579_v45 = vmul.f32 0.5, %v3569_v3 }
 0xf13   :  { %v3523_v42 = vpop.f32.mrf.mxu0  ;;  %v3564_v46 = vpop.f32.mrf.mxu1 }
 0xf14   :  { %5480 = vtanh.f32 %v3574_v53 }
 0xf15   :  { %5482 = vtanh.f32 %v3568_v63 }
 0xf16   :  { %5484 = vtanh.f32 %v3579_v45 }
 0xf1f   :  { %v5479_v47 = vpop.eup %5478 }
 0xf20   :  { %v3572_v15 = vmul.f32 0.5, %v5479_v47 }
 0xf21   :  { %v5481_v60 = vpop.eup %5480 }
 0xf22   :  { %v3573_v7 = vadd.f32 0.5, %v3572_v15  ;;  %v3576_v49 = vmul.f32 0.5, %v5481_v60  ;;  %v5483_v43 = vpop.eup %5482 }
 0xf23   :  { %v5485_v19 = vpop.eup %5484 }
 0xf24   :  { %v3577_v62 = vadd.f32 0.5, %v3576_v49  ;;  %v3584_v56 = vmul.f32 %v5483_v43, %v3573_v7  ;;  %v3581_v61 = vmul.f32 0.5, %v5485_v19 }
 0xf26   :  { %v3583_v21 = vmul.f32 %v3577_v62, %v3480_v32  ;;  %v3582_v11 = vadd.f32 0.5, %v3581_v61 }
 0xf28   :  { %v3585_v0 = vadd.f32 %v3584_v56, %v3583_v21 }
 0xf2a   :  { %5486 = vtanh.f32 %v3585_v0 }
 0xf37   :  { %v5487_v9 = vpop.eup %5486 }
 0xf38   :  { %v7025_v1 = vmul.f32 %v5487_v9, %v3582_v11 }
 0xf39   :  { %5874 = dma.done.wait [#allocation14 + $0x6], 10240 }
 0xf3a   :  { %5875 = vsyncadd [#allocation14 + $0x6], 4294957056 }
 0xf3b   :  { %5876 = dma.done.wait [#allocation14 + $0x7], 32 }
 0xf3c   :  { %5877 = vsyncadd [#allocation14 + $0x7], 4294967264 }
 0xf3d   :  { %5878 = dma.done.wait [#allocation14 + $0x8], 2048 }
 0xf3e   :  { %5879 = vsyncadd [#allocation14 + $0x8], 4294965248 }
 0xf3f   :  { %5880 = dma.done.wait [#allocation14 + $0x9], 16 }
 0xf40   :  { %5881 = vsyncadd [#allocation14 + $0x9], 4294967280 }
 0xf41   :  { %5882 = dma.done.wait [#allocation14 + $0xa], 1024 }
 0xf42   :  { %5883 = vsyncadd [#allocation14 + $0xa], 4294966272 }
 0xf43   :  { %5884 = dma.done.wait [#allocation14 + $0xb], 16 }
 0xf44   :  { %5885 = vsyncadd [#allocation14 + $0xb], 4294967280  ;;  %4132 = vmatprep.mubr.bf16.mxu0 %v6934_v8  ;;  %4173 = vmatprep.mubr.bf16.mxu1 %v3483_v41  ;;  %v5488_v31 = vld [vmem:[#allocation8 + $0x74] ss:$8 sps:$4 sm:$0xff]   ;;  %v5490_v36 = vld [vmem:[#allocation8 + $0x70] ss:$8 sps:$4 sm:$0xff]  }
 0xf45   :  { %4100 = vmatprep.subr.bf16.mxu0 %v5488_v31  ;;  %v5491_v28 = vld [vmem:[#allocation8 + $0x174] ss:$8 sps:$4 sm:$0xff]   ;;  %v5493_v59 = vld [vmem:[#allocation8 + $0x170] ss:$8 sps:$4 sm:$0xff]   ;;  %v5494_v4 = vld [vmem:[#allocation8 + $0x64] ss:$8 sps:$4 sm:$0xff]  }
 0xf46   :  { %4101 = vmatpush1.bf16.msra.mxu0 %v5490_v36  ;;  %v5496_v14 = vld [vmem:[#allocation8 + $0x60] ss:$8 sps:$4 sm:$0xff]   ;;  %4141 = vmatprep.subr.bf16.mxu1 %v5491_v28  ;;  %v5497_v20 = vld [vmem:[#allocation8 + $0x164] ss:$8 sps:$4 sm:$0xff]   ;;  %v5500_v57 = vld [vmem:[#allocation8 + $0x54] ss:$8 sps:$4 sm:$0xff]  }
 0xf47   :  { %4142 = vmatpush1.bf16.msra.mxu1 %v5493_v59  ;;  %4102 = vmatprep.subr.bf16.mxu0 %v5494_v4  ;;  %v5499_v26 = vld [vmem:[#allocation8 + $0x160] ss:$8 sps:$4 sm:$0xff]   ;;  %v5502_v54 = vld [vmem:[#allocation8 + $0x50] ss:$8 sps:$4 sm:$0xff]   ;;  %v5503_v6 = vld [vmem:[#allocation8 + $0x154] ss:$8 sps:$4 sm:$0xff]  }
 0xf48   :  { %4143 = vmatprep.subr.bf16.mxu1 %v5497_v20  ;;  %v5506_v8 = vld [vmem:[#allocation8 + $0x44] ss:$8 sps:$4 sm:$0xff]   ;;  %v5505_v34 = vld [vmem:[#allocation8 + $0x150] ss:$8 sps:$4 sm:$0xff]   ;;  %v5508_v16 = vld [vmem:[#allocation8 + $0x40] ss:$8 sps:$4 sm:$0xff]  }
 0xf49   :  { %v5509_v30 = vld [vmem:[#allocation8 + $0x144] ss:$8 sps:$4 sm:$0xff]   ;;  %v5512_v22 = vld [vmem:[#allocation8 + $0x34] ss:$8 sps:$4 sm:$0xff]   ;;  %v5511_v40 = vld [vmem:[#allocation8 + $0x140] ss:$8 sps:$4 sm:$0xff]  }
 0xf4a   :  { %4103 = vmatpush1.bf16.msra.mxu0 %v5496_v14  ;;  %v5515_v17 = vld [vmem:[#allocation8 + $0x134] ss:$8 sps:$4 sm:$0xff]   ;;  %v5514_v24 = vld [vmem:[#allocation8 + $0x30] ss:$8 sps:$4 sm:$0xff]   ;;  %v5518_v35 = vld [vmem:[#allocation8 + $0x24] ss:$8 sps:$4 sm:$0xff]  }
 0xf4b   :  { %4104 = vmatprep.subr.bf16.mxu0 %v5500_v57  ;;  %4144 = vmatpush1.bf16.msra.mxu1 %v5499_v26  ;;  %v5517_v33 = vld [vmem:[#allocation8 + $0x130] ss:$8 sps:$4 sm:$0xff]   ;;  %v5521_v32 = vld [vmem:[#allocation8 + $0x124] ss:$8 sps:$4 sm:$0xff]   ;;  %v5520_v13 = vld [vmem:[#allocation8 + $0x20] ss:$8 sps:$4 sm:$0xff]  }
 0xf4c   :  { %4145 = vmatprep.subr.bf16.mxu1 %v5503_v6  ;;  %v5524_v52 = vld [vmem:[#allocation8 + $0x14] ss:$8 sps:$4 sm:$0xff]   ;;  %v5523_v27 = vld [vmem:[#allocation8 + $0x120] ss:$8 sps:$4 sm:$0xff]   ;;  %v5526_v23 = vld [vmem:[#allocation8 + $0x10] ss:$8 sps:$4 sm:$0xff]  }
 0xf4d   :  { %v5527_v44 = vld [vmem:[#allocation8 + $0x114] ss:$8 sps:$4 sm:$0xff]   ;;  %v5530_v41 = vld [vmem:[#allocation8 + $0x4] ss:$8 sps:$4 sm:$0xff]   ;;  %v5529_v12 = vld [vmem:[#allocation8 + $0x110] ss:$8 sps:$4 sm:$0xff]  }
 0xf4e   :  { %4105 = vmatpush1.bf16.msra.mxu0 %v5502_v54  ;;  %v5533_v58 = vld [vmem:[#allocation8 + $0x104] ss:$8 sps:$4 sm:$0xff]   ;;  %v5532_v48 = vld [vmem:[#allocation8] ss:$8 sps:$4 sm:$0xff]   ;;  %v5536_v29 = vld [vmem:[#allocation8 + $0xf4] ss:$8 sps:$4 sm:$0xff]  }
 0xf4f   :  { %4106 = vmatprep.subr.bf16.mxu0 %v5506_v8  ;;  %4146 = vmatpush1.bf16.msra.mxu1 %v5505_v34  ;;  %v5535_v51 = vld [vmem:[#allocation8 + $0x100] ss:$8 sps:$4 sm:$0xff]   ;;  %v5539_v18 = vld [vmem:[#allocation8 + $0x1f4] ss:$8 sps:$4 sm:$0xff]   ;;  %v5538_v38 = vld [vmem:[#allocation8 + $0xf0] ss:$8 sps:$4 sm:$0xff]  }
 0xf50   :  { %4147 = vmatprep.subr.bf16.mxu1 %v5509_v30  ;;  %v5542_v39 = vld [vmem:[#allocation8 + $0xe4] ss:$8 sps:$4 sm:$0xff]   ;;  %v5541_v2 = vld [vmem:[#allocation8 + $0x1f0] ss:$8 sps:$4 sm:$0xff]   ;;  %v5544_v55 = vld [vmem:[#allocation8 + $0xe0] ss:$8 sps:$4 sm:$0xff]  }
 0xf51   :  { %v5545_v25 = vld [vmem:[#allocation8 + $0x1e4] ss:$8 sps:$4 sm:$0xff]   ;;  %v5548_v63 = vld [vmem:[#allocation8 + $0xd4] ss:$8 sps:$4 sm:$0xff]   ;;  %v5547_v53 = vld [vmem:[#allocation8 + $0x1e0] ss:$8 sps:$4 sm:$0xff]  }
 0xf52   :  { %4107 = vmatpush1.bf16.msra.mxu0 %v5508_v16  ;;  %v5551_v42 = vld [vmem:[#allocation8 + $0x1d4] ss:$8 sps:$4 sm:$0xff]   ;;  %v5550_v46 = vld [vmem:[#allocation8 + $0xd0] ss:$8 sps:$4 sm:$0xff]   ;;  %v5554_v5 = vld [vmem:[#allocation8 + $0xc4] ss:$8 sps:$4 sm:$0xff]  }
 0xf53   :  { %4108 = vmatprep.subr.bf16.mxu0 %v5512_v22  ;;  %4148 = vmatpush1.bf16.msra.mxu1 %v5511_v40  ;;  %v5553_v3 = vld [vmem:[#allocation8 + $0x1d0] ss:$8 sps:$4 sm:$0xff]   ;;  %v5557_v45 = vld [vmem:[#allocation8 + $0x1c4] ss:$8 sps:$4 sm:$0xff]   ;;  %v5556_v47 = vld [vmem:[#allocation8 + $0xc0] ss:$8 sps:$4 sm:$0xff]  }
 0xf54   :  { %4149 = vmatprep.subr.bf16.mxu1 %v5515_v17  ;;  %v5560_v15 = vld [vmem:[#allocation8 + $0xb4] ss:$8 sps:$4 sm:$0xff]   ;;  %v5559_v60 = vld [vmem:[#allocation8 + $0x1c0] ss:$8 sps:$4 sm:$0xff]   ;;  %v5562_v49 = vld [vmem:[#allocation8 + $0xb0] ss:$8 sps:$4 sm:$0xff]   ;;  %v3687_v17 = vpack.c.bf16 %v7025_v1, %v7025_v1 }
 0xf55   :  { %v5563_v7 = vld [vmem:[#allocation8 + $0x1b4] ss:$8 sps:$4 sm:$0xff]   ;;  %v5566_v43 = vld [vmem:[#allocation8 + $0xa4] ss:$8 sps:$4 sm:$0xff]   ;;  %v5565_v62 = vld [vmem:[#allocation8 + $0x1b0] ss:$8 sps:$4 sm:$0xff]  }
 0xf56   :  { %4109 = vmatpush1.bf16.msra.mxu0 %v5514_v24  ;;  %v5569_v56 = vld [vmem:[#allocation8 + $0x1a4] ss:$8 sps:$4 sm:$0xff]   ;;  %v5568_v21 = vld [vmem:[#allocation8 + $0xa0] ss:$8 sps:$4 sm:$0xff]   ;;  %v5572_v19 = vld [vmem:[#allocation8 + $0x94] ss:$8 sps:$4 sm:$0xff]  }
 0xf57   :  { %4110 = vmatprep.subr.bf16.mxu0 %v5518_v35  ;;  %4150 = vmatpush1.bf16.msra.mxu1 %v5517_v33  ;;  %v5571_v0 = vld [vmem:[#allocation8 + $0x1a0] ss:$8 sps:$4 sm:$0xff]   ;;  %v5574_v61 = vld [vmem:[#allocation8 + $0x90] ss:$8 sps:$4 sm:$0xff]   ;;  %v5575_v11 = vld [vmem:[#allocation8 + $0x194] ss:$8 sps:$4 sm:$0xff]  }
 0xf58   :  { %4151 = vmatprep.subr.bf16.mxu1 %v5521_v32  ;;  %v5578_v9 = vld [vmem:[#allocation8 + $0x84] ss:$8 sps:$4 sm:$0xff]   ;;  %v5577_v31 = vld [vmem:[#allocation8 + $0x190] ss:$8 sps:$4 sm:$0xff]   ;;  %v5580_v28 = vld [vmem:[#allocation8 + $0x80] ss:$8 sps:$4 sm:$0xff]  }
 0xf59   :  { %v5581_v36 = vld [vmem:[#allocation8 + $0x184] ss:$8 sps:$4 sm:$0xff]   ;;  %v5586_v59 = vld [vmem:[#allocation8 + $0x274] ss:$8 sps:$4 sm:$0xff]   ;;  %v5583_v4 = vld [vmem:[#allocation8 + $0x180] ss:$8 sps:$4 sm:$0xff]  }
 0xf5a   :  { %4111 = vmatpush1.bf16.msra.mxu0 %v5520_v13  ;;  %v5584_v14 = vld [vmem:[#allocation8 + $0x270] ss:$8 sps:$4 sm:$0xff]   ;;  %v5589_v20 = vld [vmem:[#allocation8 + $0x264] ss:$8 sps:$4 sm:$0xff]   ;;  %v5587_v26 = vld [vmem:[#allocation8 + $0x260] ss:$8 sps:$4 sm:$0xff]  }
 0xf5b   :  { %4112 = vmatprep.subr.bf16.mxu0 %v5524_v52  ;;  %4152 = vmatpush1.bf16.msra.mxu1 %v5523_v27  ;;  %v5592_v57 = vld [vmem:[#allocation8 + $0x254] ss:$8 sps:$4 sm:$0xff]   ;;  %v5590_v54 = vld [vmem:[#allocation8 + $0x250] ss:$8 sps:$4 sm:$0xff]   ;;  %v5595_v6 = vld [vmem:[#allocation8 + $0x244] ss:$8 sps:$4 sm:$0xff]  }
 0xf5c   :  { %4153 = vmatprep.subr.bf16.mxu1 %v5527_v44  ;;  %v5593_v8 = vld [vmem:[#allocation8 + $0x240] ss:$8 sps:$4 sm:$0xff]   ;;  %v5598_v34 = vld [vmem:[#allocation8 + $0x234] ss:$8 sps:$4 sm:$0xff]   ;;  %v5596_v30 = vld [vmem:[#allocation8 + $0x230] ss:$8 sps:$4 sm:$0xff]  }
 0xf5d   :  { %v5601_v16 = vld [vmem:[#allocation8 + $0x224] ss:$8 sps:$4 sm:$0xff]   ;;  %v5604_v22 = vld [vmem:[#allocation8 + $0x214] ss:$8 sps:$4 sm:$0xff]   ;;  %v5605_v40 = vld [vmem:[#allocation8 + $0x200] ss:$8 sps:$4 sm:$0xff]  }
 0xf5e   :  { %4113 = vmatpush1.bf16.msra.mxu0 %v5526_v23  ;;  %v5608_v24 = vld [vmem:[#allocation10 + $0x78] sm:$0xff]   ;;  %v5610_v33 = vld [vmem:[#allocation10 + $0x70] sm:$0xff]   ;;  %v5612_v13 = vld [vmem:[#allocation10 + $0x68] sm:$0xff]   ;;  %vm5904_vm0 = vmmov 0   ;;  %s5905_s3 = smov [#allocation21]  }
 0xf5f   :  { %4114 = vmatprep.subr.bf16.mxu0 %v5530_v41  ;;  %4154 = vmatpush1.bf16.msra.mxu1 %v5529_v12  ;;  %v5609_v35 = vld [vmem:[#allocation10 + $0x38] sm:$0xff]   ;;  %v5611_v32 = vld [vmem:[#allocation10 + $0x30] sm:$0xff]   ;;  %v5613_v52 = vld [vmem:[#allocation10 + $0x28] sm:$0xff]   ;;  %s4522_s15 = sshll.u32 %s5905_s3, 4  ;;  %s4523_s15 = int_to_ptr.vmem [resolvable:$true] %s4522_s15 }
 0xf60   :  { %4155 = vmatprep.subr.bf16.mxu1 %v5533_v58  ;;  %v5614_v27 = vld [vmem:[#allocation10 + $0x60] sm:$0xff]   ;;  %v5616_v23 = vld [vmem:[#allocation10 + $0x58] sm:$0xff]   ;;  %v5618_v41 = vld [vmem:[#allocation10 + $0x50] sm:$0xff]   ;;  %s5838_s5 = scalar_lea.vmem %s4523_s15, 128  ;;  %p5843_p9 = scmp.lt.s32.totalorder %s4523_s15, %s4523_s15 }
 0xf61   :  { %v5615_v44 = vld [vmem:[#allocation10 + $0x20] sm:$0xff]   ;;  %v5617_v1 = vld [vmem:[#allocation10 + $0x18] sm:$0xff]   ;;  %v5619_v12 = vld [vmem:[#allocation10 + $0x10] sm:$0xff]   ;;  %p5839_p8 = scmp.ne.s32.totalorder %s4523_s15, %s5838_s5  ;;  %p5844_p10 = scmp.lt.s32.totalorder %s5838_s5, %s5838_s5 }
 0xf62   :  { %4115 = vmatpush1.bf16.msra.mxu0 %v5532_v48  ;;  %v5620_v58 = vld [vmem:[#allocation10 + $0x48] sm:$0xff]  }
 0xf63   :  { %4116 = vmatprep.subr.bf16.mxu0 %v5536_v29  ;;  %4156 = vmatpush1.bf16.msra.mxu1 %v5535_v51  ;;  %v5621_v48 = vld [vmem:[#allocation10 + $0x8] sm:$0xff]   ;;  %v5622_v29 = vld [vmem:[#allocation10 + $0x40] sm:$0xff]   ;;  %p5845_p11 = por %p5844_p10, %p5843_p9 }
 0xf64   :  { %4157 = vmatprep.subr.bf16.mxu1 %v5539_v18  ;;  %v5623_v51 = vld [vmem:[#allocation10] sm:$0xff]  }
 0xf65   :  { %v5624_v18 = vld [vmem:[#allocation12 + $0x38] sm:$0xff]   ;;  %p5846_p12 = pnand %p5845_p11, %p5839_p8 }
 0xf66   :  { %4117 = vmatpush2.bf16.msra.mxu0 %v5538_v38  ;;  %v5903_v38 = vmov 0.0  }
 0xf67   :  { %4118 = vmatprep.subr.bf16.mxu0 %v5542_v39  ;;  %4158 = vmatpush2.bf16.msra.mxu1 %v5541_v2  ;;  %v5625_v39 = vld [vmem:[#allocation12 + $0x30] sm:$0xff]  }
 0xf68   :  { %4159 = vmatprep.subr.bf16.mxu1 %v5545_v25 }
 0xf6a   :  { %4119 = vmatpush2.bf16.msra.mxu0 %v5544_v55 }
 0xf6b   :  { %4120 = vmatprep.subr.bf16.mxu0 %v5548_v63  ;;  %4160 = vmatpush2.bf16.msra.mxu1 %v5547_v53 }
 0xf6c   :  { %4161 = vmatprep.subr.bf16.mxu1 %v5551_v42 }
 0xf6e   :  { %4121 = vmatpush2.bf16.msra.mxu0 %v5550_v46 }
 0xf6f   :  { %4122 = vmatprep.subr.bf16.mxu0 %v5554_v5  ;;  %4162 = vmatpush2.bf16.msra.mxu1 %v5553_v3  ;;  %v3688_v3 = vld [vmem:[#allocation9] sm:$0x3] }
 0xf70   :  { %4163 = vmatprep.subr.bf16.mxu1 %v5557_v45  ;;  %v7148_v45 = vld [vmem:[#allocation59_spill] sm:$0xff] }
 0xf72   :  { %4123 = vmatpush2.bf16.msra.mxu0 %v5556_v47  ;;  %v3693_v47 = vrot.slane %v3688_v3, %v7148_v45 }
 0xf73   :  { %4124 = vmatprep.subr.bf16.mxu0 %v5560_v15  ;;  %4164 = vmatpush2.bf16.msra.mxu1 %v5559_v60  ;;  %v7149_v15 = vld [vmem:[#allocation61_spill] sm:$0xff] }
 0xf74   :  { %4165 = vmatprep.subr.bf16.mxu1 %v5563_v7  ;;  %v3697_v60 = vrot.slane %v3688_v3, %v7149_v15 }
 0xf76   :  { %4125 = vmatpush2.bf16.msra.mxu0 %v5562_v49 }
 0xf77   :  { %4126 = vmatprep.subr.bf16.mxu0 %v5566_v43  ;;  %4166 = vmatpush2.bf16.msra.mxu1 %v5565_v62 }
 0xf78   :  { %4167 = vmatprep.subr.bf16.mxu1 %v5569_v56 }
 0xf7a   :  { %4127 = vmatpush2.bf16.msra.mxu0 %v5568_v21 }
 0xf7b   :  { %4128 = vmatprep.subr.bf16.mxu0 %v5572_v19  ;;  %4168 = vmatpush2.bf16.msra.mxu1 %v5571_v0 }
 0xf7c   :  { %4169 = vmatprep.subr.bf16.mxu1 %v5575_v11 }
 0xf7e   :  { %4129 = vmatpush2.bf16.msra.mxu0 %v5574_v61 }
 0xf7f   :  { %4130 = vmatprep.subr.bf16.mxu0 %v5578_v9  ;;  %4170 = vmatpush2.bf16.msra.mxu1 %v5577_v31 }
 0xf80   :  { %4171 = vmatprep.subr.bf16.mxu1 %v5581_v36 }
 0xf82   :  { %4131 = vmatpush2.bf16.msra.mxu0 %v5580_v28 }
 0xf83   :  { %4182 = vmatprep.subr.bf16.mxu0 %v5586_v59  ;;  %4172 = vmatpush2.bf16.msra.mxu1 %v5583_v4  ;;  %v5626_v59 = vld [vmem:[#allocation12 + $0x28] sm:$0xff]   ;;  %v5627_v4 = vld [vmem:[#allocation12 + $0x20] sm:$0xff]  }
 0xf84   :  { %4978 = vmatprep.subr.bf16.mxu1 %v5608_v24 }
 0xf85   :  { %4133 = vmatmul.mubr.bf16.vlgmr.msra.gmra.mxu0 %v6888_v10  ;;  %v5599_v10 = vld [vmem:[#allocation8 + $0x220] ss:$8 sps:$4 sm:$0xff]  }
 0xf86   :  { %4183 = vmatpush1.bf16.msra.mxu0 %v5584_v14  ;;  %4214 = vmatprep.mubr.bf16.mxu0 %v7081_v50  ;;  %v5602_v50 = vld [vmem:[#allocation8 + $0x210] ss:$8 sps:$4 sm:$0xff]  }
 0xf87   :  { %4174 = vmatmul.mubr.bf16.vlgmr.msra.gmra.mxu1 %v6980_v37  ;;  %4184 = vmatprep.subr.bf16.mxu0 %v5589_v20  ;;  %v5607_v37 = vld [vmem:[#allocation8 + $0x204] ss:$8 sps:$4 sm:$0xff]   ;;  %v5628_v14 = vld [vmem:[#allocation12 + $0x18] sm:$0xff]   ;;  %v5629_v20 = vld [vmem:[#allocation12 + $0x10] sm:$0xff]  }
 0xf88   :  { %4979 = vmatpush3.bf16.msra.mxu1 %v5609_v35 }
 0xf89   :  { %4980 = vmatprep.subr.bf16.mxu1 %v5610_v33 }
 0xf8a   :  { %4185 = vmatpush1.bf16.msra.mxu0 %v5587_v26  ;;  %v5630_v26 = vld [vmem:[#allocation12 + $0x8] sm:$0xff]  }
 0xf8b   :  { %4186 = vmatprep.subr.bf16.mxu0 %v5592_v57  ;;  %v5631_v57 = vld [vmem:[#allocation12] sm:$0xff]  }
 0xf8c   :  { %4981 = vmatpush3.bf16.msra.mxu1 %v5611_v32 }
 0xf8d   :  { %4982 = vmatprep.subr.bf16.mxu1 %v5612_v13 }
 0xf8e   :  { %4187 = vmatpush1.bf16.msra.mxu0 %v5590_v54 }
 0xf8f   :  { %4188 = vmatprep.subr.bf16.mxu0 %v5595_v6  ;;  %v4940_v6 = vld [vmem:[#allocation11] ss:$0 sm:$0xff] }
 0xf90   :  { %4983 = vmatpush3.bf16.msra.mxu1 %v5613_v52 }
 0xf91   :  { %4984 = vmatprep.subr.bf16.mxu1 %v5614_v27 }
 0xf92   :  { %4189 = vmatpush1.bf16.msra.mxu0 %v5593_v8 }
 0xf93   :  { %4190 = vmatprep.subr.bf16.mxu0 %v5598_v34 }
 0xf94   :  { %4985 = vmatpush3.bf16.msra.mxu1 %v5615_v44 }
 0xf95   :  { %4986 = vmatprep.subr.bf16.mxu1 %v5616_v23 }
 0xf96   :  { %4191 = vmatpush1.bf16.msra.mxu0 %v5596_v30 }
 0xf97   :  { %4192 = vmatprep.subr.bf16.mxu0 %v5601_v16 }
 0xf98   :  { %4987 = vmatpush3.bf16.msra.mxu1 %v5617_v1 }
 0xf99   :  { %4988 = vmatprep.subr.bf16.mxu1 %v5618_v41 }
 0xf9a   :  { %4193 = vmatpush1.bf16.msra.mxu0 %v5599_v10 }
 0xf9b   :  { %4194 = vmatprep.subr.bf16.mxu0 %v5604_v22 }
 0xf9c   :  { %4989 = vmatpush3.bf16.msra.mxu1 %v5619_v12 }
 0xf9d   :  { %4990 = vmatprep.subr.bf16.mxu1 %v5620_v58 }
 0xf9e   :  { %4195 = vmatpush1.bf16.msra.mxu0 %v5602_v50 }
 0xf9f   :  { %4196 = vmatprep.subr.bf16.mxu0 %v5607_v37  ;;  %v4957_v37 = vld [vmem:[#allocation13] ss:$0 sm:$0xff] }
 0xfa0   :  { %4991 = vmatpush3.bf16.msra.mxu1 %v5621_v48 }
 0xfa1   :  { %4992 = vmatprep.subr.bf16.mxu1 %v5622_v29 }
 0xfa2   :  { %4197 = vmatpush1.bf16.msra.mxu0 %v5605_v40 }
 0xfa3   :  { %5009 = vmatprep.subr.bf16.mxu0 %v5903_v38 }
 0xfa4   :  { %4993 = vmatpush3.bf16.msra.mxu1 %v5623_v51 }
 0xfa5   :  { %4215 = vmatmul.mubr.bf16.vlgmr.msra.gmra.mxu0 %v3687_v17 }
 0xfa6   :  { %5010 = vmatpush3.bf16.msra.mxu0 %v5624_v18  ;;  %5025 = vmatprep.mubr.msk.bf16.mxu0 %vm5904_vm0, %v5903_v38 }
 0xfa7   :  { %5011 = vmatprep.subr.bf16.mxu0 %v5903_v38 }
 0xfaa   :  { %5012 = vmatpush3.bf16.msra.mxu0 %v5625_v39 }
 0xfab   :  { %5013 = vmatprep.subr.bf16.mxu0 %v5903_v38 }
 0xfae   :  { %5014 = vmatpush3.bf16.msra.mxu0 %v5626_v59 }
 0xfaf   :  { %5015 = vmatprep.subr.bf16.mxu0 %v5903_v38 }
 0xfb2   :  { %5016 = vmatpush3.bf16.msra.mxu0 %v5627_v4 }
 0xfb3   :  { %5017 = vmatprep.subr.bf16.mxu0 %v5903_v38 }
 0xfb6   :  { %5018 = vmatpush3.bf16.msra.mxu0 %v5628_v14 }
 0xfb7   :  { %5019 = vmatprep.subr.bf16.mxu0 %v5903_v38 }
 0xfba   :  { %5020 = vmatpush3.bf16.msra.mxu0 %v5629_v20 }
 0xfbb   :  { %5021 = vmatprep.subr.bf16.mxu0 %v5903_v38 }
 0xfbe   :  { %5022 = vmatpush3.bf16.msra.mxu0 %v5630_v26 }
 0xfbf   :  { %5023 = vmatprep.subr.bf16.mxu0 %v5903_v38 }
 0xfc2   :  { %5024 = vmatpush3.bf16.msra.mxu0 %v5631_v57 }
0x1045   :  { %v4134_v2 = vpop.f32.mrf.mxu0 }
0x1046   :  { %v4135_v7 = vadd.f32 %v4134_v2, %v3693_v47 }
0x1047   :  { %v4136_v25 = vpop.f32.mrf.mxu0  ;;  %v4175_v55 = vpop.f32.mrf.mxu1 }
0x1048   :  { %v4137_v49 = vadd.f32 %v4136_v25, %v3697_v60  ;;  %v4176_v43 = vadd.f32 %v4175_v55, %v4135_v7 }
0x1049   :  { %v4138_v63 = vpop.f32.mrf.mxu0  ;;  %v4177_v53 = vpop.f32.mrf.mxu1 }
0x104a   :  { %v4178_v56 = vadd.f32 %v4177_v53, %v4137_v49 }
0x104b   :  { %v4139_v42 = vpop.f32.mrf.mxu0  ;;  %v4179_v46 = vpop.f32.mrf.mxu1 }
0x104d   :  { %v4180_v5 = vpop.f32.mrf.mxu1 }
0x1065   :  { %v4216_v62 = vpop.f32.mrf.mxu0 }
0x1066   :  { %v4217_v21 = vadd.f32 %v4216_v62, %v4176_v43 }
0x1067   :  { %v4218_v0 = vpop.f32.mrf.mxu0 }
0x1068   :  { %v4219_v19 = vadd.f32 %v4218_v0, %v4178_v56  ;;  %5632 = vtanh.f32 %v4217_v21 }
0x1069   :  { %v4220_v61 = vpop.f32.mrf.mxu0 }
0x106a   :  { %5634 = vtanh.f32 %v4219_v19 }
0x106b   :  { %v4221_v11 = vpop.f32.mrf.mxu0 }
0x1075   :  { %v5633_v9 = vpop.eup %5632 }
0x1076   :  { %v4257_v28 = vpack.c.bf16 %v5633_v9, %v5633_v9 }
0x1077   :  { %v5635_v31 = vpop.eup %5634 }
0x1078   :  { %v4258_v36 = vpack.c.bf16 %v5635_v31, %v5635_v31 }
0x107a   :  { %4394 = vmatprep.mubr.bf16.mxu1 %v4258_v36 }
0x107b   :  { %4395 = vmatmul.mubr.bf16.vlgmr.msra.gmra.mxu1 %v4257_v28 }
0x113b   :  { %v4994_v54 = vpop.f32.mrf.mxu1 }
0x113d   :  { %v4995_v8 = vpop.f32.mrf.mxu1 }
0x113e   :  { %v4996_v34 = vadd.f32 %v4995_v8, %v4994_v54 }
0x113f   :  { %v4997_v30 = vpop.f32.mrf.mxu1 }
0x1140   :  { %v4397_v16 = vadd.f32 %v4996_v34, %v4940_v6 }
0x1141   :  { %v4998_v10 = vpop.f32.mrf.mxu1 }
0x1142   :  { %5636 = vtanh.f32 %v4397_v16 }
0x114f   :  { %v5637_v22 = vpop.eup %5636 }
0x1150   :  { %v4419_v50 = vpack.c.bf16 %v5637_v22, %v5637_v22 }
0x1152   :  { %5026 = vmatmul.mubr.bf16.vlgmr.msra.gmra.mxu0 %v4419_v50 }
0x1212   :  { %v4509_v40 = vpop.f32.mrf.mxu0 }
0x1213   :  { %v4510_v17 = vadd.f32 %v4957_v37, %v4509_v40 }
0x1214   :  { %v5027_v24 = vpop.f32.mrf.mxu0 }
0x1215   :  { %4515 = vst [vmem:[#allocation21] sm:$0xff] %v4510_v17 }
0x1216   :  { %v4512_v35 = vpop.f32.mrf.mxu0 }
0x1217   :  { %5849 = shalt.err (!%p5846_p12)
}
0x1218   :  { %4525 = dma.vmem_to_hbm [thread:$0]  %s4523_s15, 128, %s7054_s16, [#allocation17]   ;;  %v5028_v33 = vpop.f32.mrf.mxu0 }
0x1219   :  { %5886 = dma.done.wait [#allocation17], 128  }
0x121a   :  { %5887 = vsyncadd [#allocation17], 4294967168 }
0x121b   :  { %4529 = vsyncpa [#allocation16], 1 }
0x121c   :  { %4530 = vsyncpa [#allocation19], 1 }
0x121d   :  { %4531 = vsyncpa [#allocation17], 1 }
0x121e   :  { %4532 = vsyncmov [#allocation14] }
0x1221   :  { %s4533_s9 = vpop.sfrf %4532 }
0x1222   :  { %p4966_p13 = scmp.ne.s32.totalorder %s4533_s9, 0 }
0x1224   :  { %4537 = shalt.err (%p4966_p13)  }
0x1225   :  { %4539 = vsyncmov [#allocation14 + $0x1] }
0x1228   :  { %s4540_s29 = vpop.sfrf %4539 }
0x1229   :  { %p4967_p0 = scmp.ne.s32.totalorder %s4540_s29, 0 }
0x122b   :  { %4544 = shalt.err (%p4967_p0)  }
0x122c   :  { %4546 = vsyncmov [#allocation14 + $0x2] }
0x122f   :  { %s4547_s30 = vpop.sfrf %4546 }
0x1230   :  { %p4968_p1 = scmp.ne.s32.totalorder %s4547_s30, 0 }
0x1232   :  { %4551 = shalt.err (%p4968_p1)  }
0x1233   :  { %4553 = vsyncmov [#allocation14 + $0x3] }
0x1236   :  { %s4554_s16 = vpop.sfrf %4553 }
0x1237   :  { %p4969_p2 = scmp.ne.s32.totalorder %s4554_s16, 0 }
0x1239   :  { %4558 = shalt.err (%p4969_p2)  }
0x123a   :  { %4560 = vsyncmov [#allocation14 + $0x4] }
0x123d   :  { %s4561_s0 = vpop.sfrf %4560 }
0x123e   :  { %p4970_p3 = scmp.ne.s32.totalorder %s4561_s0, 0 }
0x1240   :  { %4565 = shalt.err (%p4970_p3)  }
0x1241   :  { %4567 = vsyncmov [#allocation14 + $0x5] }
0x1244   :  { %s4568_s17 = vpop.sfrf %4567 }
0x1245   :  { %p4971_p4 = scmp.ne.s32.totalorder %s4568_s17, 0 }
0x1247   :  { %4572 = shalt.err (%p4971_p4)  }
0x1248   :  { %4574 = vsyncmov [#allocation14 + $0x6] }
0x124b   :  { %s4575_s18 = vpop.sfrf %4574 }
0x124c   :  { %p4972_p5 = scmp.ne.s32.totalorder %s4575_s18, 0 }
0x124e   :  { %4579 = shalt.err (%p4972_p5)  }
0x124f   :  { %4581 = vsyncmov [#allocation14 + $0x7] }
0x1252   :  { %s4582_s7 = vpop.sfrf %4581 }
0x1253   :  { %p4973_p6 = scmp.ne.s32.totalorder %s4582_s7, 0 }
0x1255   :  { %4586 = shalt.err (%p4973_p6)  }
0x1256   :  { %4588 = vsyncmov [#allocation14 + $0x8] }
0x1259   :  { %s4589_s2 = vpop.sfrf %4588 }
0x125a   :  { %p4974_p7 = scmp.ne.s32.totalorder %s4589_s2, 0 }
0x125c   :  { %4593 = shalt.err (%p4974_p7)  }
0x125d   :  { %4595 = vsyncmov [#allocation14 + $0x9] }
0x1260   :  { %s4596_s24 = vpop.sfrf %4595 }
0x1261   :  { %p4975_p8 = scmp.ne.s32.totalorder %s4596_s24, 0 }
0x1263   :  { %4600 = shalt.err (%p4975_p8)  }
0x1264   :  { %4602 = vsyncmov [#allocation14 + $0xa] }
0x1267   :  { %s4603_s8 = vpop.sfrf %4602 }
0x1268   :  { %p4976_p9 = scmp.ne.s32.totalorder %s4603_s8, 0 }
0x126a   :  { %4607 = shalt.err (%p4976_p9)  }
0x126b   :  { %4609 = vsyncmov [#allocation14 + $0xb] }
0x126e   :  { %s4610_s25 = vpop.sfrf %4609 }
0x126f   :  { %p4977_p10 = scmp.ne.s32.totalorder %s4610_s25, 0 }
0x1271   :  { %4614 = shalt.err (%p4977_p10)  }

</bundles_post_ra>
